<compile_context>
chip_gen: v6e
topology: v6e:2x2x1
jax: 0.10.0
libtpu: 0.0.40
codegen_flags: <defaults>
</compile_context>

<pallas_src>
import functools

import jax
import jax.numpy as jnp
from jax import lax
from jax.experimental import pallas as pl
from jax.experimental.pallas import tpu as pltpu


def _convnext_kernel(x_hbm, dw_w_ref, dw_b_ref, ln_w_ref, ln_b_ref,
                     w1_ref, b1_ref, w2_ref, b2_ref, gamma_ref,
                     o_ref, xbuf, sem,
                     *, TT, TTH, nT, eps, approx_gelu):
    # x_hbm : (B, Tpad, C) float32 in HBM (pl.ANY) — padded, channels-last.
    # xbuf  : (2, TTH, C) float32 VMEM double buffer for the halo'd window.
    # sem   : DMA semaphores, one per slot.
    b = pl.program_id(0)
    i = pl.program_id(1)
    slot = lax.rem(i, 2)

    def win_copy(t_idx, slot_idx):
        start = t_idx * TT
        if TT % 8 == 0 and not isinstance(start, int):
            start = pl.multiple_of(start, 8)        # sublane-aligned DMA start
        return pltpu.make_async_copy(
            x_hbm.at[b, pl.ds(start, TTH), :],
            xbuf.at[slot_idx],
            sem.at[slot_idx])

    # Prime the pipeline at the start of each batch row's time loop (this also
    # keeps the DMA carry from ever crossing a "parallel" batch boundary).
    @pl.when(i == 0)
    def _():
        win_copy(0, 0).start()

    # Prefetch the next time tile of the same batch row into the other slot.
    @pl.when(i + 1 < nT)
    def _():
        win_copy(i + 1, 1 - slot).start()

    # Wait for the current window (descriptor matches the copy that filled it).
    win_copy(i, slot).wait()

    xw = xbuf.at[slot]                                   # (TTH, C) ref view

    # ---- depthwise Conv1d, kernel_size=7, padding=3, groups=C --------------
    # Taps are streamed straight from the ref; no (TTH, C) value materialized.
    dww = dw_w_ref[...]                                  # (7, C), loaded once
    y = xw[pl.ds(0, TT), :] * dww[0, :]
    for k in range(1, 7):                                # static unroll
        y = y + xw[pl.ds(k, TT), :] * dww[k, :]
    y = y + dw_b_ref[0, :]

    # ---- LayerNorm over channels (eps=1e-6, biased var), one fused pass ----
    mean = jnp.mean(y, axis=-1, keepdims=True)           # (TT, 1)
    msq = jnp.mean(y * y, axis=-1, keepdims=True)
    var = msq - mean * mean
    y = (y - mean) * lax.rsqrt(var + eps)
    y = y * ln_w_ref[0, :] + ln_b_ref[0, :]

    # ---- pwconv1 (Linear C -> I) + GELU: bf16 MXU operands, f32 acc --------
    h = jnp.dot(y.astype(jnp.bfloat16), w1_ref[...],
                preferred_element_type=jnp.float32)
    h = h + b1_ref[0, :]
    if approx_gelu:
        h = 0.5 * h * (1.0 + jnp.tanh(0.7978845608028654
                                      * (h + 0.044715 * h * h * h)))
    else:  # exact erf GELU == PyTorch nn.GELU() default
        h = 0.5 * h * (1.0 + lax.erf(h * 0.7071067811865476))

    # ---- pwconv2 (Linear I -> C): bf16 MXU operands, f32 acc ---------------
    z = jnp.dot(h.astype(jnp.bfloat16), w2_ref[...],
                preferred_element_type=jnp.float32)
    z = z + b2_ref[0, :]

    # ---- layer scale + residual (re-read from the resident window) ---------
    res = xw[pl.ds(3, TT), :]
    o_ref[0] = res + gamma_ref[0, :] * z


def _vmem_limit_bytes():
    # Generation-aware VMEM budget (v5e/v6e: 128 MiB phys, v7x: 64 MiB).
    try:
        cap = int(pltpu.get_tpu_info().vmem_capacity_bytes)
    except Exception:
        cap = 64 * 1024 * 1024
    return min((cap * 3) // 4, 96 * 1024 * 1024)


def _pick_time_tile(T, time_tile):
    """Largest tile <= time_tile that divides T and is a multiple of 8, so no
    post-kernel slice pass is needed; falls back to pad+slice for ragged T."""
    TT = min(int(time_tile), T)
    if T % TT != 0:
        d = next((d for d in range(TT, 7, -1) if T % d == 0 and d % 8 == 0),
                 None)
        if d is not None:
            TT = d
        else:
            TT = max(8, (TT // 8) * 8)   # ragged fallback (output sliced)
    return TT


def convnext_block(x_nct, params, *, eps=1e-6, time_tile=512,
                   approx_gelu=False):
    """x_nct: (B, C, T) float32. Returns (B, C, T)."""
    B, C, T = x_nct.shape
    I = params["w1"].shape[1]

    TT = _pick_time_tile(T, time_tile)
    nT = pl.cdiv(T, TT)
    Tp = nT * TT
    TTH = TT + 8                           # tile + 3-halo each side, 8-aligned

    # Channels-last + conv zero-padding (padding=3).  Left pad 3, right pad
    # 5 + (Tp - T) so every window DMA of length TTH stays in bounds; padded
    # rows past T are zeros (matching Conv1d padding) and only feed outputs
    # that are discarded.  This is the only wrapper-side activation pass.
    x_btc = jnp.transpose(x_nct, (0, 2, 1)).astype(jnp.float32)      # (B,T,C)
    x_pad = jnp.pad(x_btc, ((0, 0), (3, 5 + Tp - T), (0, 0)))        # (B,Tp+8,C)

    # MXU wants bf16 operands; cast the matmul weights once here.
    w1_bf = params["w1"].astype(jnp.bfloat16)
    w2_bf = params["w2"].astype(jnp.bfloat16)

    kernel = functools.partial(_convnext_kernel, TT=TT, TTH=TTH, nT=nT,
                               eps=eps, approx_gelu=approx_gelu)

    def rep(shape):
        # replicated (weight) blocks: constant index_map -> DMA'd only once
        return pl.BlockSpec(shape, lambda b, i: tuple(0 for _ in shape))

    out_btc = pl.pallas_call(
        kernel,
        out_shape=jax.ShapeDtypeStruct((B, Tp, C), jnp.float32),
        grid_spec=pltpu.PrefetchScalarGridSpec(
            num_scalar_prefetch=0,
            grid=(B, nT),
            in_specs=[
                pl.BlockSpec(memory_space=pl.ANY),   # x_pad stays in HBM
                rep((7, C)),      # dwconv weight
                rep((1, C)),      # dwconv bias
                rep((1, C)),      # ln weight
                rep((1, C)),      # ln bias
                rep((C, I)),      # pwconv1 weight (bf16)
                rep((1, I)),      # pwconv1 bias
                rep((I, C)),      # pwconv2 weight (bf16)
                rep((1, C)),      # pwconv2 bias
                rep((1, C)),      # gamma
            ],
            out_specs=pl.BlockSpec((1, TT, C), lambda b, i: (b, i, 0)),
            scratch_shapes=[
                pltpu.VMEM((2, TTH, C), jnp.float32),   # window double buffer
                pltpu.SemaphoreType.DMA((2,)),
            ]),
        compiler_params=pltpu.CompilerParams(
            # time axis is "arbitrary": it carries the manual DMA double-buffer
            # state; batch stays "parallel" for megacore/multi-TC sharding.
            dimension_semantics=("parallel", "arbitrary"),
            vmem_limit_bytes=_vmem_limit_bytes(),
        ),
    )(x_pad, params["dw_w"], params["dw_b"], params["ln_w"], params["ln_b"],
      w1_bf, params["b1"], w2_bf, params["b2"], params["gamma"])

    if Tp != T:                       # only for ragged T with no nice divisor
        out_btc = out_btc[:, :T, :]
    return jnp.transpose(out_btc, (0, 2, 1))             # back to (B, C, T)


def convnext_block_ref(x_nct, params, *, eps=1e-6, matmul_dtype=jnp.float32):
    """Pure-JAX reference of the PyTorch forward. matmul_dtype=bfloat16 mimics
    the kernel's bf16 MXU operands (f32 accumulate) for tight verification."""
    x = jnp.transpose(x_nct, (0, 2, 1))                  # (B, T, C)
    residual = x
    B, T, C = x.shape
    zpad = jnp.zeros((B, 3, C), x.dtype)
    xpad = jnp.concatenate([zpad, x, zpad], axis=1)
    y = sum(xpad[:, k:k + T, :] * params["dw_w"][k, :] for k in range(7))
    y = y + params["dw_b"][0]
    mean = jnp.mean(y, -1, keepdims=True)
    var = jnp.mean((y - mean) ** 2, -1, keepdims=True)
    y = (y - mean) / jnp.sqrt(var + eps) * params["ln_w"][0] + params["ln_b"][0]
    h = jnp.dot(y.astype(matmul_dtype), params["w1"].astype(matmul_dtype),
                preferred_element_type=jnp.float32) + params["b1"][0]
    h = 0.5 * h * (1.0 + lax.erf(h * 0.7071067811865476))
    z = jnp.dot(h.astype(matmul_dtype), params["w2"].astype(matmul_dtype),
                preferred_element_type=jnp.float32) + params["b2"][0]
    z = params["gamma"][0] * z
    return jnp.transpose(residual + z, (0, 2, 1))


def init_params(key, dim, intermediate_dim, layer_scale_init_value=0.5):
    ks = jax.random.split(key, 6)
    scale = 0.1
    return {
        # torch depthwise Conv1d weight is (dim, 1, 7); stored here as (7, dim)
        "dw_w": scale * jax.random.normal(ks[0], (7, dim), jnp.float32),
        "dw_b": scale * jax.random.normal(ks[1], (1, dim), jnp.float32),
        "ln_w": jnp.ones((1, dim), jnp.float32),
        "ln_b": jnp.zeros((1, dim), jnp.float32),
        # torch Linear weight is (out, in); stored transposed as (in, out)
        "w1": scale * jax.random.normal(ks[2], (dim, intermediate_dim), jnp.float32),
        "b1": scale * jax.random.normal(ks[3], (1, intermediate_dim), jnp.float32),
        "w2": scale * jax.random.normal(ks[4], (intermediate_dim, dim), jnp.float32),
        "b2": scale * jax.random.normal(ks[5], (1, dim), jnp.float32),
        "gamma": layer_scale_init_value * jnp.ones((1, dim), jnp.float32),
    }


def _check(out, x, params):
    # tight check vs a reference that mimics the bf16 MXU operands
    ref_bf = convnext_block_ref(x, params, matmul_dtype=jnp.bfloat16)
    assert jnp.allclose(out, ref_bf, atol=5e-3, rtol=5e-3), "mismatch vs bf16 ref"
    # loose sanity check vs the pure-f32 reference (bf16 operand rounding only)
    ref_f32 = convnext_block_ref(x, params)
    assert jnp.allclose(out, ref_f32, atol=5e-2, rtol=5e-2), "mismatch vs f32 ref"


if __name__ == "__main__":
    key = jax.random.PRNGKey(0)
    k1, k2, k3, k4 = jax.random.split(key, 4)

    # Main test: lane-aligned dims, time split into two 256-tiles so the
    # depthwise-conv halo across the tile seam (and the DMA double-buffer
    # hand-off between grid steps) is exercised.
    B, C, T, INTER = 2, 128, 512, 256
    x = jax.random.normal(k1, (B, C, T), jnp.float32)               # NCT
    params = init_params(k2, C, INTER, layer_scale_init_value=0.5)
    fn = jax.jit(functools.partial(convnext_block, time_tile=256))
    out = jax.block_until_ready(fn(x, params))
    assert out.shape == (B, C, T)
    _check(out, x, params)

    # Tiny-shape sanity check (single tile, ragged lane dims).
    B2, C2, T2, INTER2 = 2, 4, 16, 32
    x2 = jax.random.normal(k3, (B2, C2, T2), jnp.float32)
    params2 = init_params(k4, C2, INTER2, layer_scale_init_value=0.5)
    out2 = jax.block_until_ready(convnext_block(x2, params2))
    assert out2.shape == (B2, C2, T2)
    _check(out2, x2, params2)

    print("KERNEL_OK")
</pallas_src>

<mosaic_0001>
module attributes {stable_mosaic.version = 11 : i64} {
  func.func @_convnext_kernel(%arg0: i32, %arg1: i32, %arg2: memref<2x520x128xf32, #tpu.memory_space<any>>, %arg3: memref<7x128xf32, #tpu.memory_space<vmem>>, %arg4: memref<1x128xf32, #tpu.memory_space<vmem>>, %arg5: memref<1x128xf32, #tpu.memory_space<vmem>>, %arg6: memref<1x128xf32, #tpu.memory_space<vmem>>, %arg7: memref<128x256xbf16, #tpu.memory_space<vmem>>, %arg8: memref<1x256xf32, #tpu.memory_space<vmem>>, %arg9: memref<256x128xbf16, #tpu.memory_space<vmem>>, %arg10: memref<1x128xf32, #tpu.memory_space<vmem>>, %arg11: memref<1x128xf32, #tpu.memory_space<vmem>>, %arg12: memref<1x256x128xf32, #tpu.memory_space<vmem>>, %arg13: memref<2x264x128xf32, #tpu.memory_space<vmem>>, %arg14: memref<2x!tpu.dma_semaphore, #tpu.memory_space<semaphore_mem>>) attributes {dimension_semantics = [#tpu.dimension_semantics<parallel>, #tpu.dimension_semantics<arbitrary>], iteration_bounds = array<i64: 2, 2>, scalar_prefetch = 0 : i64, scratch_operands = 2 : i64, tpu.core_type = #tpu.core_type<tc>, window_params = [{}, {pipeline_mode = #tpu.pipeline_mode<synchronous>, transform_indices = @transform_1, window_bounds = array<i64: 7, 128>}, {pipeline_mode = #tpu.pipeline_mode<synchronous>, transform_indices = @transform_2, window_bounds = array<i64: 1, 128>}, {pipeline_mode = #tpu.pipeline_mode<synchronous>, transform_indices = @transform_3, window_bounds = array<i64: 1, 128>}, {pipeline_mode = #tpu.pipeline_mode<synchronous>, transform_indices = @transform_4, window_bounds = array<i64: 1, 128>}, {pipeline_mode = #tpu.pipeline_mode<synchronous>, transform_indices = @transform_5, window_bounds = array<i64: 128, 256>}, {pipeline_mode = #tpu.pipeline_mode<synchronous>, transform_indices = @transform_6, window_bounds = array<i64: 1, 256>}, {pipeline_mode = #tpu.pipeline_mode<synchronous>, transform_indices = @transform_7, window_bounds = array<i64: 256, 128>}, {pipeline_mode = #tpu.pipeline_mode<synchronous>, transform_indices = @transform_8, window_bounds = array<i64: 1, 128>}, {pipeline_mode = #tpu.pipeline_mode<synchronous>, transform_indices = @transform_9, window_bounds = array<i64: 1, 128>}, {transform_indices = @transform_10, window_bounds = array<i64: 1, 256, 128>}]} {
    %c2_i32 = arith.constant 2 : i32
    %0 = arith.remsi %arg1, %c2_i32 : i32
    %c0_i32 = arith.constant 0 : i32
    %1 = arith.cmpi eq, %arg1, %c0_i32 : i32
    %2 = arith.extui %1 : i1 to i32
    %c0_i32_0 = arith.constant 0 : i32
    %3 = arith.cmpi ne, %2, %c0_i32_0 : i32
    scf.if %3 {
      %c0_i32_61 = arith.constant 0 : i32
      %c0_i32_62 = arith.constant 0 : i32
      %c0_i32_63 = arith.constant 0 : i32
      %c0_i32_64 = arith.constant 0 : i32
      %148 = tpu.memref_slice %arg2[%arg0, %c0_i32_63, %c0_i32_64] : memref<2x520x128xf32, #tpu.memory_space<any>> -> memref<1x264x128xf32, #tpu.memory_space<any>>
      %149 = tpu.memref_squeeze %148 : memref<1x264x128xf32, #tpu.memory_space<any>> -> memref<264x128xf32, #tpu.memory_space<any>>
      %c0_i32_65 = arith.constant 0 : i32
      %c0_i32_66 = arith.constant 0 : i32
      %150 = tpu.memref_slice %arg13[%c0_i32_61, %c0_i32_65, %c0_i32_66] : memref<2x264x128xf32, #tpu.memory_space<vmem>> -> memref<1x264x128xf32, #tpu.memory_space<vmem>>
      %151 = tpu.memref_squeeze %150 : memref<1x264x128xf32, #tpu.memory_space<vmem>> -> memref<264x128xf32, #tpu.memory_space<vmem>>
      %152 = tpu.memref_slice %arg14[%c0_i32_62] : memref<2x!tpu.dma_semaphore, #tpu.memory_space<semaphore_mem>> -> memref<1x!tpu.dma_semaphore, #tpu.memory_space<semaphore_mem>>
      %153 = tpu.memref_squeeze %152 : memref<1x!tpu.dma_semaphore, #tpu.memory_space<semaphore_mem>> -> memref<!tpu.dma_semaphore, #tpu.memory_space<semaphore_mem>>
      tpu.enqueue_dma source(%149 : memref<264x128xf32, #tpu.memory_space<any>>) target(%151 : memref<264x128xf32, #tpu.memory_space<vmem>>) target_semaphore(%153 : memref<!tpu.dma_semaphore, #tpu.memory_space<semaphore_mem>>)
    } else {
    }
    %c1_i32 = arith.constant 1 : i32
    %4 = arith.addi %arg1, %c1_i32 : i32
    %c2_i32_1 = arith.constant 2 : i32
    %5 = arith.cmpi slt, %4, %c2_i32_1 : i32
    %6 = arith.extui %5 : i1 to i32
    %c0_i32_2 = arith.constant 0 : i32
    %7 = arith.cmpi ne, %6, %c0_i32_2 : i32
    scf.if %7 {
      %c1_i32_61 = arith.constant 1 : i32
      %148 = arith.addi %arg1, %c1_i32_61 : i32
      %c1_i32_62 = arith.constant 1 : i32
      %149 = arith.subi %c1_i32_62, %0 : i32
      %c256_i32_63 = arith.constant 256 : i32
      %150 = arith.muli %148, %c256_i32_63 : i32
      %151 = tpu.assume_multiple %150, 8 : i32
      %c0_i32_64 = arith.constant 0 : i32
      %152 = tpu.memref_slice %arg2[%arg0, %151, %c0_i32_64] : memref<2x520x128xf32, #tpu.memory_space<any>> -> memref<1x264x128xf32, #tpu.memory_space<any>>
      %153 = tpu.memref_squeeze %152 : memref<1x264x128xf32, #tpu.memory_space<any>> -> memref<264x128xf32, #tpu.memory_space<any>>
      %c0_i32_65 = arith.constant 0 : i32
      %c0_i32_66 = arith.constant 0 : i32
      %154 = tpu.memref_slice %arg13[%149, %c0_i32_65, %c0_i32_66] : memref<2x264x128xf32, #tpu.memory_space<vmem>> -> memref<1x264x128xf32, #tpu.memory_space<vmem>>
      %155 = tpu.memref_squeeze %154 : memref<1x264x128xf32, #tpu.memory_space<vmem>> -> memref<264x128xf32, #tpu.memory_space<vmem>>
      %156 = tpu.memref_slice %arg14[%149] : memref<2x!tpu.dma_semaphore, #tpu.memory_space<semaphore_mem>> -> memref<1x!tpu.dma_semaphore, #tpu.memory_space<semaphore_mem>>
      %157 = tpu.memref_squeeze %156 : memref<1x!tpu.dma_semaphore, #tpu.memory_space<semaphore_mem>> -> memref<!tpu.dma_semaphore, #tpu.memory_space<semaphore_mem>>
      tpu.enqueue_dma source(%153 : memref<264x128xf32, #tpu.memory_space<any>>) target(%155 : memref<264x128xf32, #tpu.memory_space<vmem>>) target_semaphore(%157 : memref<!tpu.dma_semaphore, #tpu.memory_space<semaphore_mem>>)
    } else {
    }
    %c256_i32 = arith.constant 256 : i32
    %8 = arith.muli %arg1, %c256_i32 : i32
    %9 = tpu.assume_multiple %8, 8 : i32
    %c0_i32_3 = arith.constant 0 : i32
    %10 = tpu.memref_slice %arg2[%arg0, %9, %c0_i32_3] : memref<2x520x128xf32, #tpu.memory_space<any>> -> memref<1x264x128xf32, #tpu.memory_space<any>>
    %11 = tpu.memref_squeeze %10 : memref<1x264x128xf32, #tpu.memory_space<any>> -> memref<264x128xf32, #tpu.memory_space<any>>
    %c0_i32_4 = arith.constant 0 : i32
    %c0_i32_5 = arith.constant 0 : i32
    %12 = tpu.memref_slice %arg13[%0, %c0_i32_4, %c0_i32_5] : memref<2x264x128xf32, #tpu.memory_space<vmem>> -> memref<1x264x128xf32, #tpu.memory_space<vmem>>
    %13 = tpu.memref_squeeze %12 : memref<1x264x128xf32, #tpu.memory_space<vmem>> -> memref<264x128xf32, #tpu.memory_space<vmem>>
    %14 = tpu.memref_slice %arg14[%0] : memref<2x!tpu.dma_semaphore, #tpu.memory_space<semaphore_mem>> -> memref<1x!tpu.dma_semaphore, #tpu.memory_space<semaphore_mem>>
    %15 = tpu.memref_squeeze %14 : memref<1x!tpu.dma_semaphore, #tpu.memory_space<semaphore_mem>> -> memref<!tpu.dma_semaphore, #tpu.memory_space<semaphore_mem>>
    tpu.wait_dma2 semaphore(%15 : memref<!tpu.dma_semaphore, #tpu.memory_space<semaphore_mem>>) src(%11 : memref<264x128xf32, #tpu.memory_space<any>>) dst(%13 : memref<264x128xf32, #tpu.memory_space<vmem>>)
    %c0 = arith.constant 0 : index
    %c0_6 = arith.constant 0 : index
    %16 = vector.load %arg3[%c0, %c0_6] : memref<7x128xf32, #tpu.memory_space<vmem>>, vector<7x128xf32>
    %c0_i32_7 = arith.constant 0 : i32
    %c0_i32_8 = arith.constant 0 : i32
    %17 = tpu.memref_slice %arg13[%0, %c0_i32_7, %c0_i32_8] : memref<2x264x128xf32, #tpu.memory_space<vmem>> -> memref<1x264x128xf32, #tpu.memory_space<vmem>>
    %18 = tpu.memref_squeeze %17 : memref<1x264x128xf32, #tpu.memory_space<vmem>> -> memref<264x128xf32, #tpu.memory_space<vmem>>
    %c0_9 = arith.constant 0 : index
    %c0_10 = arith.constant 0 : index
    %19 = vector.load %18[%c0_9, %c0_10] : memref<264x128xf32, #tpu.memory_space<vmem>>, vector<256x128xf32>
    %20 = vector.extract_strided_slice %16 {offsets = [0, 0], sizes = [1, 128], strides = [1, 1]} : vector<7x128xf32> to vector<1x128xf32>
    %21 = vector.shape_cast %20 : vector<1x128xf32> to vector<128xf32>
    %22 = vector.shape_cast %21 : vector<128xf32> to vector<1x128xf32>
    %23 = vector.broadcast %22 : vector<1x128xf32> to vector<256x128xf32>
    %24 = arith.mulf %19, %23 : vector<256x128xf32>
    %c0_i32_11 = arith.constant 0 : i32
    %c0_i32_12 = arith.constant 0 : i32
    %25 = tpu.memref_slice %arg13[%0, %c0_i32_11, %c0_i32_12] : memref<2x264x128xf32, #tpu.memory_space<vmem>> -> memref<1x264x128xf32, #tpu.memory_space<vmem>>
    %26 = tpu.memref_squeeze %25 : memref<1x264x128xf32, #tpu.memory_space<vmem>> -> memref<264x128xf32, #tpu.memory_space<vmem>>
    %c1 = arith.constant 1 : index
    %c0_13 = arith.constant 0 : index
    %27 = vector.load %26[%c1, %c0_13] : memref<264x128xf32, #tpu.memory_space<vmem>>, vector<256x128xf32>
    %28 = vector.extract_strided_slice %16 {offsets = [1, 0], sizes = [1, 128], strides = [1, 1]} : vector<7x128xf32> to vector<1x128xf32>
    %29 = vector.shape_cast %28 : vector<1x128xf32> to vector<128xf32>
    %30 = vector.shape_cast %29 : vector<128xf32> to vector<1x128xf32>
    %31 = vector.broadcast %30 : vector<1x128xf32> to vector<256x128xf32>
    %32 = arith.mulf %27, %31 : vector<256x128xf32>
    %33 = arith.addf %24, %32 : vector<256x128xf32>
    %c0_i32_14 = arith.constant 0 : i32
    %c0_i32_15 = arith.constant 0 : i32
    %34 = tpu.memref_slice %arg13[%0, %c0_i32_14, %c0_i32_15] : memref<2x264x128xf32, #tpu.memory_space<vmem>> -> memref<1x264x128xf32, #tpu.memory_space<vmem>>
    %35 = tpu.memref_squeeze %34 : memref<1x264x128xf32, #tpu.memory_space<vmem>> -> memref<264x128xf32, #tpu.memory_space<vmem>>
    %c2 = arith.constant 2 : index
    %c0_16 = arith.constant 0 : index
    %36 = vector.load %35[%c2, %c0_16] : memref<264x128xf32, #tpu.memory_space<vmem>>, vector<256x128xf32>
    %37 = vector.extract_strided_slice %16 {offsets = [2, 0], sizes = [1, 128], strides = [1, 1]} : vector<7x128xf32> to vector<1x128xf32>
    %38 = vector.shape_cast %37 : vector<1x128xf32> to vector<128xf32>
    %39 = vector.shape_cast %38 : vector<128xf32> to vector<1x128xf32>
    %40 = vector.broadcast %39 : vector<1x128xf32> to vector<256x128xf32>
    %41 = arith.mulf %36, %40 : vector<256x128xf32>
    %42 = arith.addf %33, %41 : vector<256x128xf32>
    %c0_i32_17 = arith.constant 0 : i32
    %c0_i32_18 = arith.constant 0 : i32
    %43 = tpu.memref_slice %arg13[%0, %c0_i32_17, %c0_i32_18] : memref<2x264x128xf32, #tpu.memory_space<vmem>> -> memref<1x264x128xf32, #tpu.memory_space<vmem>>
    %44 = tpu.memref_squeeze %43 : memref<1x264x128xf32, #tpu.memory_space<vmem>> -> memref<264x128xf32, #tpu.memory_space<vmem>>
    %c3 = arith.constant 3 : index
    %c0_19 = arith.constant 0 : index
    %45 = vector.load %44[%c3, %c0_19] : memref<264x128xf32, #tpu.memory_space<vmem>>, vector<256x128xf32>
    %46 = vector.extract_strided_slice %16 {offsets = [3, 0], sizes = [1, 128], strides = [1, 1]} : vector<7x128xf32> to vector<1x128xf32>
    %47 = vector.shape_cast %46 : vector<1x128xf32> to vector<128xf32>
    %48 = vector.shape_cast %47 : vector<128xf32> to vector<1x128xf32>
    %49 = vector.broadcast %48 : vector<1x128xf32> to vector<256x128xf32>
    %50 = arith.mulf %45, %49 : vector<256x128xf32>
    %51 = arith.addf %42, %50 : vector<256x128xf32>
    %c0_i32_20 = arith.constant 0 : i32
    %c0_i32_21 = arith.constant 0 : i32
    %52 = tpu.memref_slice %arg13[%0, %c0_i32_20, %c0_i32_21] : memref<2x264x128xf32, #tpu.memory_space<vmem>> -> memref<1x264x128xf32, #tpu.memory_space<vmem>>
    %53 = tpu.memref_squeeze %52 : memref<1x264x128xf32, #tpu.memory_space<vmem>> -> memref<264x128xf32, #tpu.memory_space<vmem>>
    %c4 = arith.constant 4 : index
    %c0_22 = arith.constant 0 : index
    %54 = vector.load %53[%c4, %c0_22] : memref<264x128xf32, #tpu.memory_space<vmem>>, vector<256x128xf32>
    %55 = vector.extract_strided_slice %16 {offsets = [4, 0], sizes = [1, 128], strides = [1, 1]} : vector<7x128xf32> to vector<1x128xf32>
    %56 = vector.shape_cast %55 : vector<1x128xf32> to vector<128xf32>
    %57 = vector.shape_cast %56 : vector<128xf32> to vector<1x128xf32>
    %58 = vector.broadcast %57 : vector<1x128xf32> to vector<256x128xf32>
    %59 = arith.mulf %54, %58 : vector<256x128xf32>
    %60 = arith.addf %51, %59 : vector<256x128xf32>
    %c0_i32_23 = arith.constant 0 : i32
    %c0_i32_24 = arith.constant 0 : i32
    %61 = tpu.memref_slice %arg13[%0, %c0_i32_23, %c0_i32_24] : memref<2x264x128xf32, #tpu.memory_space<vmem>> -> memref<1x264x128xf32, #tpu.memory_space<vmem>>
    %62 = tpu.memref_squeeze %61 : memref<1x264x128xf32, #tpu.memory_space<vmem>> -> memref<264x128xf32, #tpu.memory_space<vmem>>
    %c5 = arith.constant 5 : index
    %c0_25 = arith.constant 0 : index
    %63 = vector.load %62[%c5, %c0_25] : memref<264x128xf32, #tpu.memory_space<vmem>>, vector<256x128xf32>
    %64 = vector.extract_strided_slice %16 {offsets = [5, 0], sizes = [1, 128], strides = [1, 1]} : vector<7x128xf32> to vector<1x128xf32>
    %65 = vector.shape_cast %64 : vector<1x128xf32> to vector<128xf32>
    %66 = vector.shape_cast %65 : vector<128xf32> to vector<1x128xf32>
    %67 = vector.broadcast %66 : vector<1x128xf32> to vector<256x128xf32>
    %68 = arith.mulf %63, %67 : vector<256x128xf32>
    %69 = arith.addf %60, %68 : vector<256x128xf32>
    %c0_i32_26 = arith.constant 0 : i32
    %c0_i32_27 = arith.constant 0 : i32
    %70 = tpu.memref_slice %arg13[%0, %c0_i32_26, %c0_i32_27] : memref<2x264x128xf32, #tpu.memory_space<vmem>> -> memref<1x264x128xf32, #tpu.memory_space<vmem>>
    %71 = tpu.memref_squeeze %70 : memref<1x264x128xf32, #tpu.memory_space<vmem>> -> memref<264x128xf32, #tpu.memory_space<vmem>>
    %c6 = arith.constant 6 : index
    %c0_28 = arith.constant 0 : index
    %72 = vector.load %71[%c6, %c0_28] : memref<264x128xf32, #tpu.memory_space<vmem>>, vector<256x128xf32>
    %73 = vector.extract_strided_slice %16 {offsets = [6, 0], sizes = [1, 128], strides = [1, 1]} : vector<7x128xf32> to vector<1x128xf32>
    %74 = vector.shape_cast %73 : vector<1x128xf32> to vector<128xf32>
    %75 = vector.shape_cast %74 : vector<128xf32> to vector<1x128xf32>
    %76 = vector.broadcast %75 : vector<1x128xf32> to vector<256x128xf32>
    %77 = arith.mulf %72, %76 : vector<256x128xf32>
    %78 = arith.addf %69, %77 : vector<256x128xf32>
    %c0_29 = arith.constant 0 : index
    %c0_30 = arith.constant 0 : index
    %79 = vector.load %arg4[%c0_29, %c0_30] : memref<1x128xf32, #tpu.memory_space<vmem>>, vector<1x128xf32>
    %80 = vector.shape_cast %79 : vector<1x128xf32> to vector<128xf32>
    %81 = vector.shape_cast %80 : vector<128xf32> to vector<1x128xf32>
    %82 = vector.broadcast %81 : vector<1x128xf32> to vector<256x128xf32>
    %83 = arith.addf %78, %82 : vector<256x128xf32>
    %cst = arith.constant dense<0.000000e+00> : vector<256xf32>
    %84 = vector.multi_reduction <add>, %83, %cst [1] : vector<256x128xf32> to vector<256xf32>
    %85 = vector.shape_cast %84 : vector<256xf32> to vector<256x1xf32>
    %cst_31 = arith.constant 1.280000e+02 : f32
    %86 = vector.broadcast %cst_31 : f32 to vector<256x1xf32>
    %87 = arith.divf %85, %86 : vector<256x1xf32>
    %88 = arith.mulf %83, %83 : vector<256x128xf32>
    %cst_32 = arith.constant dense<0.000000e+00> : vector<256xf32>
    %89 = vector.multi_reduction <add>, %88, %cst_32 [1] : vector<256x128xf32> to vector<256xf32>
    %90 = vector.shape_cast %89 : vector<256xf32> to vector<256x1xf32>
    %cst_33 = arith.constant 1.280000e+02 : f32
    %91 = vector.broadcast %cst_33 : f32 to vector<256x1xf32>
    %92 = arith.divf %90, %91 : vector<256x1xf32>
    %93 = arith.mulf %87, %87 : vector<256x1xf32>
    %94 = arith.subf %92, %93 : vector<256x1xf32>
    %95 = vector.broadcast %87 : vector<256x1xf32> to vector<256x128xf32>
    %96 = arith.subf %83, %95 : vector<256x128xf32>
    %cst_34 = arith.constant 9.99999997E-7 : f32
    %97 = vector.broadcast %cst_34 : f32 to vector<256x1xf32>
    %98 = arith.addf %94, %97 : vector<256x1xf32>
    %99 = math.rsqrt %98 : vector<256x1xf32>
    %100 = vector.broadcast %99 : vector<256x1xf32> to vector<256x128xf32>
    %101 = arith.mulf %96, %100 : vector<256x128xf32>
    %c0_35 = arith.constant 0 : index
    %c0_36 = arith.constant 0 : index
    %102 = vector.load %arg5[%c0_35, %c0_36] : memref<1x128xf32, #tpu.memory_space<vmem>>, vector<1x128xf32>
    %103 = vector.shape_cast %102 : vector<1x128xf32> to vector<128xf32>
    %104 = vector.shape_cast %103 : vector<128xf32> to vector<1x128xf32>
    %105 = vector.broadcast %104 : vector<1x128xf32> to vector<256x128xf32>
    %106 = arith.mulf %101, %105 : vector<256x128xf32>
    %c0_37 = arith.constant 0 : index
    %c0_38 = arith.constant 0 : index
    %107 = vector.load %arg6[%c0_37, %c0_38] : memref<1x128xf32, #tpu.memory_space<vmem>>, vector<1x128xf32>
    %108 = vector.shape_cast %107 : vector<1x128xf32> to vector<128xf32>
    %109 = vector.shape_cast %108 : vector<128xf32> to vector<1x128xf32>
    %110 = vector.broadcast %109 : vector<1x128xf32> to vector<256x128xf32>
    %111 = arith.addf %106, %110 : vector<256x128xf32>
    %112 = arith.truncf %111 : vector<256x128xf32> to vector<256x128xbf16>
    %c0_39 = arith.constant 0 : index
    %c0_40 = arith.constant 0 : index
    %113 = vector.load %arg7[%c0_39, %c0_40] : memref<128x256xbf16, #tpu.memory_space<vmem>>, vector<128x256xbf16>
    %cst_41 = arith.constant dense<0.000000e+00> : vector<256x256xf32>
    %114 = tpu.matmul %112, %113, %cst_41 {dimension_numbers = #tpu.dot_dimension_numbers<[1], [0], [0], [1], [0, 0, 1, 1], [], []>} : vector<256x128xbf16>, vector<128x256xbf16>, vector<256x256xf32> -> vector<256x256xf32>
    %c0_42 = arith.constant 0 : index
    %c0_43 = arith.constant 0 : index
    %115 = vector.load %arg8[%c0_42, %c0_43] : memref<1x256xf32, #tpu.memory_space<vmem>>, vector<1x256xf32>
    %116 = vector.shape_cast %115 : vector<1x256xf32> to vector<256xf32>
    %117 = vector.shape_cast %116 : vector<256xf32> to vector<1x256xf32>
    %118 = vector.broadcast %117 : vector<1x256xf32> to vector<256x256xf32>
    %119 = arith.addf %114, %118 : vector<256x256xf32>
    %cst_44 = arith.constant 5.000000e-01 : f32
    %120 = vector.broadcast %cst_44 : f32 to vector<256x256xf32>
    %121 = arith.mulf %120, %119 : vector<256x256xf32>
    %cst_45 = arith.constant 0.707106769 : f32
    %122 = vector.broadcast %cst_45 : f32 to vector<256x256xf32>
    %123 = arith.mulf %119, %122 : vector<256x256xf32>
    %124 = math.erf %123 : vector<256x256xf32>
    %cst_46 = arith.constant 1.000000e+00 : f32
    %125 = vector.broadcast %cst_46 : f32 to vector<256x256xf32>
    %126 = arith.addf %125, %124 : vector<256x256xf32>
    %127 = arith.mulf %121, %126 : vector<256x256xf32>
    %128 = arith.truncf %127 : vector<256x256xf32> to vector<256x256xbf16>
    %c0_47 = arith.constant 0 : index
    %c0_48 = arith.constant 0 : index
    %129 = vector.load %arg9[%c0_47, %c0_48] : memref<256x128xbf16, #tpu.memory_space<vmem>>, vector<256x128xbf16>
    %cst_49 = arith.constant dense<0.000000e+00> : vector<256x128xf32>
    %130 = tpu.matmul %128, %129, %cst_49 {dimension_numbers = #tpu.dot_dimension_numbers<[1], [0], [0], [1], [0, 0, 1, 1], [], []>} : vector<256x256xbf16>, vector<256x128xbf16>, vector<256x128xf32> -> vector<256x128xf32>
    %c0_50 = arith.constant 0 : index
    %c0_51 = arith.constant 0 : index
    %131 = vector.load %arg10[%c0_50, %c0_51] : memref<1x128xf32, #tpu.memory_space<vmem>>, vector<1x128xf32>
    %132 = vector.shape_cast %131 : vector<1x128xf32> to vector<128xf32>
    %133 = vector.shape_cast %132 : vector<128xf32> to vector<1x128xf32>
    %134 = vector.broadcast %133 : vector<1x128xf32> to vector<256x128xf32>
    %135 = arith.addf %130, %134 : vector<256x128xf32>
    %c0_i32_52 = arith.constant 0 : i32
    %c0_i32_53 = arith.constant 0 : i32
    %136 = tpu.memref_slice %arg13[%0, %c0_i32_52, %c0_i32_53] : memref<2x264x128xf32, #tpu.memory_space<vmem>> -> memref<1x264x128xf32, #tpu.memory_space<vmem>>
    %137 = tpu.memref_squeeze %136 : memref<1x264x128xf32, #tpu.memory_space<vmem>> -> memref<264x128xf32, #tpu.memory_space<vmem>>
    %c3_54 = arith.constant 3 : index
    %c0_55 = arith.constant 0 : index
    %138 = vector.load %137[%c3_54, %c0_55] : memref<264x128xf32, #tpu.memory_space<vmem>>, vector<256x128xf32>
    %c0_56 = arith.constant 0 : index
    %c0_57 = arith.constant 0 : index
    %139 = vector.load %arg11[%c0_56, %c0_57] : memref<1x128xf32, #tpu.memory_space<vmem>>, vector<1x128xf32>
    %140 = vector.shape_cast %139 : vector<1x128xf32> to vector<128xf32>
    %141 = vector.shape_cast %140 : vector<128xf32> to vector<1x128xf32>
    %142 = vector.broadcast %141 : vector<1x128xf32> to vector<256x128xf32>
    %143 = arith.mulf %142, %135 : vector<256x128xf32>
    %144 = arith.addf %138, %143 : vector<256x128xf32>
    %c0_58 = arith.constant 0 : index
    %c0_59 = arith.constant 0 : index
    %c0_60 = arith.constant 0 : index
    %145 = vector.load %arg12[%c0_58, %c0_59, %c0_60] : memref<1x256x128xf32, #tpu.memory_space<vmem>>, vector<1x256x128xf32>
    %146 = vector.shape_cast %145 : vector<1x256x128xf32> to vector<256x128xf32>
    %147 = vector.shape_cast %144 : vector<256x128xf32> to vector<1x256x128xf32>
    tpu.vector_store %arg12[%c0_58, %c0_59, %c0_60], %147 {strides = array<i32>} : memref<1x256x128xf32, #tpu.memory_space<vmem>>, vector<1x256x128xf32>,
    return
  }
  func.func @transform_1(%arg0: i32, %arg1: i32) -> (i32, i32) {
    %c0_i32 = arith.constant 0 : i32
    %c0_i32_0 = arith.constant 0 : i32
    %c0_i32_1 = arith.constant 0 : i32
    return %c0_i32, %c0_i32_0 : i32, i32
  }
  func.func @transform_2(%arg0: i32, %arg1: i32) -> (i32, i32) {
    %c0_i32 = arith.constant 0 : i32
    %c0_i32_0 = arith.constant 0 : i32
    %c0_i32_1 = arith.constant 0 : i32
    return %c0_i32, %c0_i32_0 : i32, i32
  }
  func.func @transform_3(%arg0: i32, %arg1: i32) -> (i32, i32) {
    %c0_i32 = arith.constant 0 : i32
    %c0_i32_0 = arith.constant 0 : i32
    %c0_i32_1 = arith.constant 0 : i32
    return %c0_i32, %c0_i32_0 : i32, i32
  }
  func.func @transform_4(%arg0: i32, %arg1: i32) -> (i32, i32) {
    %c0_i32 = arith.constant 0 : i32
    %c0_i32_0 = arith.constant 0 : i32
    %c0_i32_1 = arith.constant 0 : i32
    return %c0_i32, %c0_i32_0 : i32, i32
  }
  func.func @transform_5(%arg0: i32, %arg1: i32) -> (i32, i32) {
    %c0_i32 = arith.constant 0 : i32
    %c0_i32_0 = arith.constant 0 : i32
    %c0_i32_1 = arith.constant 0 : i32
    return %c0_i32, %c0_i32_0 : i32, i32
  }
  func.func @transform_6(%arg0: i32, %arg1: i32) -> (i32, i32) {
    %c0_i32 = arith.constant 0 : i32
    %c0_i32_0 = arith.constant 0 : i32
    %c0_i32_1 = arith.constant 0 : i32
    return %c0_i32, %c0_i32_0 : i32, i32
  }
  func.func @transform_7(%arg0: i32, %arg1: i32) -> (i32, i32) {
    %c0_i32 = arith.constant 0 : i32
    %c0_i32_0 = arith.constant 0 : i32
    %c0_i32_1 = arith.constant 0 : i32
    return %c0_i32, %c0_i32_0 : i32, i32
  }
  func.func @transform_8(%arg0: i32, %arg1: i32) -> (i32, i32) {
    %c0_i32 = arith.constant 0 : i32
    %c0_i32_0 = arith.constant 0 : i32
    %c0_i32_1 = arith.constant 0 : i32
    return %c0_i32, %c0_i32_0 : i32, i32
  }
  func.func @transform_9(%arg0: i32, %arg1: i32) -> (i32, i32) {
    %c0_i32 = arith.constant 0 : i32
    %c0_i32_0 = arith.constant 0 : i32
    %c0_i32_1 = arith.constant 0 : i32
    return %c0_i32, %c0_i32_0 : i32, i32
  }
  func.func @transform_10(%arg0: i32, %arg1: i32) -> (i32, i32, i32) {
    %c0_i32 = arith.constant 0 : i32
    %c0_i32_0 = arith.constant 0 : i32
    return %arg0, %arg1, %c0_i32 : i32, i32, i32
  }
}

</mosaic_0001>

<bundles_post_ra>
// kernel: convnext_block.1
= control target key start
LH: loop header
LB: loop body
LE: loop exit
PB: predicated region body
PF: predicated region fallthrough
CT: control target
= control target key end

     0   :  { %s3571_s13 = smov 0   ;;  %s3573_s14 = smov 0   ;;  %s5237_s0 = inlined_call_operand.vmem [shape: f32[2,520,128], index: 0, kind: input, shape index: {}]   ;;  %s5238_s1 = inlined_call_operand.vmem [shape: f32[7,128], index: 1, kind: input, shape index: {}]   ;;  %s5239_s2 = inlined_call_operand.vmem [shape: f32[1,128], index: 2, kind: input, shape index: {}]   ;;  %s5240_s3 = inlined_call_operand.vmem [shape: f32[1,128], index: 3, kind: input, shape index: {}]   ;;  %s5241_s4 = inlined_call_operand.vmem [shape: f32[1,128], index: 4, kind: input, shape index: {}]   ;;  %s5242_s5 = inlined_call_operand.vmem [shape: bf16[128,256], index: 5, kind: input, shape index: {}]   ;;  %s5243_s6 = inlined_call_operand.vmem [shape: f32[1,256], index: 6, kind: input, shape index: {}]   ;;  %s5244_s7 = inlined_call_operand.vmem [shape: bf16[256,128], index: 7, kind: input, shape index: {}]   ;;  %s5245_s8 = inlined_call_operand.vmem [shape: f32[1,128], index: 8, kind: input, shape index: {}]   ;;  %s5246_s9 = inlined_call_operand.vmem [shape: f32[1,128], index: 9, kind: input, shape index: {}]   ;;  %s5247_s10 = inlined_call_operand.vmem [shape: f32[2,512,128], index: 10, kind: output, shape index: {}]  }
   0x1   :  { %s3575_s15 = smov 0   ;;  %s3577_s16 = smov 0  }
   0x2   :  { %s3579_s17 = smov 0  }
   0x3 LB: > { %s29_s18 = sadd.s32 1, %s3505_s15  ;;  %s32_s19 = sadd.s32 1, %s3509_s16  ;;  %s3513_s17 = sphi %s3579_s17, %s20_s17   ;;  %s3509_s16 = sphi %s3577_s16, %s5264_s16   ;;  %s3505_s15 = sphi %s3575_s15, %s5263_s15   ;;  %s3501_s14 = sphi %s3573_s14, %s5262_s14   ;;  %s3497_s13 = sphi %s3571_s13, %s5261_s13  }
   0x4   : > { %p30_p0 = scmp.ge.s32.totalorder %s29_s18, 2  ;;  %p2972_p1 = scmp.ge.s32.totalorder %s3513_s17, 1 }
   0x5   : > { %p292_p2 = scmp.lt.s32.totalorder %s3513_s17, 5 }
   0x6   : > { %s5266_s18 = smov (%p30_p0, %s29_s18), 0  ;;  %s5268_s19 = smov (!%p30_p0, %s32_s19), %s3509_s16 }
   0x7   : > { %p293_p3 = pnand %p2972_p1, %p292_p2  ;;  %p34_p4 = scmp.ge.s32.totalorder %s5268_s19, 2 }
   0x9   : > { %s5270_s19 = smov (%p34_p4, %s5268_s19), 0  ;;  %296 = sbr.rel (%p293_p3) target bundleno = 829 (0x33d), region = 56 }
   0xa   : > { %5253 = sst [smem:[#allocation7_spill]] %s5270_s19 }
   0xe   : > { %s2973_s20 = sshll.u32 %s3497_s13, 5  ;;  %p328_p5 = scmp.lt.s32.totalorder %s3501_s14, 1 }
   0xf   : > { %p330_p6 = scmp.lt.s32.totalorder %s2973_s20, 63  ;;  %p338_p7 = scmp.lt.s32.totalorder %s3497_s13, 0 }
  0x10   : > { %s329_s21 = scalar_select %p328_p5, %s3501_s14, 1 }
  0x11   : > { %s5272_s20 = smov (!%p330_p6, %s2973_s20), 63  ;;  %s339_s23 = ssub.s32 0, %s3497_s13 }
  0x12   : > { %s2974_s22 = sshll.u32 %s329_s21, 6  ;;  %s2976_s25 = smin.u32 %s3497_s13, %s339_s23 }
  0x13   : > { %s333_s24 = sadd.s32 %s2974_s22, %s5272_s20  ;;  %s341_s27 = sand.u32 1, %s2976_s25  }
  0x14   : > { %s2975_s26 = sshll.u32 %s333_s24, 3  ;;  %s342_s11 = ssub.s32 0, %s341_s27 }
  0x15   : > { %s3614_s30 = scalar_lea.vmem %s5247_s10, %s2975_s26  ;;  %s5274_s11 = smov (!%p338_p7, %s342_s11), %s341_s27 }
  0x16   : > { %p2977_p8 = scmp.ne.s32.totalorder %s3497_s13, 0 }
  0x17   : > { %s348_s12 = smul.u32 (!%p2977_p8), 520, %s3501_s14 }
  0x18   : > { %347 = sbr.rel (%p2977_p8) target bundleno = 48 (0x30), region = 60 }
  0x19   : > { %s3623_s20 = scalar_lea.vmem (!%p2977_p8), %s5237_s0, %s348_s12 }
  0x1d   : > { %v383_v0 = vld [vmem:[%s3623_s20] sm:$0xff]  ;;  %v385_v1 = vld [vmem:[%s3623_s20 + $0x8] sm:$0xff]  ;;  %v387_v2 = vld [vmem:[%s3623_s20 + $0x10] sm:$0xff] }
  0x1e   : > { %384 = vst [vmem:[#allocation2] sm:$0xff] %v383_v0  ;;  %386 = vst [vmem:[#allocation2 + $0x8] sm:$0xff] %v385_v1  ;;  %v389_v3 = vld [vmem:[%s3623_s20 + $0x18] sm:$0xff]  ;;  %v391_v4 = vld [vmem:[%s3623_s20 + $0x20] sm:$0xff] }
  0x1f   : > { %388 = vst [vmem:[#allocation2 + $0x10] sm:$0xff] %v387_v2  ;;  %v393_v5 = vld [vmem:[%s3623_s20 + $0x28] sm:$0xff]  ;;  %390 = vst [vmem:[#allocation2 + $0x18] sm:$0xff] %v389_v3  ;;  %v395_v6 = vld [vmem:[%s3623_s20 + $0x30] sm:$0xff] }
  0x20   : > { %392 = vst [vmem:[#allocation2 + $0x20] sm:$0xff] %v391_v4  ;;  %394 = vst [vmem:[#allocation2 + $0x28] sm:$0xff] %v393_v5  ;;  %v397_v7 = vld [vmem:[%s3623_s20 + $0x38] sm:$0xff]  ;;  %v399_v8 = vld [vmem:[%s3623_s20 + $0x40] sm:$0xff] }
  0x21   : > { %396 = vst [vmem:[#allocation2 + $0x30] sm:$0xff] %v395_v6  ;;  %398 = vst [vmem:[#allocation2 + $0x38] sm:$0xff] %v397_v7  ;;  %v401_v9 = vld [vmem:[%s3623_s20 + $0x48] sm:$0xff]  ;;  %v403_v10 = vld [vmem:[%s3623_s20 + $0x50] sm:$0xff] }
  0x22   : > { %400 = vst [vmem:[#allocation2 + $0x40] sm:$0xff] %v399_v8  ;;  %v405_v11 = vld [vmem:[%s3623_s20 + $0x58] sm:$0xff]  ;;  %402 = vst [vmem:[#allocation2 + $0x48] sm:$0xff] %v401_v9  ;;  %v407_v12 = vld [vmem:[%s3623_s20 + $0x60] sm:$0xff] }
  0x23   : > { %404 = vst [vmem:[#allocation2 + $0x50] sm:$0xff] %v403_v10  ;;  %406 = vst [vmem:[#allocation2 + $0x58] sm:$0xff] %v405_v11  ;;  %v409_v13 = vld [vmem:[%s3623_s20 + $0x68] sm:$0xff]  ;;  %v411_v14 = vld [vmem:[%s3623_s20 + $0x70] sm:$0xff] }
  0x24   : > { %408 = vst [vmem:[#allocation2 + $0x60] sm:$0xff] %v407_v12  ;;  %410 = vst [vmem:[#allocation2 + $0x68] sm:$0xff] %v409_v13  ;;  %v413_v15 = vld [vmem:[%s3623_s20 + $0x78] sm:$0xff]  ;;  %v415_v16 = vld [vmem:[%s3623_s20 + $0x80] sm:$0xff] }
  0x25   : > { %412 = vst [vmem:[#allocation2 + $0x70] sm:$0xff] %v411_v14  ;;  %v417_v17 = vld [vmem:[%s3623_s20 + $0x88] sm:$0xff]  ;;  %414 = vst [vmem:[#allocation2 + $0x78] sm:$0xff] %v413_v15  ;;  %v419_v18 = vld [vmem:[%s3623_s20 + $0x90] sm:$0xff] }
  0x26   : > { %416 = vst [vmem:[#allocation2 + $0x80] sm:$0xff] %v415_v16  ;;  %418 = vst [vmem:[#allocation2 + $0x88] sm:$0xff] %v417_v17  ;;  %v421_v19 = vld [vmem:[%s3623_s20 + $0x98] sm:$0xff]  ;;  %v423_v20 = vld [vmem:[%s3623_s20 + $0xa0] sm:$0xff] }
  0x27   : > { %420 = vst [vmem:[#allocation2 + $0x90] sm:$0xff] %v419_v18  ;;  %422 = vst [vmem:[#allocation2 + $0x98] sm:$0xff] %v421_v19  ;;  %v425_v21 = vld [vmem:[%s3623_s20 + $0xa8] sm:$0xff]  ;;  %v427_v22 = vld [vmem:[%s3623_s20 + $0xb0] sm:$0xff] }
  0x28   : > { %424 = vst [vmem:[#allocation2 + $0xa0] sm:$0xff] %v423_v20  ;;  %v429_v23 = vld [vmem:[%s3623_s20 + $0xb8] sm:$0xff]  ;;  %426 = vst [vmem:[#allocation2 + $0xa8] sm:$0xff] %v425_v21  ;;  %v431_v24 = vld [vmem:[%s3623_s20 + $0xc0] sm:$0xff] }
  0x29   : > { %428 = vst [vmem:[#allocation2 + $0xb0] sm:$0xff] %v427_v22  ;;  %430 = vst [vmem:[#allocation2 + $0xb8] sm:$0xff] %v429_v23  ;;  %v433_v25 = vld [vmem:[%s3623_s20 + $0xc8] sm:$0xff]  ;;  %v435_v26 = vld [vmem:[%s3623_s20 + $0xd0] sm:$0xff] }
  0x2a   : > { %432 = vst [vmem:[#allocation2 + $0xc0] sm:$0xff] %v431_v24  ;;  %434 = vst [vmem:[#allocation2 + $0xc8] sm:$0xff] %v433_v25  ;;  %v437_v27 = vld [vmem:[%s3623_s20 + $0xd8] sm:$0xff]  ;;  %v439_v28 = vld [vmem:[%s3623_s20 + $0xe0] sm:$0xff] }
  0x2b   : > { %436 = vst [vmem:[#allocation2 + $0xd0] sm:$0xff] %v435_v26  ;;  %v441_v29 = vld [vmem:[%s3623_s20 + $0xe8] sm:$0xff]  ;;  %438 = vst [vmem:[#allocation2 + $0xd8] sm:$0xff] %v437_v27  ;;  %v443_v30 = vld [vmem:[%s3623_s20 + $0xf0] sm:$0xff] }
  0x2c   : > { %440 = vst [vmem:[#allocation2 + $0xe0] sm:$0xff] %v439_v28  ;;  %442 = vst [vmem:[#allocation2 + $0xe8] sm:$0xff] %v441_v29  ;;  %v445_v31 = vld [vmem:[%s3623_s20 + $0xf8] sm:$0xff]  ;;  %v447_v32 = vld [vmem:[%s3623_s20 + $0x100] sm:$0xff] }
  0x2d   : > { %444 = vst [vmem:[#allocation2 + $0xf0] sm:$0xff] %v443_v30  ;;  %446 = vst [vmem:[#allocation2 + $0xf8] sm:$0xff] %v445_v31 }
  0x2e   : > { %448 = vst [vmem:[#allocation2 + $0x100] sm:$0xff] %v447_v32 }
  0x2f   : > { %456 = vsyncadd [#allocation3], 4224 }
  0x30 PF: > { %s457_s19 = sadd.s32 1, %s3497_s13 }
  0x31   : > { %p2978_p9 = scmp.ge.s32.totalorder %s457_s19, 2 }
  0x32   : > { %s462_s22 = ssub.s32 (!%p2978_p9), 1, %s5274_s11  ;;  %s2979_s23 = sshll.u32 (!%p2978_p9), %s3497_s13, 8 }
  0x33   : > { %461 = sbr.rel (%p2978_p9) target bundleno = 75 (0x4b), region = 98 }
  0x34   : > { %s2909_s24 = smul.u32 (!%p2978_p9), 520, %s3501_s14  ;;  %s469_s14 = scalar_lea.sflag (!%p2978_p9), [#allocation3], %s462_s22 }
  0x35   : > { %s467_s25 = smul.u32 (!%p2978_p9), 264, %s462_s22 }
  0x36   : > { %s2910_s26 = sadd.s32 (!%p2978_p9), %s2979_s23, %s2909_s24 }
  0x37   : > { %s3667_s29 = scalar_lea.vmem (!%p2978_p9), %s5237_s0, %s2910_s26  ;;  %s3672_s13 = scalar_lea.vmem (!%p2978_p9), [#allocation2], %s467_s25 }
  0x38   : > { %v2980_v33 = vld [vmem:[%s3667_s29 + $0x100] sm:$0xff]  ;;  %v2981_v34 = vld [vmem:[%s3667_s29 + $0x108] sm:$0xff]  ;;  %v2982_v35 = vld [vmem:[%s3667_s29 + $0x110] sm:$0xff] }
  0x39   : > { %504 = vst [vmem:[%s3672_s13] sm:$0xff] %v2980_v33  ;;  %506 = vst [vmem:[%s3672_s13 + $0x8] sm:$0xff] %v2981_v34  ;;  %v2983_v36 = vld [vmem:[%s3667_s29 + $0x118] sm:$0xff]  ;;  %v2984_v37 = vld [vmem:[%s3667_s29 + $0x120] sm:$0xff] }
  0x3a   : > { %508 = vst [vmem:[%s3672_s13 + $0x10] sm:$0xff] %v2982_v35  ;;  %v2985_v38 = vld [vmem:[%s3667_s29 + $0x128] sm:$0xff]  ;;  %510 = vst [vmem:[%s3672_s13 + $0x18] sm:$0xff] %v2983_v36  ;;  %v2986_v39 = vld [vmem:[%s3667_s29 + $0x130] sm:$0xff] }
  0x3b   : > { %512 = vst [vmem:[%s3672_s13 + $0x20] sm:$0xff] %v2984_v37  ;;  %514 = vst [vmem:[%s3672_s13 + $0x28] sm:$0xff] %v2985_v38  ;;  %v2987_v40 = vld [vmem:[%s3667_s29 + $0x138] sm:$0xff]  ;;  %v2988_v41 = vld [vmem:[%s3667_s29 + $0x140] sm:$0xff] }
  0x3c   : > { %516 = vst [vmem:[%s3672_s13 + $0x30] sm:$0xff] %v2986_v39  ;;  %518 = vst [vmem:[%s3672_s13 + $0x38] sm:$0xff] %v2987_v40  ;;  %v2989_v42 = vld [vmem:[%s3667_s29 + $0x148] sm:$0xff]  ;;  %v2990_v43 = vld [vmem:[%s3667_s29 + $0x150] sm:$0xff] }
  0x3d   : > { %520 = vst [vmem:[%s3672_s13 + $0x40] sm:$0xff] %v2988_v41  ;;  %v2991_v44 = vld [vmem:[%s3667_s29 + $0x158] sm:$0xff]  ;;  %522 = vst [vmem:[%s3672_s13 + $0x48] sm:$0xff] %v2989_v42  ;;  %v2992_v45 = vld [vmem:[%s3667_s29 + $0x160] sm:$0xff] }
  0x3e   : > { %524 = vst [vmem:[%s3672_s13 + $0x50] sm:$0xff] %v2990_v43  ;;  %526 = vst [vmem:[%s3672_s13 + $0x58] sm:$0xff] %v2991_v44  ;;  %v2993_v46 = vld [vmem:[%s3667_s29 + $0x168] sm:$0xff]  ;;  %v2994_v47 = vld [vmem:[%s3667_s29 + $0x170] sm:$0xff] }
  0x3f   : > { %528 = vst [vmem:[%s3672_s13 + $0x60] sm:$0xff] %v2992_v45  ;;  %530 = vst [vmem:[%s3672_s13 + $0x68] sm:$0xff] %v2993_v46  ;;  %v2995_v48 = vld [vmem:[%s3667_s29 + $0x178] sm:$0xff]  ;;  %v2996_v49 = vld [vmem:[%s3667_s29 + $0x180] sm:$0xff] }
  0x40   : > { %532 = vst [vmem:[%s3672_s13 + $0x70] sm:$0xff] %v2994_v47  ;;  %v2997_v50 = vld [vmem:[%s3667_s29 + $0x188] sm:$0xff]  ;;  %534 = vst [vmem:[%s3672_s13 + $0x78] sm:$0xff] %v2995_v48  ;;  %v2998_v51 = vld [vmem:[%s3667_s29 + $0x190] sm:$0xff] }
  0x41   : > { %536 = vst [vmem:[%s3672_s13 + $0x80] sm:$0xff] %v2996_v49  ;;  %538 = vst [vmem:[%s3672_s13 + $0x88] sm:$0xff] %v2997_v50  ;;  %v2999_v52 = vld [vmem:[%s3667_s29 + $0x198] sm:$0xff]  ;;  %v3000_v53 = vld [vmem:[%s3667_s29 + $0x1a0] sm:$0xff] }
  0x42   : > { %540 = vst [vmem:[%s3672_s13 + $0x90] sm:$0xff] %v2998_v51  ;;  %542 = vst [vmem:[%s3672_s13 + $0x98] sm:$0xff] %v2999_v52  ;;  %v3001_v54 = vld [vmem:[%s3667_s29 + $0x1a8] sm:$0xff]  ;;  %v3002_v55 = vld [vmem:[%s3667_s29 + $0x1b0] sm:$0xff] }
  0x43   : > { %544 = vst [vmem:[%s3672_s13 + $0xa0] sm:$0xff] %v3000_v53  ;;  %v3003_v56 = vld [vmem:[%s3667_s29 + $0x1b8] sm:$0xff]  ;;  %546 = vst [vmem:[%s3672_s13 + $0xa8] sm:$0xff] %v3001_v54  ;;  %v3004_v57 = vld [vmem:[%s3667_s29 + $0x1c0] sm:$0xff] }
  0x44   : > { %548 = vst [vmem:[%s3672_s13 + $0xb0] sm:$0xff] %v3002_v55  ;;  %550 = vst [vmem:[%s3672_s13 + $0xb8] sm:$0xff] %v3003_v56  ;;  %v3005_v58 = vld [vmem:[%s3667_s29 + $0x1c8] sm:$0xff]  ;;  %v3006_v59 = vld [vmem:[%s3667_s29 + $0x1d0] sm:$0xff] }
  0x45   : > { %552 = vst [vmem:[%s3672_s13 + $0xc0] sm:$0xff] %v3004_v57  ;;  %554 = vst [vmem:[%s3672_s13 + $0xc8] sm:$0xff] %v3005_v58  ;;  %v3007_v60 = vld [vmem:[%s3667_s29 + $0x1d8] sm:$0xff]  ;;  %v3008_v61 = vld [vmem:[%s3667_s29 + $0x1e0] sm:$0xff] }
  0x46   : > { %556 = vst [vmem:[%s3672_s13 + $0xd0] sm:$0xff] %v3006_v59  ;;  %v3009_v62 = vld [vmem:[%s3667_s29 + $0x1e8] sm:$0xff]  ;;  %558 = vst [vmem:[%s3672_s13 + $0xd8] sm:$0xff] %v3007_v60  ;;  %v3010_v63 = vld [vmem:[%s3667_s29 + $0x1f0] sm:$0xff] }
  0x47   : > { %560 = vst [vmem:[%s3672_s13 + $0xe0] sm:$0xff] %v3008_v61  ;;  %562 = vst [vmem:[%s3672_s13 + $0xe8] sm:$0xff] %v3009_v62  ;;  %v3011_v0 = vld [vmem:[%s3667_s29 + $0x1f8] sm:$0xff]  ;;  %v3012_v1 = vld [vmem:[%s3667_s29 + $0x200] sm:$0xff] }
  0x48   : > { %564 = vst [vmem:[%s3672_s13 + $0xf0] sm:$0xff] %v3010_v63  ;;  %566 = vst [vmem:[%s3672_s13 + $0xf8] sm:$0xff] %v3011_v0 }
  0x49   : > { %568 = vst [vmem:[%s3672_s13 + $0x100] sm:$0xff] %v3012_v1 }
  0x4a   : > { %576 = vsyncadd %s469_s14, 4224 }
  0x4b PF: > { %s578_s12 = smul.u32 264, %s5274_s11  ;;  %s580_s20 = scalar_lea.sflag [#allocation3], %s5274_s11 }
  0x4d   : > { %s3740_s21 = scalar_lea.vmem [#allocation2], %s578_s12 }
  0x4e   : > { %3493 = dma.done.wait %s580_s20, 4224 }
  0x4f   : > { %3494 = vsyncadd %s580_s20, 4294963072  ;;  %v617_v2 = vlaneseq  ;;  %v584_v11 = vld [vmem:[%s5238_s1] sm:$0x7f] }
  0x50   : > { %v585_v12 = vld [vmem:[%s3740_s21] sm:$0xff]  ;;  %v586_v29 = vld [vmem:[%s3740_s21 + $0x8] sm:$0xff]  ;;  %v587_v44 = vld [vmem:[%s3740_s21 + $0x10] sm:$0xff] }
  0x51   : > { %v3743_v3 = vshrl.u32 %v617_v2, 7  ;;  %v653_v13 = vld [vmem:[%s3740_s21 + $0x1] sm:$0xff]  ;;  %v654_v30 = vld [vmem:[%s3740_s21 + $0x9] sm:$0xff]  ;;  %v655_v45 = vld [vmem:[%s3740_s21 + $0x11] sm:$0xff] }
  0x52   : > { %v753_v16 = vld [vmem:[%s3740_s21 + $0x2] sm:$0xff]  ;;  %v754_v31 = vld [vmem:[%s3740_s21 + $0xa] sm:$0xff]  ;;  %v755_v50 = vld [vmem:[%s3740_s21 + $0x12] sm:$0xff] }
  0x53   : > { %5254 = vst [vmem:[#allocation8_spill] sm:$0xff] %v3743_v3  ;;  %v5249_v4 = vsub.s32 0, %v3743_v3  ;;  %v5248_v5 = vsub.s32 1, %v3743_v3  ;;  %v787_v6 = vsub.s32 2, %v3743_v3  ;;  %v887_v7 = vsub.s32 3, %v3743_v3  ;;  %v853_v18 = vld [vmem:[%s3740_s21 + $0x3] sm:$0xff] }
  0x54   : > { %v987_v8 = vsub.s32 4, %v3743_v3  ;;  %v1087_v9 = vsub.s32 5, %v3743_v3  ;;  %v1187_v10 = vsub.s32 6, %v3743_v3  ;;  %v953_v20 = vld [vmem:[%s3740_s21 + $0x4] sm:$0xff]  ;;  %v954_v37 = vld [vmem:[%s3740_s21 + $0xc] sm:$0xff]  ;;  %v955_v52 = vld [vmem:[%s3740_s21 + $0x14] sm:$0xff] }
  0x55   : > { %v3759_v14 = vrot.slane %v584_v11, %v5249_v4  ;;  %v3763_v15 = vrot.slane %v584_v11, %v5248_v5  ;;  %v3766_v17 = vrot.slane %v584_v11, %v787_v6  ;;  %v3769_v19 = vrot.slane %v584_v11, %v887_v7  ;;  %v1053_v22 = vld [vmem:[%s3740_s21 + $0x5] sm:$0xff]  ;;  %v1054_v38 = vld [vmem:[%s3740_s21 + $0xd] sm:$0xff]  ;;  %v1055_v57 = vld [vmem:[%s3740_s21 + $0x15] sm:$0xff] }
  0x56   : > { %v3772_v21 = vrot.slane %v584_v11, %v987_v8  ;;  %v3775_v23 = vrot.slane %v584_v11, %v1087_v9  ;;  %v1153_v24 = vld [vmem:[%s3740_s21 + $0x6] sm:$0xff]  ;;  %v3778_v25 = vrot.slane %v584_v11, %v1187_v10  ;;  %v1154_v43 = vld [vmem:[%s3740_s21 + $0xe] sm:$0xff]  ;;  %v1155_v58 = vld [vmem:[%s3740_s21 + $0x16] sm:$0xff] }
  0x57   : > { %v621_v26 = vmul.f32 %v3759_v14, %v585_v12  ;;  %v689_v27 = vmul.f32 %v3763_v15, %v653_v13  ;;  %v789_v28 = vmul.f32 %v3766_v17, %v753_v16  ;;  %v889_v32 = vmul.f32 %v3769_v19, %v853_v18  ;;  %v854_v36 = vld [vmem:[%s3740_s21 + $0xb] sm:$0xff]  ;;  %v855_v51 = vld [vmem:[%s3740_s21 + $0x13] sm:$0xff]  ;;  %v856_v2 = vld [vmem:[%s3740_s21 + $0x1b] sm:$0xff] }
  0x58   : > { %v989_v33 = vmul.f32 %v3772_v21, %v953_v20  ;;  %v1089_v34 = vmul.f32 %v3775_v23, %v1053_v22  ;;  %v622_v35 = vmul.f32 %v3759_v14, %v586_v29  ;;  %v3794_v40 = vmul.f32 %v3778_v25, %v1153_v24  ;;  %v588_v59 = vld [vmem:[%s3740_s21 + $0x18] sm:$0xff]  ;;  %v589_v20 = vld [vmem:[%s3740_s21 + $0x20] sm:$0xff] }
  0x59   : > { %v721_v39 = vadd.f32 %v689_v27, %v621_v26  ;;  %v690_v41 = vmul.f32 %v3763_v15, %v654_v30  ;;  %v790_v42 = vmul.f32 %v3766_v17, %v754_v31  ;;  %v890_v46 = vmul.f32 %v3769_v19, %v854_v36  ;;  %v656_v0 = vld [vmem:[%s3740_s21 + $0x19] sm:$0xff]  ;;  %v657_v22 = vld [vmem:[%s3740_s21 + $0x21] sm:$0xff] }
  0x5a   : > { %v990_v47 = vmul.f32 %v3772_v21, %v954_v37  ;;  %v1090_v48 = vmul.f32 %v3775_v23, %v1054_v38  ;;  %v623_v49 = vmul.f32 %v3759_v14, %v587_v44  ;;  %v691_v55 = vmul.f32 %v3763_v15, %v655_v45  ;;  %v756_v1 = vld [vmem:[%s3740_s21 + $0x1a] sm:$0xff]  ;;  %v757_v24 = vld [vmem:[%s3740_s21 + $0x22] sm:$0xff]  ;;  %v779_v3 = vld [vmem:[%s3740_s21 + $0xd2] sm:$0xff] }
  0x5b   : > { %v821_v53 = vadd.f32 %v789_v28, %v721_v39  ;;  %v722_v54 = vadd.f32 %v690_v41, %v622_v35  ;;  %v791_v56 = vmul.f32 %v3766_v17, %v755_v50  ;;  %v1190_v60 = vmul.f32 %v3778_v25, %v1154_v43  ;;  %v956_v10 = vld [vmem:[%s3740_s21 + $0x1c] sm:$0xff]  ;;  %v957_v38 = vld [vmem:[%s3740_s21 + $0x24] sm:$0xff] }
  0x5c   : > { %v891_v61 = vmul.f32 %v3769_v19, %v855_v51  ;;  %v991_v62 = vmul.f32 %v3772_v21, %v955_v52  ;;  %v1091_v63 = vmul.f32 %v3775_v23, %v1055_v57  ;;  %v723_v8 = vadd.f32 %v691_v55, %v623_v49  ;;  %v1056_v11 = vld [vmem:[%s3740_s21 + $0x1d] sm:$0xff]  ;;  %v1057_v43 = vld [vmem:[%s3740_s21 + $0x25] sm:$0xff] }
  0x5d   : > { %v921_v6 = vadd.f32 %v889_v32, %v821_v53  ;;  %v822_v7 = vadd.f32 %v790_v42, %v722_v54  ;;  %v624_v9 = vmul.f32 %v3759_v14, %v588_v59  ;;  %v1191_v12 = vmul.f32 %v3778_v25, %v1155_v58  ;;  %v1156_v30 = vld [vmem:[%s3740_s21 + $0x1e] sm:$0xff]  ;;  %v590_v44 = vld [vmem:[%s3740_s21 + $0x28] sm:$0xff] }
  0x5e   : > { %v692_v13 = vmul.f32 %v3763_v15, %v656_v0  ;;  %v792_v16 = vmul.f32 %v3766_v17, %v756_v1  ;;  %v892_v18 = vmul.f32 %v3769_v19, %v856_v2  ;;  %v823_v28 = vadd.f32 %v791_v56, %v723_v8  ;;  %v857_v31 = vld [vmem:[%s3740_s21 + $0x23] sm:$0xff]  ;;  %v3843_v45 = vld [vmem:[%s5239_s2] ss:$0 sm:$0xff]  ;;  %v858_v56 = vld [vmem:[%s3740_s21 + $0x2b] sm:$0xff] }
  0x5f   : > { %v1021_v26 = vadd.f32 %v989_v33, %v921_v6  ;;  %v922_v27 = vadd.f32 %v890_v46, %v822_v7  ;;  %v992_v29 = vmul.f32 %v3772_v21, %v956_v10  ;;  %v1092_v35 = vmul.f32 %v3775_v23, %v1056_v11  ;;  %v758_v55 = vld [vmem:[%s3740_s21 + $0x2a] sm:$0xff] }
  0x60   : > { %v724_v32 = vadd.f32 %v692_v13, %v624_v9  ;;  %v625_v36 = vmul.f32 %v3759_v14, %v589_v20  ;;  %v693_v37 = vmul.f32 %v3763_v15, %v657_v22  ;;  %v923_v33 = vadd.f32 %v891_v61, %v823_v28  ;;  %v1157_v6 = vld [vmem:[%s3740_s21 + $0x26] sm:$0xff]  ;;  %v591_v13 = vld [vmem:[%s3740_s21 + $0x30] sm:$0xff] }
  0x61   : > { %v1121_v39 = vadd.f32 %v1089_v34, %v1021_v26  ;;  %v1022_v41 = vadd.f32 %v990_v47, %v922_v27  ;;  %v793_v42 = vmul.f32 %v3766_v17, %v757_v24  ;;  %v1192_v49 = vmul.f32 %v3778_v25, %v1156_v30  ;;  %v658_v34 = vld [vmem:[%s3740_s21 + $0x29] sm:$0xff]  ;;  %v759_v24 = vld [vmem:[%s3740_s21 + $0x32] sm:$0xff] }
  0x62   : > { %v824_v46 = vadd.f32 %v792_v16, %v724_v32  ;;  %v725_v50 = vadd.f32 %v693_v37, %v625_v36  ;;  %v893_v51 = vmul.f32 %v3769_v19, %v857_v31  ;;  %v1023_v53 = vadd.f32 %v991_v62, %v923_v33  ;;  %v958_v9 = vld [vmem:[%s3740_s21 + $0x2c] sm:$0xff]  ;;  %v592_v37 = vld [vmem:[%s3740_s21 + $0x38] sm:$0xff]  ;;  %v977_v4 = vld [vmem:[%s3740_s21 + $0xc4] sm:$0xff] }
  0x63   : > { %v1221_v47 = vadd.f32 %v3794_v40, %v1121_v39  ;;  %v1122_v52 = vadd.f32 %v1090_v48, %v1022_v41  ;;  %v993_v54 = vmul.f32 %v3772_v21, %v957_v38  ;;  %v1093_v59 = vmul.f32 %v3775_v23, %v1057_v43  ;;  %v659_v16 = vld [vmem:[%s3740_s21 + $0x31] sm:$0xff]  ;;  %v660_v43 = vld [vmem:[%s3740_s21 + $0x39] sm:$0xff] }
  0x64   : > { %v924_v57 = vadd.f32 %v892_v18, %v824_v46  ;;  %v825_v58 = vadd.f32 %v793_v42, %v725_v50  ;;  %v626_v61 = vmul.f32 %v3759_v14, %v590_v44  ;;  %v1123_v1 = vadd.f32 %v1091_v63, %v1023_v53  ;;  %v1058_v22 = vld [vmem:[%s3740_s21 + $0x2d] sm:$0xff]  ;;  %v1059_v50 = vld [vmem:[%s3740_s21 + $0x35] sm:$0xff] }
  0x65   : > { %v3855_v0 = vadd.f32 %v3843_v45, %v1221_v47  ;;  %v1222_v40 = vadd.f32 %v1190_v60, %v1122_v52  ;;  %v694_v48 = vmul.f32 %v3763_v15, %v658_v34  ;;  %v794_v7 = vmul.f32 %v3766_v17, %v758_v55  ;;  %v859_v30 = vld [vmem:[%s3740_s21 + $0x33] sm:$0xff]  ;;  %v860_v55 = vld [vmem:[%s3740_s21 + $0x3b] sm:$0xff] }
  0x66   : > { %v1024_v62 = vadd.f32 %v992_v29, %v924_v57  ;;  %v925_v2 = vadd.f32 %v893_v51, %v825_v58  ;;  %v894_v8 = vmul.f32 %v3769_v19, %v858_v56  ;;  %v1223_v63 = vadd.f32 %v1191_v12, %v1123_v1  ;;  %v1158_v12 = vld [vmem:[%s3740_s21 + $0x2e] sm:$0xff]  ;;  %v1159_v51 = vld [vmem:[%s3740_s21 + $0x36] sm:$0xff] }
  0x67   : > { %1292 = vadd.xlane.f32.xlu0 %v3855_v0  ;;  %v1389_v10 = vmul.f32 %v3855_v0, %v3855_v0  ;;  %v3866_v60 = vadd.f32 %v3843_v45, %v1222_v40  ;;  %v726_v11 = vadd.f32 %v694_v48, %v626_v61  ;;  %v1193_v27 = vmul.f32 %v3778_v25, %v1157_v6  ;;  %v959_v42 = vld [vmem:[%s3740_s21 + $0x34] sm:$0xff]  ;;  %v593_v61 = vld [vmem:[%s3740_s21 + $0x40] sm:$0xff] }
  0x68   : > { %v1124_v18 = vadd.f32 %v1092_v35, %v1024_v62  ;;  %v1025_v20 = vadd.f32 %v993_v54, %v925_v2  ;;  %v994_v29 = vmul.f32 %v3772_v21, %v958_v9  ;;  %v627_v35 = vmul.f32 %v3759_v14, %v591_v13  ;;  %v760_v34 = vld [vmem:[%s3740_s21 + $0x3a] sm:$0xff]  ;;  %v861_v13 = vld [vmem:[%s3740_s21 + $0x43] sm:$0xff] }
  0x69   : > { %1421 = vadd.xlane.f32.xlu1 %v1389_v10  ;;  %v1390_v26 = vmul.f32 %v3866_v60, %v3866_v60  ;;  %v826_v28 = vadd.f32 %v794_v7, %v726_v11  ;;  %v695_v36 = vmul.f32 %v3763_v15, %v659_v16  ;;  %v3883_v38 = vadd.f32 %v3843_v45, %v1223_v63  ;;  %v661_v40 = vld [vmem:[%s3740_s21 + $0x41] sm:$0xff] }
  0x6a   : > { %v1224_v31 = vadd.f32 %v1192_v49, %v1124_v18  ;;  %v1125_v32 = vadd.f32 %v1093_v59, %v1025_v20  ;;  %v1094_v41 = vmul.f32 %v3775_v23, %v1058_v22  ;;  %v795_v33 = vmul.f32 %v3766_v17, %v759_v24  ;;  %v960_v6 = vld [vmem:[%s3740_s21 + $0x3c] sm:$0xff]  ;;  %v594_v24 = vld [vmem:[%s3740_s21 + $0x48] sm:$0xff] }
  0x6b   : > { %1294 = vadd.xlane.f32.xlu0 %v3866_v60  ;;  %v926_v39 = vadd.f32 %v894_v8, %v826_v28  ;;  %v1194_v44 = vmul.f32 %v3778_v25, %v1158_v12  ;;  %v727_v46 = vadd.f32 %v695_v36, %v627_v35  ;;  %v895_v49 = vmul.f32 %v3769_v19, %v859_v30  ;;  %v761_v7 = vld [vmem:[%s3740_s21 + $0x42] sm:$0xff] }
  0x6c   : > { %v3895_v47 = vadd.f32 %v3843_v45, %v1224_v31  ;;  %v1225_v52 = vadd.f32 %v1193_v27, %v1125_v32  ;;  %v628_v54 = vmul.f32 %v3759_v14, %v592_v37  ;;  %v1391_v56 = vmul.f32 %v3883_v38, %v3883_v38  ;;  %v1060_v11 = vld [vmem:[%s3740_s21 + $0x3d] sm:$0xff]  ;;  %v662_v30 = vld [vmem:[%s3740_s21 + $0x49] sm:$0xff] }
  0x6d   : > { %1423 = vadd.xlane.f32.xlu1 %v1390_v26  ;;  %v1026_v53 = vadd.f32 %v994_v29, %v926_v39  ;;  %v827_v57 = vadd.f32 %v795_v33, %v727_v46  ;;  %v995_v58 = vmul.f32 %v3772_v21, %v959_v42  ;;  %v696_v59 = vmul.f32 %v3763_v15, %v660_v43  ;;  %v961_v12 = vld [vmem:[%s3740_s21 + $0x44] sm:$0xff] }
  0x6e   : > { %v1095_v48 = vmul.f32 %v3775_v23, %v1059_v50  ;;  %v1195_v62 = vmul.f32 %v3778_v25, %v1159_v51  ;;  %v796_v2 = vmul.f32 %v3766_v17, %v760_v34  ;;  %v1392_v8 = vmul.f32 %v3895_v47, %v3895_v47  ;;  %v762_v31 = vld [vmem:[%s3740_s21 + $0x4a] sm:$0xff]  ;;  %v1160_v36 = vld [vmem:[%s3740_s21 + $0x3e] sm:$0xff] }
  0x6f   : > { %1296 = vadd.xlane.f32.xlu0 %v3883_v38  ;;  %v1126_v1 = vadd.f32 %v1094_v41, %v1026_v53  ;;  %v927_v9 = vadd.f32 %v895_v49, %v827_v57  ;;  %v728_v10 = vadd.f32 %v696_v59, %v628_v54  ;;  %v896_v63 = vmul.f32 %v3769_v19, %v860_v55  ;;  %v1061_v41 = vld [vmem:[%s3740_s21 + $0x45] sm:$0xff]  ;;  %v595_v53 = vld [vmem:[%s3740_s21 + $0x50] sm:$0xff] }
  0x70   : > { %v3918_v16 = vadd.f32 %v3843_v45, %v1225_v52  ;;  %v629_v20 = vmul.f32 %v3759_v14, %v593_v61  ;;  %v697_v22 = vmul.f32 %v3763_v15, %v661_v40  ;;  %v996_v28 = vmul.f32 %v3772_v21, %v960_v6  ;;  %v1161_v33 = vld [vmem:[%s3740_s21 + $0x46] sm:$0xff]  ;;  %v663_v54 = vld [vmem:[%s3740_s21 + $0x51] sm:$0xff] }
  0x71   : > { %1298 = vadd.xlane.f32.xlu1 %v3895_v47  ;;  %v1226_v18 = vadd.f32 %v1194_v44, %v1126_v1  ;;  %v1027_v26 = vadd.f32 %v995_v58, %v927_v9  ;;  %v828_v27 = vadd.f32 %v796_v2, %v728_v10  ;;  %v797_v29 = vmul.f32 %v3766_v17, %v761_v7  ;;  %v862_v49 = vld [vmem:[%s3740_s21 + $0x4b] sm:$0xff]  ;;  %v863_v7 = vld [vmem:[%s3740_s21 + $0x53] sm:$0xff] }
  0x72   : > { %v1393_v32 = vmul.f32 %v3918_v16, %v3918_v16  ;;  %v1096_v35 = vmul.f32 %v3775_v23, %v1060_v11  ;;  %v729_v37 = vadd.f32 %v697_v22, %v629_v20  ;;  %v897_v39 = vmul.f32 %v3769_v19, %v861_v13  ;;  %v962_v59 = vld [vmem:[%s3740_s21 + $0x4c] sm:$0xff]  ;;  %v963_v22 = vld [vmem:[%s3740_s21 + $0x54] sm:$0xff] }
  0x73   : > { %1425 = vadd.xlane.f32.xlu0 %v1391_v56  ;;  %v3936_v42 = vadd.f32 %v3843_v45, %v1226_v18  ;;  %v1127_v43 = vadd.f32 %v1095_v48, %v1027_v26  ;;  %v928_v44 = vadd.f32 %v896_v63, %v828_v27  ;;  %v630_v46 = vmul.f32 %v3759_v14, %v594_v24  ;;  %v763_v61 = vld [vmem:[%s3740_s21 + $0x52] sm:$0xff] }
  0x74   : > { %v829_v50 = vadd.f32 %v797_v29, %v729_v37  ;;  %v997_v51 = vmul.f32 %v3772_v21, %v961_v12  ;;  %v698_v34 = vmul.f32 %v3763_v15, %v662_v30  ;;  %v798_v52 = vmul.f32 %v3766_v17, %v762_v31  ;;  %v1062_v6 = vld [vmem:[%s3740_s21 + $0x4d] sm:$0xff]  ;;  %v596_v24 = vld [vmem:[%s3740_s21 + $0x58] sm:$0xff] }
  0x75   : > { %1427 = vadd.xlane.f32.xlu1 %v1392_v8  ;;  %v1028_v55 = vadd.f32 %v996_v28, %v928_v44  ;;  %v1196_v56 = vmul.f32 %v3778_v25, %v1160_v36  ;;  %v1097_v57 = vmul.f32 %v3775_v23, %v1061_v41  ;;  %v1197_v58 = vmul.f32 %v3778_v25, %v1161_v33  ;;  %v1162_v10 = vld [vmem:[%s3740_s21 + $0x4e] sm:$0xff]  ;;  %v664_v26 = vld [vmem:[%s3740_s21 + $0x59] sm:$0xff] }
  0x76   : > { %v1227_v40 = vadd.f32 %v1195_v62, %v1127_v43  ;;  %v929_v1 = vadd.f32 %v897_v39, %v829_v50  ;;  %v730_v48 = vadd.f32 %v698_v34, %v630_v46  ;;  %v898_v2 = vmul.f32 %v3769_v19, %v862_v49  ;;  %v764_v30 = vld [vmem:[%s3740_s21 + $0x5a] sm:$0xff] }
  0x77   : > { %1300 = vadd.xlane.f32.xlu0 %v3918_v16  ;;  %v1394_v8 = vmul.f32 %v3936_v42, %v3936_v42  ;;  %v1128_v9 = vadd.f32 %v1096_v35, %v1028_v55  ;;  %v631_v63 = vmul.f32 %v3759_v14, %v595_v53  ;;  %v699_v11 = vmul.f32 %v3763_v15, %v663_v54  ;;  %v1063_v39 = vld [vmem:[%s3740_s21 + $0x55] sm:$0xff]  ;;  %v597_v53 = vld [vmem:[%s3740_s21 + $0x60] sm:$0xff] }
  0x78   : > { %v1029_v62 = vadd.f32 %v997_v51, %v929_v1  ;;  %v830_v13 = vadd.f32 %v798_v52, %v730_v48  ;;  %v998_v18 = vmul.f32 %v3772_v21, %v962_v59  ;;  %v799_v20 = vmul.f32 %v3766_v17, %v763_v61  ;;  %v864_v41 = vld [vmem:[%s3740_s21 + $0x5b] sm:$0xff] }
  0x79   : > { %1302 = vadd.xlane.f32.xlu1 %v3936_v42  ;;  %v1228_v27 = vadd.f32 %v1196_v56, %v1128_v9  ;;  %v1098_v28 = vmul.f32 %v3775_v23, %v1062_v6  ;;  %v731_v29 = vadd.f32 %v699_v11, %v631_v63  ;;  %v899_v12 = vmul.f32 %v3769_v19, %v863_v7  ;;  %v1163_v44 = vld [vmem:[%s3740_s21 + $0x56] sm:$0xff]  ;;  %v665_v54 = vld [vmem:[%s3740_s21 + $0x61] sm:$0xff] }
  0x7a   : > { %v3969_v31 = vadd.f32 %v3843_v45, %v1227_v40  ;;  %v1129_v35 = vadd.f32 %v1097_v57, %v1029_v62  ;;  %v930_v36 = vadd.f32 %v898_v2, %v830_v13  ;;  %v1198_v37 = vmul.f32 %v3778_v25, %v1162_v10  ;;  %v964_v49 = vld [vmem:[%s3740_s21 + $0x5c] sm:$0xff]  ;;  %v598_v62 = vld [vmem:[%s3740_s21 + $0x68] sm:$0xff] }
  0x7b   : > { %1429 = vadd.xlane.f32.xlu0 %v1393_v32  ;;  %v831_v33 = vadd.f32 %v799_v20, %v731_v29  ;;  %v999_v43 = vmul.f32 %v3772_v21, %v963_v22  ;;  %v632_v46 = vmul.f32 %v3759_v14, %v596_v24  ;;  %v700_v32 = vmul.f32 %v3763_v15, %v664_v26  ;;  %v1064_v61 = vld [vmem:[%s3740_s21 + $0x5d] sm:$0xff]  ;;  %v666_v24 = vld [vmem:[%s3740_s21 + $0x69] sm:$0xff] }
  0x7c   : > { %v3980_v50 = vadd.f32 %v3843_v45, %v1228_v27  ;;  %v1395_v51 = vmul.f32 %v3969_v31, %v3969_v31  ;;  %v1030_v34 = vadd.f32 %v998_v18, %v930_v36  ;;  %v800_v52 = vmul.f32 %v3766_v17, %v764_v30  ;;  %v765_v40 = vld [vmem:[%s3740_s21 + $0x62] sm:$0xff]  ;;  %v766_v30 = vld [vmem:[%s3740_s21 + $0x6a] sm:$0xff] }
  0x7d   : > { %1431 = vadd.xlane.f32.xlu1 %v1394_v8  ;;  %v931_v55 = vadd.f32 %v899_v12, %v831_v33  ;;  %v1099_v56 = vmul.f32 %v3775_v23, %v1063_v39  ;;  %v732_v57 = vadd.f32 %v700_v32, %v632_v46  ;;  %v900_v59 = vmul.f32 %v3769_v19, %v864_v41  ;;  %v865_v7 = vld [vmem:[%s3740_s21 + $0x63] sm:$0xff]  ;;  %v866_v39 = vld [vmem:[%s3740_s21 + $0x6b] sm:$0xff] }
  0x7e   : > { %v1229_v1 = vadd.f32 %v1197_v58, %v1129_v35  ;;  %v1130_v48 = vadd.f32 %v1098_v28, %v1030_v34  ;;  %v1199_v2 = vmul.f32 %v3778_v25, %v1163_v44  ;;  %v1000_v6 = vmul.f32 %v3772_v21, %v964_v49  ;;  %v1164_v10 = vld [vmem:[%s3740_s21 + $0x5e] sm:$0xff]  ;;  %v1165_v44 = vld [vmem:[%s3740_s21 + $0x66] sm:$0xff]  ;;  %v599_v32 = vld [vmem:[%s3740_s21 + $0x70] sm:$0xff] }
  0x7f   : > { %1304 = vadd.xlane.f32.xlu0 %v3969_v31  ;;  %v1031_v8 = vadd.f32 %v999_v43, %v931_v55  ;;  %v832_v9 = vadd.f32 %v800_v52, %v732_v57  ;;  %v633_v63 = vmul.f32 %v3759_v14, %v597_v53  ;;  %v701_v11 = vmul.f32 %v3763_v15, %v665_v54  ;;  %v965_v22 = vld [vmem:[%s3740_s21 + $0x64] sm:$0xff]  ;;  %v667_v49 = vld [vmem:[%s3740_s21 + $0x71] sm:$0xff] }
  0x80   : > { %v1396_v58 = vmul.f32 %v3980_v50, %v3980_v50  ;;  %v1230_v13 = vadd.f32 %v1198_v37, %v1130_v48  ;;  %v1100_v18 = vmul.f32 %v3775_v23, %v1064_v61  ;;  %v801_v20 = vmul.f32 %v3766_v17, %v765_v40  ;;  %v1065_v12 = vld [vmem:[%s3740_s21 + $0x65] sm:$0xff]  ;;  %v767_v61 = vld [vmem:[%s3740_s21 + $0x72] sm:$0xff] }
  0x81   : > { %1306 = vadd.xlane.f32.xlu1 %v3980_v50  ;;  %v1131_v26 = vadd.f32 %v1099_v56, %v1031_v8  ;;  %v932_v27 = vadd.f32 %v900_v59, %v832_v9  ;;  %v733_v28 = vadd.f32 %v701_v11, %v633_v63  ;;  %v901_v29 = vmul.f32 %v3769_v19, %v865_v7  ;;  %v966_v54 = vld [vmem:[%s3740_s21 + $0x6c] sm:$0xff]  ;;  %v967_v11 = vld [vmem:[%s3740_s21 + $0x74] sm:$0xff] }
  0x82   : > { %v4010_v35 = vadd.f32 %v3843_v45, %v1229_v1  ;;  %v1200_v36 = vmul.f32 %v3778_v25, %v1164_v10  ;;  %v634_v37 = vmul.f32 %v3759_v14, %v598_v62  ;;  %v1001_v43 = vmul.f32 %v3772_v21, %v965_v22  ;;  %v867_v40 = vld [vmem:[%s3740_s21 + $0x73] sm:$0xff] }
  0x83   : > { %1433 = vadd.xlane.f32.xlu0 %v1395_v51  ;;  %v1032_v41 = vadd.f32 %v1000_v6, %v932_v27  ;;  %v833_v33 = vadd.f32 %v801_v20, %v733_v28  ;;  %v702_v46 = vmul.f32 %v3763_v15, %v666_v24  ;;  %v4021_v51 = vadd.f32 %v3843_v45, %v1230_v13  ;;  %v600_v62 = vld [vmem:[%s3740_s21 + $0x78] sm:$0xff] }
  0x84   : > { %v1231_v34 = vadd.f32 %v1199_v2, %v1131_v26  ;;  %v1101_v52 = vmul.f32 %v3775_v23, %v1065_v12  ;;  %v802_v53 = vmul.f32 %v3766_v17, %v766_v30  ;;  %v902_v59 = vmul.f32 %v3769_v19, %v866_v39  ;;  %v1066_v2 = vld [vmem:[%s3740_s21 + $0x6d] sm:$0xff]  ;;  %v768_v26 = vld [vmem:[%s3740_s21 + $0x7a] sm:$0xff] }
  0x85   : > { %1435 = vadd.xlane.f32.xlu1 %v1396_v58  ;;  %v1132_v55 = vadd.f32 %v1100_v18, %v1032_v41  ;;  %v933_v56 = vadd.f32 %v901_v29, %v833_v33  ;;  %v734_v57 = vadd.f32 %v702_v46, %v634_v37  ;;  %v1397_v1 = vmul.f32 %v4010_v35, %v4010_v35  ;;  %v668_v58 = vld [vmem:[%s3740_s21 + $0x79] sm:$0xff]  ;;  %v1166_v18 = vld [vmem:[%s3740_s21 + $0x6e] sm:$0xff] }
  0x86   : > { %v1201_v48 = vmul.f32 %v3778_v25, %v1165_v44  ;;  %v635_v6 = vmul.f32 %v3759_v14, %v599_v32  ;;  %v703_v7 = vmul.f32 %v3763_v15, %v667_v49  ;;  %v1398_v8 = vmul.f32 %v4021_v51, %v4021_v51  ;;  %v868_v30 = vld [vmem:[%s3740_s21 + $0x7b] sm:$0xff] }
  0x87   : > { %1308 = vadd.xlane.f32.xlu0 %v4010_v35  ;;  %v1033_v9 = vadd.f32 %v1001_v43, %v933_v56  ;;  %v834_v10 = vadd.f32 %v802_v53, %v734_v57  ;;  %v1002_v63 = vmul.f32 %v3772_v21, %v966_v54  ;;  %v1232_v13 = vadd.f32 %v1200_v36, %v1132_v55  ;;  %v1067_v39 = vld [vmem:[%s3740_s21 + $0x75] sm:$0xff]  ;;  %v769_v57 = vld [vmem:[%s3740_s21 + $0x82] sm:$0xff] }
  0x88   : > { %v735_v20 = vadd.f32 %v703_v7, %v635_v6  ;;  %v803_v22 = vmul.f32 %v3766_v17, %v767_v61  ;;  %v903_v24 = vmul.f32 %v3769_v19, %v867_v40  ;;  %v4048_v27 = vadd.f32 %v3843_v45, %v1231_v34  ;;  %v968_v43 = vld [vmem:[%s3740_s21 + $0x7c] sm:$0xff] }
  0x89   : > { %1310 = vadd.xlane.f32.xlu1 %v4021_v51  ;;  %v1133_v28 = vadd.f32 %v1101_v52, %v1033_v9  ;;  %v934_v29 = vadd.f32 %v902_v59, %v834_v10  ;;  %v1102_v12 = vmul.f32 %v3775_v23, %v1066_v2  ;;  %v1003_v37 = vmul.f32 %v3772_v21, %v967_v11  ;;  %v601_v34 = vld [vmem:[%s3740_s21 + $0x80] sm:$0xff] }
  0x8a   : > { %v835_v36 = vadd.f32 %v803_v22, %v735_v20  ;;  %v636_v41 = vmul.f32 %v3759_v14, %v600_v62  ;;  %v704_v33 = vmul.f32 %v3763_v15, %v668_v58  ;;  %v1399_v44 = vmul.f32 %v4048_v27, %v4048_v27  ;;  %v669_v52 = vld [vmem:[%s3740_s21 + $0x81] sm:$0xff] }
  0x8b   : > { %1437 = vadd.xlane.f32.xlu0 %v1397_v1  ;;  %v1034_v46 = vadd.f32 %v1002_v63, %v934_v29  ;;  %v1202_v32 = vmul.f32 %v3778_v25, %v1166_v18  ;;  %v804_v49 = vmul.f32 %v3766_v17, %v768_v26  ;;  %v4064_v53 = vadd.f32 %v3843_v45, %v1232_v13  ;;  %v1068_v2 = vld [vmem:[%s3740_s21 + $0x7d] sm:$0xff]  ;;  %v602_v63 = vld [vmem:[%s3740_s21 + $0x88] sm:$0xff] }
  0x8c   : > { %v935_v54 = vadd.f32 %v903_v24, %v835_v36  ;;  %v736_v55 = vadd.f32 %v704_v33, %v636_v41  ;;  %v904_v56 = vmul.f32 %v3769_v19, %v868_v30  ;;  %v1233_v59 = vadd.f32 %v1201_v48, %v1133_v28  ;;  %v869_v6 = vld [vmem:[%s3740_s21 + $0x83] sm:$0xff] }
  0x8d   : > { %1439 = vadd.xlane.f32.xlu1 %v1398_v8  ;;  %v1134_v61 = vadd.f32 %v1102_v12, %v1034_v46  ;;  %v1103_v40 = vmul.f32 %v3775_v23, %v1067_v39  ;;  %v1004_v1 = vmul.f32 %v3772_v21, %v968_v43  ;;  %v1167_v8 = vld [vmem:[%s3740_s21 + $0x76] sm:$0xff]  ;;  %v637_v10 = vmul.f32 %v3759_v14, %v601_v34  ;;  %v969_v13 = vld [vmem:[%s3740_s21 + $0x84] sm:$0xff] }
  0x8e   : > { %v1035_v7 = vadd.f32 %v1003_v37, %v935_v54  ;;  %v836_v9 = vadd.f32 %v804_v49, %v736_v55  ;;  %v705_v48 = vmul.f32 %v3763_v15, %v669_v52  ;;  %v1400_v11 = vmul.f32 %v4064_v53, %v4064_v53  ;;  %v670_v18 = vld [vmem:[%s3740_s21 + $0x89] sm:$0xff]  ;;  %v1168_v24 = vld [vmem:[%s3740_s21 + $0x7e] sm:$0xff]  ;;  %v671_v34 = vld [vmem:[%s3740_s21 + $0x91] sm:$0xff] }
  0x8f   : > { %1312 = vadd.xlane.f32.xlu0 %v4048_v27  ;;  %v1234_v62 = vadd.f32 %v1202_v32, %v1134_v61  ;;  %v805_v58 = vmul.f32 %v3766_v17, %v769_v57  ;;  %v1104_v22 = vmul.f32 %v3775_v23, %v1068_v2  ;;  %v905_v28 = vmul.f32 %v3769_v19, %v869_v6  ;;  %v770_v29 = vld [vmem:[%s3740_s21 + $0x8a] sm:$0xff]  ;;  %v871_v2 = vld [vmem:[%s3740_s21 + $0x93] sm:$0xff] }
  0x90   : > { %v936_v20 = vadd.f32 %v904_v56, %v836_v9  ;;  %v737_v26 = vadd.f32 %v705_v48, %v637_v10  ;;  %v4088_v12 = vadd.f32 %v3843_v45, %v1233_v59  ;;  %v1135_v30 = vadd.f32 %v1103_v40, %v1035_v7  ;;  %v870_v39 = vld [vmem:[%s3740_s21 + $0x8b] sm:$0xff] }
  0x91   : > { %1314 = vadd.xlane.f32.xlu1 %v4064_v53  ;;  %v1203_v36 = vmul.f32 %v3778_v25, %v1167_v8  ;;  %v638_v37 = vmul.f32 %v3759_v14, %v602_v63  ;;  %v1005_v43 = vmul.f32 %v3772_v21, %v969_v13  ;;  %v1069_v46 = vld [vmem:[%s3740_s21 + $0x85] sm:$0xff]  ;;  %v706_v32 = vmul.f32 %v3763_v15, %v670_v18  ;;  %v603_v49 = vld [vmem:[%s3740_s21 + $0x90] sm:$0xff]  ;;  %v604_v13 = vld [vmem:[%s3740_s21 + $0x98] sm:$0xff] }
  0x92   : > { %v1036_v41 = vadd.f32 %v1004_v1, %v936_v20  ;;  %v837_v33 = vadd.f32 %v805_v58, %v737_v26  ;;  %v4099_v52 = vadd.f32 %v3843_v45, %v1234_v62  ;;  %v1204_v54 = vmul.f32 %v3778_v25, %v1168_v24  ;;  %v1169_v59 = vld [vmem:[%s3740_s21 + $0x86] sm:$0xff]  ;;  %v771_v1 = vld [vmem:[%s3740_s21 + $0x92] sm:$0xff] }
  0x93   : > { %1441 = vadd.xlane.f32.xlu0 %v1399_v44  ;;  %v806_v55 = vmul.f32 %v3766_v17, %v770_v29  ;;  %v970_v44 = vld [vmem:[%s3740_s21 + $0x8c] sm:$0xff]  ;;  %v738_v61 = vadd.f32 %v706_v32, %v638_v37  ;;  %v906_v40 = vmul.f32 %v3769_v19, %v870_v39  ;;  %v1401_v6 = vmul.f32 %v4088_v12, %v4088_v12  ;;  %v971_v58 = vld [vmem:[%s3740_s21 + $0x94] sm:$0xff] }
  0x94   : > { %v1136_v56 = vadd.f32 %v1104_v22, %v1036_v41  ;;  %v937_v57 = vadd.f32 %v905_v28, %v837_v33  ;;  %v1105_v7 = vmul.f32 %v3775_v23, %v1069_v46  ;;  %v1070_v8 = vld [vmem:[%s3740_s21 + $0x8d] sm:$0xff]  ;;  %v639_v9 = vmul.f32 %v3759_v14, %v603_v49  ;;  %v672_v18 = vld [vmem:[%s3740_s21 + $0x99] sm:$0xff] }
  0x95   : > { %1443 = vadd.xlane.f32.xlu1 %v1400_v11  ;;  %v707_v10 = vmul.f32 %v3763_v15, %v671_v34  ;;  %v1235_v48 = vadd.f32 %v1203_v36, %v1135_v30  ;;  %v838_v11 = vadd.f32 %v806_v55, %v738_v61  ;;  %v1006_v62 = vmul.f32 %v3772_v21, %v970_v44  ;;  %v772_v28 = vld [vmem:[%s3740_s21 + $0x9a] sm:$0xff]  ;;  %v1170_v39 = vld [vmem:[%s3740_s21 + $0x8e] sm:$0xff] }
  0x96   : > { %v1037_v63 = vadd.f32 %v1005_v43, %v937_v57  ;;  %v1205_v20 = vmul.f32 %v3778_v25, %v1169_v59  ;;  %v807_v24 = vmul.f32 %v3766_v17, %v771_v1  ;;  %v907_v26 = vmul.f32 %v3769_v19, %v871_v2  ;;  %v872_v41 = vld [vmem:[%s3740_s21 + $0x9b] sm:$0xff] }
  0x97   : > { %1316 = vadd.xlane.f32.xlu0 %v4088_v12  ;;  %v739_v22 = vadd.f32 %v707_v10, %v639_v9  ;;  %v1402_v29 = vmul.f32 %v4099_v52, %v4099_v52  ;;  %v1236_v30 = vadd.f32 %v1204_v54, %v1136_v56  ;;  %v938_v36 = vadd.f32 %v906_v40, %v838_v11  ;;  %v1071_v46 = vld [vmem:[%s3740_s21 + $0x95] sm:$0xff]  ;;  %v605_v57 = vld [vmem:[%s3740_s21 + $0xa0] sm:$0xff] }
  0x98   : > { %v1106_v37 = vmul.f32 %v3775_v23, %v1070_v8  ;;  %v1007_v43 = vmul.f32 %v3772_v21, %v971_v58  ;;  %v640_v32 = vmul.f32 %v3759_v14, %v604_v13  ;;  %v708_v49 = vmul.f32 %v3763_v15, %v672_v18  ;;  %v972_v34 = vld [vmem:[%s3740_s21 + $0x9c] sm:$0xff] }
  0x99   : > { %1318 = vadd.xlane.f32.xlu1 %v4099_v52  ;;  %v839_v33 = vadd.f32 %v807_v24, %v739_v22  ;;  %v4135_v54 = vadd.f32 %v3843_v45, %v1235_v48  ;;  %v1137_v55 = vadd.f32 %v1105_v7, %v1037_v63  ;;  %v1038_v44 = vadd.f32 %v1006_v62, %v938_v36  ;;  %v673_v59 = vld [vmem:[%s3740_s21 + $0xa1] sm:$0xff]  ;;  %v1171_v1 = vld [vmem:[%s3740_s21 + $0x96] sm:$0xff] }
  0x9a   : > { %v808_v56 = vmul.f32 %v3766_v17, %v772_v28  ;;  %v1206_v61 = vmul.f32 %v3778_v25, %v1170_v39  ;;  %v740_v2 = vadd.f32 %v708_v49, %v640_v32  ;;  %v773_v8 = vld [vmem:[%s3740_s21 + $0xa2] sm:$0xff]  ;;  %v4145_v7 = vadd.f32 %v3843_v45, %v1236_v30  ;;  %v774_v30 = vld [vmem:[%s3740_s21 + $0xaa] sm:$0xff] }
  0x9b   : > { %1445 = vadd.xlane.f32.xlu0 %v1401_v6  ;;  %v939_v40 = vadd.f32 %v907_v26, %v839_v33  ;;  %v908_v6 = vmul.f32 %v3769_v19, %v872_v41  ;;  %v1138_v9 = vadd.f32 %v1106_v37, %v1038_v44  ;;  %v1107_v10 = vmul.f32 %v3775_v23, %v1071_v46  ;;  %v1072_v63 = vld [vmem:[%s3740_s21 + $0x9d] sm:$0xff]  ;;  %v1073_v26 = vld [vmem:[%s3740_s21 + $0xa5] sm:$0xff] }
  0x9c   : > { %v1008_v48 = vmul.f32 %v3772_v21, %v972_v34  ;;  %v873_v11 = vld [vmem:[%s3740_s21 + $0xa3] sm:$0xff]  ;;  %v840_v13 = vadd.f32 %v808_v56, %v740_v2  ;;  %v641_v22 = vmul.f32 %v3759_v14, %v605_v57  ;;  %v709_v24 = vmul.f32 %v3763_v15, %v673_v59  ;;  %v874_v33 = vld [vmem:[%s3740_s21 + $0xab] sm:$0xff] }
  0x9d   : > { %1447 = vadd.xlane.f32.xlu1 %v1402_v29  ;;  %v973_v62 = vld [vmem:[%s3740_s21 + $0xa4] sm:$0xff]  ;;  %v1039_v58 = vadd.f32 %v1007_v43, %v939_v40  ;;  %v1403_v36 = vmul.f32 %v4135_v54, %v4135_v54  ;;  %v1237_v37 = vadd.f32 %v1205_v20, %v1137_v55  ;;  %v1207_v39 = vmul.f32 %v3778_v25, %v1171_v1  ;;  %v3208_v34 = vld [vmem:[%s5242_s5 + $0x74] ss:$8 sps:$4 sm:$0xff]  }
  0x9e   : > { %v1172_v18 = vld [vmem:[%s3740_s21 + $0x9e] sm:$0xff]  ;;  %v606_v28 = vld [vmem:[%s3740_s21 + $0xa8] sm:$0xff]  ;;  %v809_v41 = vmul.f32 %v3766_v17, %v773_v8  ;;  %v940_v43 = vadd.f32 %v908_v6, %v840_v13  ;;  %v1108_v46 = vmul.f32 %v3775_v23, %v1072_v63  ;;  %v741_v32 = vadd.f32 %v709_v24, %v641_v22  ;;  %v607_v40 = vld [vmem:[%s3740_s21 + $0xb0] sm:$0xff]  ;;  %1911 = vmatprep.subr.bf16.mxu0 %v3208_v34 }
  0x9f   : > { %v674_v29 = vld [vmem:[%s3740_s21 + $0xa9] sm:$0xff]  ;;  %1320 = vadd.xlane.f32.xlu0 %v4135_v54  ;;  %v909_v49 = vmul.f32 %v3769_v19, %v873_v11  ;;  %v1404_v55 = vmul.f32 %v4145_v7, %v4145_v7  ;;  %v1238_v44 = vadd.f32 %v1206_v61, %v1138_v9  ;;  %v1139_v56 = vadd.f32 %v1107_v10, %v1039_v58  ;;  %v675_v1 = vld [vmem:[%s3740_s21 + $0xb1] sm:$0xff] }
  0xa0   : > { %v3210_v20 = vld [vmem:[%s5242_s5 + $0x70] ss:$8 sps:$4 sm:$0xff]   ;;  %v642_v57 = vmul.f32 %v3759_v14, %v606_v28  ;;  %v1040_v2 = vadd.f32 %v1008_v48, %v940_v43  ;;  %v841_v6 = vadd.f32 %v809_v41, %v741_v32  ;;  %v1009_v8 = vmul.f32 %v3772_v21, %v973_v62  ;;  %v3211_v61 = vld [vmem:[%s5242_s5 + $0x64] ss:$8 sps:$4 sm:$0xff]  }
  0xa1   : > { %1322 = vadd.xlane.f32.xlu1 %v4145_v7  ;;  %v974_v59 = vld [vmem:[%s3740_s21 + $0xac] sm:$0xff]  ;;  %v710_v11 = vmul.f32 %v3763_v15, %v674_v29  ;;  %v4188_v9 = vadd.f32 %v3843_v45, %v1237_v37  ;;  %v1208_v10 = vmul.f32 %v3778_v25, %v1172_v18  ;;  %v1109_v48 = vmul.f32 %v3775_v23, %v1073_v26  ;;  %v3213_v18 = vld [vmem:[%s5242_s5 + $0x60] ss:$8 sps:$4 sm:$0xff]  }
  0xa2   : > { %v1173_v63 = vld [vmem:[%s3740_s21 + $0xa6] sm:$0xff]  ;;  %v775_v13 = vld [vmem:[%s3740_s21 + $0xb2] sm:$0xff]  ;;  %v810_v62 = vmul.f32 %v3766_v17, %v774_v30  ;;  %v1140_v24 = vadd.f32 %v1108_v46, %v1040_v2  ;;  %v941_v28 = vadd.f32 %v909_v49, %v841_v6  ;;  %v910_v41 = vmul.f32 %v3769_v19, %v874_v33  ;;  %1912 = vmatpush1.bf16.msra.mxu0 %v3210_v20  ;;  %v776_v32 = vld [vmem:[%s3740_s21 + $0xba] sm:$0xff] }
  0xa3   : > { %1449 = vadd.xlane.f32.xlu0 %v1403_v36  ;;  %v1074_v58 = vld [vmem:[%s3740_s21 + $0xad] sm:$0xff]  ;;  %v742_v29 = vadd.f32 %v710_v11, %v642_v57  ;;  %v608_v36 = vld [vmem:[%s3740_s21 + $0xb8] sm:$0xff]  ;;  %v4201_v26 = vadd.f32 %v3843_v45, %v1238_v44  ;;  %v1405_v30 = vmul.f32 %v4188_v9, %v4188_v9  ;;  %v643_v37 = vmul.f32 %v3759_v14, %v607_v40 }
  0xa4   : > { %v875_v22 = vld [vmem:[%s3740_s21 + $0xb3] sm:$0xff]  ;;  %v711_v43 = vmul.f32 %v3763_v15, %v675_v1  ;;  %v1239_v49 = vadd.f32 %v1207_v39, %v1139_v56  ;;  %v1041_v34 = vadd.f32 %v1009_v8, %v941_v28  ;;  %1913 = vmatprep.subr.bf16.mxu0 %v3211_v61  ;;  %v1209_v40 = vmul.f32 %v3778_v25, %v1173_v63  ;;  %v876_v2 = vld [vmem:[%s3740_s21 + $0xbb] sm:$0xff] }
  0xa5   : > { %1451 = vadd.xlane.f32.xlu1 %v1404_v55  ;;  %v975_v33 = vld [vmem:[%s3740_s21 + $0xb4] sm:$0xff]  ;;  %v842_v20 = vadd.f32 %v810_v62, %v742_v29  ;;  %v1010_v55 = vmul.f32 %v3772_v21, %v974_v59  ;;  %v811_v39 = vmul.f32 %v3766_v17, %v775_v13  ;;  %v911_v56 = vmul.f32 %v3769_v19, %v875_v22  ;;  %v976_v61 = vld [vmem:[%s3740_s21 + $0xbc] sm:$0xff] }
  0xa6   : > { %v676_v46 = vld [vmem:[%s3740_s21 + $0xb9] sm:$0xff]  ;;  %v1174_v44 = vld [vmem:[%s3740_s21 + $0xae] sm:$0xff]  ;;  %v743_v1 = vadd.f32 %v711_v43, %v643_v37  ;;  %v1240_v59 = vadd.f32 %v1208_v10, %v1140_v24  ;;  %v1141_v6 = vadd.f32 %v1109_v48, %v1041_v34  ;;  %v1110_v11 = vmul.f32 %v3775_v23, %v1074_v58  ;;  %1914 = vmatpush1.bf16.msra.mxu0 %v3213_v18  ;;  %v677_v28 = vld [vmem:[%s3740_s21 + $0xc1] sm:$0xff] }
  0xa7   : > { %v3214_v57 = vld [vmem:[%s5242_s5 + $0x54] ss:$8 sps:$4 sm:$0xff]   ;;  %1324 = vadd.xlane.f32.xlu0 %v4188_v9  ;;  %v942_v8 = vadd.f32 %v910_v41, %v842_v20  ;;  %v609_v62 = vld [vmem:[%s3740_s21 + $0xc0] sm:$0xff]  ;;  %v3216_v63 = vld [vmem:[%s5242_s5 + $0x50] ss:$8 sps:$4 sm:$0xff]   ;;  %v1406_v13 = vmul.f32 %v4201_v26, %v4201_v26  ;;  %v644_v24 = vmul.f32 %v3759_v14, %v608_v36  ;;  %v712_v58 = vmul.f32 %v3763_v15, %v676_v46 }
  0xa8   : > { %v843_v10 = vadd.f32 %v811_v39, %v743_v1  ;;  %v1075_v22 = vld [vmem:[%s3740_s21 + $0xb5] sm:$0xff]  ;;  %v777_v29 = vld [vmem:[%s3740_s21 + $0xc2] sm:$0xff]  ;;  %v4236_v41 = vadd.f32 %v3843_v45, %v1239_v49  ;;  %v1011_v37 = vmul.f32 %v3772_v21, %v975_v33  ;;  %v812_v43 = vmul.f32 %v3766_v17, %v776_v32  ;;  %1915 = vmatprep.subr.bf16.mxu0 %v3214_v57 }
  0xa9   : > { %1326 = vadd.xlane.f32.xlu1 %v4201_v26  ;;  %v1175_v48 = vld [vmem:[%s3740_s21 + $0xb6] sm:$0xff]  ;;  %v1042_v18 = vadd.f32 %v1010_v55, %v942_v8  ;;  %v877_v20 = vld [vmem:[%s3740_s21 + $0xc3] sm:$0xff]  ;;  %v1210_v49 = vmul.f32 %v3778_v25, %v1174_v44  ;;  %v744_v55 = vadd.f32 %v712_v58, %v644_v24  ;;  %v912_v32 = vmul.f32 %v3769_v19, %v876_v2 }
  0xaa   : > { %5255 = vst [vmem:[#allocation9_spill] sm:$0xff] %v4236_v41  ;;  %v1076_v34 = vld [vmem:[%s3740_s21 + $0xbd] sm:$0xff]  ;;  %v943_v33 = vadd.f32 %v911_v56, %v843_v10  ;;  %v610_v1 = vld [vmem:[%s3740_s21 + $0xc8] sm:$0xff]  ;;  %v4252_v57 = vadd.f32 %v3843_v45, %v1240_v59  ;;  %v1407_v39 = vmul.f32 %v4236_v41, %v4236_v41  ;;  %v1241_v8 = vadd.f32 %v1209_v40, %v1141_v6 }
  0xab   : > { %v3217_v36 = vld [vmem:[%s5242_s5 + $0x44] ss:$8 sps:$4 sm:$0xff]   ;;  %v3219_v46 = vld [vmem:[%s5242_s5 + $0x40] ss:$8 sps:$4 sm:$0xff]   ;;  %1453 = vadd.xlane.f32.xlu0 %v1405_v30  ;;  %v1142_v5 = vadd.f32 %v1110_v11, %v1042_v18  ;;  %1916 = vmatpush1.bf16.msra.mxu0 %v3216_v63  ;;  %v3220_v44 = vld [vmem:[%s5242_s5 + $0x34] ss:$8 sps:$4 sm:$0xff]   ;;  %v844_v56 = vadd.f32 %v812_v43, %v744_v55  ;;  %v1012_v2 = vmul.f32 %v3772_v21, %v976_v61 }
  0xac   : > { %v678_v30 = vld [vmem:[%s3740_s21 + $0xc9] sm:$0xff]  ;;  %v1176_v10 = vld [vmem:[%s3740_s21 + $0xbe] sm:$0xff]  ;;  %v645_v45 = vmul.f32 %v3759_v14, %v609_v62  ;;  %v713_v59 = vmul.f32 %v3763_v15, %v677_v28  ;;  %v1043_v11 = vadd.f32 %v1011_v37, %v943_v33  ;;  %v1111_v63 = vmul.f32 %v3775_v23, %v1075_v22  ;;  %1917 = vmatprep.subr.bf16.mxu0 %v3217_v36 }
  0xad   : > { %1455 = vadd.xlane.f32.xlu1 %v1406_v13  ;;  %v1077_v40 = vld [vmem:[%s3740_s21 + $0xc5] sm:$0xff]  ;;  %v1211_v24 = vmul.f32 %v3778_v25, %v1175_v48  ;;  %v813_v58 = vmul.f32 %v3766_v17, %v777_v29  ;;  %v944_v62 = vadd.f32 %v912_v32, %v844_v56  ;;  %v1112_v28 = vmul.f32 %v3775_v23, %v1076_v34  ;;  %v611_v37 = vld [vmem:[%s3740_s21 + $0xd0] sm:$0xff]  ;;  %v4284_v43 = vld [vmem:[%s5239_s2] ss:$0 sm:$0xff] }
  0xae   : > { %v778_v6 = vld [vmem:[%s3740_s21 + $0xca] sm:$0xff]  ;;  %v745_v18 = vadd.f32 %v713_v59, %v645_v45  ;;  %v913_v22 = vmul.f32 %v3769_v19, %v877_v20  ;;  %v1408_v29 = vmul.f32 %v4252_v57, %v4252_v57  ;;  %v4287_v36 = vadd.f32 %v4284_v43, %v1241_v8 }
  0xaf   : > { %v878_v13 = vld [vmem:[%s3740_s21 + $0xcb] sm:$0xff]  ;;  %1328 = vadd.xlane.f32.xlu0 %v4236_v41  ;;  %v1242_v34 = vadd.f32 %v1210_v49, %v1142_v5  ;;  %v646_v33 = vmul.f32 %v3759_v14, %v610_v1  ;;  %1918 = vmatpush1.bf16.msra.mxu0 %v3219_v46  ;;  %v1044_v32 = vadd.f32 %v1012_v2, %v944_v62  ;;  %v879_v5 = vld [vmem:[%s3740_s21 + $0xd3] sm:$0xff] }
  0xb0   : > { %v3222_v61 = vld [vmem:[%s5242_s5 + $0x30] ss:$8 sps:$4 sm:$0xff]   ;;  %v3223_v20 = vld [vmem:[%s5242_s5 + $0x24] ss:$8 sps:$4 sm:$0xff]   ;;  %v845_v56 = vadd.f32 %v813_v58, %v745_v18  ;;  %v1013_v45 = vmul.f32 %v3772_v21, %v977_v4  ;;  %v714_v8 = vmul.f32 %v3763_v15, %v678_v30  ;;  %v1143_v49 = vadd.f32 %v1111_v63, %v1043_v11  ;;  %1919 = vmatprep.subr.bf16.mxu0 %v3220_v44  ;;  %v3225_v2 = vld [vmem:[%s5242_s5 + $0x20] ss:$8 sps:$4 sm:$0xff]  }
  0xb1   : > { %v679_v48 = vld [vmem:[%s3740_s21 + $0xd1] sm:$0xff]  ;;  %1330 = vadd.xlane.f32.xlu1 %v4252_v57  ;;  %v1177_v59 = vld [vmem:[%s3740_s21 + $0xc6] sm:$0xff]  ;;  %v1212_v1 = vmul.f32 %v3778_v25, %v1176_v10  ;;  %v1113_v46 = vmul.f32 %v3775_v23, %v1077_v40  ;;  %v814_v41 = vmul.f32 %v3766_v17, %v778_v6  ;;  %v1144_v4 = vadd.f32 %v1112_v28, %v1044_v32  ;;  %v680_v18 = vld [vmem:[%s3740_s21 + $0xd9] sm:$0xff] }
  0xb2   : > { %v978_v55 = vld [vmem:[%s3740_s21 + $0xcc] sm:$0xff]  ;;  %v945_v58 = vadd.f32 %v913_v22, %v845_v56  ;;  %v746_v30 = vadd.f32 %v714_v8, %v646_v33  ;;  %v914_v62 = vmul.f32 %v3769_v19, %v878_v13  ;;  %v1409_v10 = vmul.f32 %v4287_v36, %v4287_v36  ;;  %v612_v13 = vld [vmem:[%s3740_s21 + $0xd8] sm:$0xff] }
  0xb3   : > { %1457 = vadd.xlane.f32.xlu0 %v1407_v39  ;;  %v1078_v11 = vld [vmem:[%s3740_s21 + $0xcd] sm:$0xff]  ;;  %v647_v44 = vmul.f32 %v3759_v14, %v611_v37  ;;  %v715_v40 = vmul.f32 %v3763_v15, %v679_v48  ;;  %1920 = vmatpush1.bf16.msra.mxu0 %v3222_v61  ;;  %v4313_v39 = vadd.f32 %v4284_v43, %v1242_v34 }
  0xb4   : > { %v1045_v6 = vadd.f32 %v1013_v45, %v945_v58  ;;  %v846_v63 = vadd.f32 %v814_v41, %v746_v30  ;;  %v1014_v28 = vmul.f32 %v3772_v21, %v978_v55  ;;  %v1213_v22 = vmul.f32 %v3778_v25, %v1177_v59  ;;  %v979_v61 = vld [vmem:[%s3740_s21 + $0xd4] sm:$0xff]  ;;  %1921 = vmatprep.subr.bf16.mxu0 %v3223_v20  ;;  %v613_v30 = vld [vmem:[%s3740_s21 + $0xe0] sm:$0xff] }
  0xb5   : > { %1459 = vadd.xlane.f32.xlu1 %v1408_v29  ;;  %v747_v33 = vadd.f32 %v715_v40, %v647_v44  ;;  %v815_v37 = vmul.f32 %v3766_v17, %v779_v3  ;;  %v915_v48 = vmul.f32 %v3769_v19, %v879_v5  ;;  %v780_v29 = vld [vmem:[%s3740_s21 + $0xda] sm:$0xff]  ;;  %v1243_v34 = vadd.f32 %v1211_v24, %v1143_v49  ;;  %v1178_v59 = vld [vmem:[%s3740_s21 + $0xce] sm:$0xff] }
  0xb6   : > { %v3226_v41 = vld [vmem:[%s5242_s5 + $0x14] ss:$8 sps:$4 sm:$0xff]   ;;  %v1244_v55 = vadd.f32 %v1212_v1, %v1144_v4  ;;  %v1145_v32 = vadd.f32 %v1113_v46, %v1045_v6  ;;  %v946_v56 = vadd.f32 %v914_v62, %v846_v63  ;;  %v1114_v3 = vmul.f32 %v3775_v23, %v1078_v11  ;;  %v3228_v24 = vld [vmem:[%s5242_s5 + $0x10] ss:$8 sps:$4 sm:$0xff]   ;;  %v3229_v63 = vld [vmem:[%s5242_s5 + $0x4] ss:$8 sps:$4 sm:$0xff]  }
  0xb7   : > { %1332 = vadd.xlane.f32.xlu0 %v4287_v36  ;;  %v880_v45 = vld [vmem:[%s3740_s21 + $0xdb] sm:$0xff]  ;;  %v847_v8 = vadd.f32 %v815_v37, %v747_v33  ;;  %v648_v20 = vmul.f32 %v3759_v14, %v612_v13  ;;  %v716_v5 = vmul.f32 %v3763_v15, %v680_v18  ;;  %1922 = vmatpush1.bf16.msra.mxu0 %v3225_v2  ;;  %v881_v37 = vld [vmem:[%s3740_s21 + $0xe3] sm:$0xff] }
  0xb8   : > { %v1410_v49 = vmul.f32 %v4313_v39, %v4313_v39  ;;  %v1046_v1 = vadd.f32 %v1014_v28, %v946_v56  ;;  %v1015_v46 = vmul.f32 %v3772_v21, %v979_v61  ;;  %v1079_v4 = vld [vmem:[%s3740_s21 + $0xd5] sm:$0xff]  ;;  %v816_v58 = vmul.f32 %v3766_v17, %v780_v29  ;;  %v681_v62 = vld [vmem:[%s3740_s21 + $0xe1] sm:$0xff]  ;;  %1923 = vmatprep.subr.bf16.mxu0 %v3226_v41 }
  0xb9   : > { %1334 = vadd.xlane.f32.xlu1 %v4313_v39  ;;  %v947_v2 = vadd.f32 %v915_v48, %v847_v8  ;;  %v748_v11 = vadd.f32 %v716_v5, %v648_v20  ;;  %v916_v44 = vmul.f32 %v3769_v19, %v880_v45  ;;  %v980_v40 = vld [vmem:[%s3740_s21 + $0xdc] sm:$0xff]  ;;  %v4350_v28 = vadd.f32 %v4284_v43, %v1243_v34  ;;  %v614_v56 = vld [vmem:[%s3740_s21 + $0xe8] sm:$0xff] }
  0xba   : > { %v781_v6 = vld [vmem:[%s3740_s21 + $0xe2] sm:$0xff]  ;;  %v4353_v13 = vadd.f32 %v4284_v43, %v1244_v55  ;;  %v1245_v18 = vadd.f32 %v1213_v22, %v1145_v32  ;;  %v1214_v33 = vmul.f32 %v3778_v25, %v1178_v59  ;;  %v1146_v48 = vadd.f32 %v1114_v3, %v1046_v1  ;;  %v1179_v61 = vld [vmem:[%s3740_s21 + $0xd6] sm:$0xff] }
  0xbb   : > { %1461 = vadd.xlane.f32.xlu0 %v1409_v10  ;;  %v848_v29 = vadd.f32 %v816_v58, %v748_v11  ;;  %v649_v41 = vmul.f32 %v3759_v14, %v613_v30  ;;  %v717_v10 = vmul.f32 %v3763_v15, %v681_v62  ;;  %1924 = vmatpush1.bf16.msra.mxu0 %v3228_v24  ;;  %v3231_v34 = vld [vmem:[%s5242_s5] ss:$8 sps:$4 sm:$0xff]  }
  0xbc   : > { %v1047_v22 = vadd.f32 %v1015_v46, %v947_v2  ;;  %v1115_v55 = vmul.f32 %v3775_v23, %v1079_v4  ;;  %v1016_v32 = vmul.f32 %v3772_v21, %v980_v40  ;;  %v817_v45 = vmul.f32 %v3766_v17, %v781_v6  ;;  %v682_v3 = vld [vmem:[%s3740_s21 + $0xe9] sm:$0xff]  ;;  %v1080_v8 = vld [vmem:[%s3740_s21 + $0xdd] sm:$0xff]  ;;  %1925 = vmatprep.subr.bf16.mxu0 %v3229_v63  ;;  %v683_v6 = vld [vmem:[%s3740_s21 + $0xf1] sm:$0xff] }
  0xbd   : > { %1463 = vadd.xlane.f32.xlu1 %v1410_v49  ;;  %v948_v59 = vadd.f32 %v916_v44, %v848_v29  ;;  %v749_v20 = vadd.f32 %v717_v10, %v649_v41  ;;  %v917_v5 = vmul.f32 %v3769_v19, %v881_v37  ;;  %v782_v24 = vld [vmem:[%s3740_s21 + $0xea] sm:$0xff]  ;;  %v1411_v49 = vmul.f32 %v4350_v28, %v4350_v28  ;;  %v1180_v29 = vld [vmem:[%s3740_s21 + $0xde] sm:$0xff] }
  0xbe   : > { %v1412_v1 = vmul.f32 %v4353_v13, %v4353_v13  ;;  %v1215_v46 = vmul.f32 %v3778_v25, %v1179_v61  ;;  %v981_v4 = vld [vmem:[%s3740_s21 + $0xe4] sm:$0xff]  ;;  %v650_v58 = vmul.f32 %v3759_v14, %v614_v56  ;;  %v4381_v62 = vadd.f32 %v4284_v43, %v1245_v18  ;;  %v615_v40 = vld [vmem:[%s3740_s21 + $0xf0] sm:$0xff] }
  0xbf   : > { %1336 = vadd.xlane.f32.xlu0 %v4350_v28  ;;  %v882_v30 = vld [vmem:[%s3740_s21 + $0xeb] sm:$0xff]  ;;  %v1246_v2 = vadd.f32 %v1214_v33, %v1146_v48  ;;  %v849_v11 = vadd.f32 %v817_v45, %v749_v20  ;;  %v718_v44 = vmul.f32 %v3763_v15, %v682_v3  ;;  %1926 = vmatpush1.bf16.msra.mxu0 %v3231_v34  ;;  %v883_v20 = vld [vmem:[%s3740_s21 + $0xf3] sm:$0xff] }
  0xc0   : > { %v1147_v63 = vadd.f32 %v1115_v55, %v1047_v22  ;;  %v1048_v37 = vadd.f32 %v1016_v32, %v948_v59  ;;  %v1116_v61 = vmul.f32 %v3775_v23, %v1080_v8  ;;  %v818_v18 = vmul.f32 %v3766_v17, %v782_v24  ;;  %v982_v56 = vld [vmem:[%s3740_s21 + $0xec] sm:$0xff]  ;;  %v684_v24 = vld [vmem:[%s3740_s21 + $0xf9] sm:$0xff] }
  0xc1   : > { %1338 = vadd.xlane.f32.xlu1 %v4353_v13  ;;  %v949_v33 = vadd.f32 %v917_v5, %v849_v11  ;;  %v1017_v48 = vmul.f32 %v3772_v21, %v981_v4  ;;  %v750_v41 = vadd.f32 %v718_v44, %v650_v58  ;;  %v918_v10 = vmul.f32 %v3769_v19, %v882_v30  ;;  %v783_v34 = vld [vmem:[%s3740_s21 + $0xf2] sm:$0xff]  ;;  %v1081_v22 = vld [vmem:[%s3740_s21 + $0xe5] sm:$0xff]  ;;  %v784_v11 = vld [vmem:[%s3740_s21 + $0xfa] sm:$0xff] }
  0xc2   : > { %v651_v55 = vmul.f32 %v3759_v14, %v615_v40  ;;  %v719_v32 = vmul.f32 %v3763_v15, %v683_v6  ;;  %v4398_v45 = vadd.f32 %v4284_v43, %v1246_v2  ;;  %v1413_v3 = vmul.f32 %v4381_v62, %v4381_v62  ;;  %v616_v5 = vld [vmem:[%s3740_s21 + $0xf8] sm:$0xff]  ;;  %v1082_v58 = vld [vmem:[%s3740_s21 + $0xed] sm:$0xff] }
  0xc3   : > { %1465 = vadd.xlane.f32.xlu0 %v1411_v49  ;;  %v1216_v59 = vmul.f32 %v3778_v25, %v1180_v29  ;;  %v850_v8 = vadd.f32 %v818_v18, %v750_v41  ;;  %v1148_v49 = vadd.f32 %v1116_v61, %v1048_v37  ;;  %v1018_v4 = vmul.f32 %v3772_v21, %v982_v56  ;;  %v884_v18 = vld [vmem:[%s3740_s21 + $0xfb] sm:$0xff]  ;;  %v1181_v41 = vld [vmem:[%s3740_s21 + $0xe6] sm:$0xff] }
  0xc4   : > { %v751_v30 = vadd.f32 %v719_v32, %v651_v55  ;;  %v819_v2 = vmul.f32 %v3766_v17, %v783_v34  ;;  %v1247_v44 = vadd.f32 %v1215_v46, %v1147_v63  ;;  %v1049_v40 = vadd.f32 %v1017_v48, %v949_v33  ;;  %v983_v61 = vld [vmem:[%s3740_s21 + $0xf4] sm:$0xff] }
  0xc5   : > { %1467 = vadd.xlane.f32.xlu1 %v1412_v1  ;;  %v1117_v6 = vmul.f32 %v3775_v23, %v1081_v22  ;;  %v950_v29 = vadd.f32 %v918_v10, %v850_v8  ;;  %v919_v37 = vmul.f32 %v3769_v19, %v883_v20  ;;  %v652_v56 = vmul.f32 %v3759_v14, %v616_v5  ;;  %v1182_v22 = vld [vmem:[%s3740_s21 + $0xee] sm:$0xff]  ;;  %v984_v20 = vld [vmem:[%s3740_s21 + $0xfc] sm:$0xff] }
  0xc6   : > { %v851_v1 = vadd.f32 %v819_v2, %v751_v30  ;;  %v720_v34 = vmul.f32 %v3763_v15, %v684_v24  ;;  %v1414_v46 = vmul.f32 %v4398_v45, %v4398_v45  ;;  %v1118_v63 = vmul.f32 %v3775_v23, %v1082_v58 }
  0xc7   : > { %1340 = vadd.xlane.f32.xlu0 %v4381_v62  ;;  %v820_v33 = vmul.f32 %v3766_v17, %v784_v11  ;;  %v1248_v48 = vadd.f32 %v1216_v59, %v1148_v49  ;;  %v1050_v10 = vadd.f32 %v1018_v4, %v950_v29  ;;  %v920_v32 = vmul.f32 %v3769_v19, %v884_v18  ;;  %v1083_v49 = vld [vmem:[%s3740_s21 + $0xf5] sm:$0xff] }
  0xc8   : > { %v752_v55 = vadd.f32 %v720_v34, %v652_v56  ;;  %v4426_v14 = vadd.f32 %v4284_v43, %v1247_v44  ;;  %v1217_v15 = vmul.f32 %v3778_v25, %v1181_v41  ;;  %v1019_v8 = vmul.f32 %v3772_v21, %v983_v61  ;;  %v1183_v29 = vld [vmem:[%s3740_s21 + $0xf6] sm:$0xff] }
  0xc9   : > { %1342 = vadd.xlane.f32.xlu1 %v4398_v45  ;;  %v1149_v17 = vadd.f32 %v1117_v6, %v1049_v40  ;;  %v951_v5 = vadd.f32 %v919_v37, %v851_v1  ;;  %v1218_v59 = vmul.f32 %v3778_v25, %v1182_v22  ;;  %v3515_v4 = vmov 0   ;;  %v1184_v37 = vld [vmem:[%s3740_s21 + $0xfe] sm:$0xff] }
  0xca   : > { %v852_v24 = vadd.f32 %v820_v33, %v752_v55  ;;  %1943 = vmatprep.mubr.bf16.mxu0 %v3515_v4  ;;  %v4435_v19 = vadd.f32 %v4284_v43, %v1248_v48  ;;  %v1150_v58 = vadd.f32 %v1118_v63, %v1050_v10  ;;  %v1020_v2 = vmul.f32 %v3772_v21, %v984_v20 }
  0xcb   : > { %1469 = vadd.xlane.f32.xlu0 %v1413_v3  ;;  %v1084_v3 = vld [vmem:[%s3740_s21 + $0xfd] sm:$0xff]  ;;  %v1415_v11 = vmul.f32 %v4426_v14, %v4426_v14  ;;  %v1249_v44 = vadd.f32 %v1217_v15, %v1149_v17  ;;  %v1051_v40 = vadd.f32 %v1019_v8, %v951_v5  ;;  %v1119_v6 = vmul.f32 %v3775_v23, %v1083_v49 }
  0xcc   : > { %v952_v30 = vadd.f32 %v920_v32, %v852_v24  ;;  %v1416_v18 = vmul.f32 %v4435_v19, %v4435_v19  ;;  %v1250_v41 = vadd.f32 %v1218_v59, %v1150_v58  ;;  %v1120_v21 = vmul.f32 %v3775_v23, %v1084_v3 }
  0xcd   : > { %1471 = vadd.xlane.f32.xlu1 %v1414_v46  ;;  %v4450_v61 = vadd.f32 %v4284_v43, %v1249_v44  ;;  %v1151_v56 = vadd.f32 %v1119_v6, %v1051_v40  ;;  %v1219_v34 = vmul.f32 %v3778_v25, %v1183_v29  ;;  %v1220_v33 = vmul.f32 %v3778_v25, %v1184_v37 }
  0xce   : > { %v1052_v1 = vadd.f32 %v1020_v2, %v952_v30  ;;  %v4454_v46 = vadd.f32 %v4284_v43, %v1250_v41 }
  0xcf   : > { %1344 = vadd.xlane.f32.xlu0 %v4426_v14  ;;  %v1417_v23 = vmul.f32 %v4450_v61, %v4450_v61  ;;  %v1251_v48 = vadd.f32 %v1219_v34, %v1151_v56 }
  0xd0   : > { %v1152_v63 = vadd.f32 %v1120_v21, %v1052_v1  ;;  %v1418_v10 = vmul.f32 %v4454_v46, %v4454_v46 }
  0xd1   : > { %1346 = vadd.xlane.f32.xlu1 %v4435_v19  ;;  %v4464_v55 = vadd.f32 %v4284_v43, %v1251_v48 }
  0xd2   : > { %v1252_v22 = vadd.f32 %v1220_v33, %v1152_v63 }
  0xd3   : > { %1473 = vadd.xlane.f32.xlu0 %v1415_v11  ;;  %v1419_v25 = vmul.f32 %v4464_v55, %v4464_v55 }
  0xd4   : > { %v4467_v32 = vadd.f32 %v4284_v43, %v1252_v22 }
  0xd5   : > { %1475 = vadd.xlane.f32.xlu1 %v1416_v18 }
  0xd6   : > { %v1420_v15 = vmul.f32 %v4467_v32, %v4467_v32 }
  0xd7   : > { %1348 = vadd.xlane.f32.xlu0 %v4450_v61 }
  0xd9   : > { %1350 = vadd.xlane.f32.xlu1 %v4454_v46 }
  0xdb   : > { %1477 = vadd.xlane.f32.xlu0 %v1417_v23 }
  0xdd   : > { %1479 = vadd.xlane.f32.xlu1 %v1418_v10 }
  0xdf   : > { %1352 = vadd.xlane.f32.xlu0 %v4464_v55 }
  0xe1   : > { %1354 = vadd.xlane.f32.xlu1 %v4467_v32 }
  0xe3   : > { %1481 = vadd.xlane.f32.xlu0 %v1419_v25 }
  0xe5   : > { %1483 = vadd.xlane.f32.xlu1 %v1420_v15 }
  0xf0   : > { %v1293_v8 = vpop.xlane.xlu0 %1292 }
  0xf1   : > { %v1357_v20 = vmul.f32 0.0078125, %v1293_v8 }
  0xf2   : > { %v1422_v17 = vpop.xlane.xlu1 %1421 }
  0xf3   : > { %v1517_v5 = vmul.f32 %v1357_v20, %v1357_v20  ;;  %v1485_v24 = vmul.f32 0.0078125, %v1422_v17 }
  0xf4   : > { %v1295_v59 = vpop.xlane.xlu0 %1294 }
  0xf5   : > { %v1549_v43 = vsub.f32 %v1485_v24, %v1517_v5  ;;  %v1358_v49 = vmul.f32 0.0078125, %v1295_v59  ;;  %v1581_v59 = vsub.f32 %v3855_v0, %v1357_v20 }
  0xf6   : > { %v1424_v58 = vpop.xlane.xlu1 %1423 }
  0xf7   : > { %v1613_v30 = vadd.f32 1e-06, %v1549_v43  ;;  %v1518_v2 = vmul.f32 %v1358_v49, %v1358_v49  ;;  %v1486_v3 = vmul.f32 0.0078125, %v1424_v58  ;;  %v1582_v0 = vsub.f32 %v3866_v60, %v1358_v49 }
  0xf8   : > { %v1297_v11 = vpop.xlane.xlu0 %1296 }
  0xf9   : > { %3248 = vrsqrt.f32 %v1613_v30  ;;  %v1550_v44 = vsub.f32 %v1486_v3, %v1518_v2  ;;  %v4475_v40 = vmul.f32 0.0078125, %v1297_v11 }
  0xfa   : > { %v1299_v6 = vpop.xlane.xlu1 %1298 }
  0xfb   : > { %v1614_v29 = vadd.f32 1e-06, %v1550_v44  ;;  %v1519_v18 = vmul.f32 %v4475_v40, %v4475_v40  ;;  %v4479_v41 = vmul.f32 0.0078125, %v1299_v6 }
  0xfc   : > { %v1426_v1 = vpop.xlane.xlu0 %1425 }
  0xfd   : > { %3250 = vrsqrt.f32 %v1614_v29  ;;  %v1487_v21 = vmul.f32 0.0078125, %v1426_v1  ;;  %v1520_v56 = vmul.f32 %v4479_v41, %v4479_v41 }
  0xfe   : > { %v1428_v37 = vpop.xlane.xlu1 %1427 }
  0xff   : > { %v1551_v34 = vsub.f32 %v1487_v21, %v1519_v18  ;;  %v1488_v63 = vmul.f32 0.0078125, %v1428_v37  ;;  %v4497_v18 = vld [vmem:[%s5240_s3] ss:$0 sm:$0xff] }
 0x100   : > { %v1301_v33 = vpop.xlane.xlu0 %1300 }
 0x101   : > { %v1615_v23 = vadd.f32 1e-06, %v1551_v34  ;;  %v1552_v48 = vsub.f32 %v1488_v63, %v1520_v56  ;;  %v4483_v10 = vmul.f32 0.0078125, %v1301_v33 }
 0x102   : > { %v1303_v22 = vpop.xlane.xlu1 %1302 }
 0x103   : > { %3252 = vrsqrt.f32 %v1615_v23  ;;  %v1616_v25 = vadd.f32 1e-06, %v1552_v48  ;;  %v1521_v15 = vmul.f32 %v4483_v10, %v4483_v10  ;;  %v4487_v8 = vmul.f32 0.0078125, %v1303_v22  ;;  %v4508_v48 = vld [vmem:[%s5241_s4] ss:$0 sm:$0xff] }
 0x104   : > { %v1430_v17 = vpop.xlane.xlu0 %1429  ;;  %v1583_v22 = vsub.f32 %v3883_v38, %v4475_v40  ;;  %v1584_v38 = vsub.f32 %v3895_v47, %v4479_v41  ;;  %v1585_v41 = vsub.f32 %v3918_v16, %v4483_v10 }
 0x105   : > { %3254 = vrsqrt.f32 %v1616_v25  ;;  %v1489_v5 = vmul.f32 0.0078125, %v1430_v17  ;;  %v1522_v58 = vmul.f32 %v4487_v8, %v4487_v8  ;;  %v1586_v16 = vsub.f32 %v3936_v42, %v4487_v8 }
 0x106   : > { %v3249_v24 = vpop.eup %3248  ;;  %v1432_v43 = vpop.xlane.xlu1 %1431 }
 0x107   : > { %v1553_v30 = vsub.f32 %v1489_v5, %v1521_v15  ;;  %v1490_v2 = vmul.f32 0.0078125, %v1432_v43  ;;  %v1677_v11 = vmul.f32 %v3249_v24, %v1581_v59 }
 0x108   : > { %v1305_v3 = vpop.xlane.xlu0 %1304 }
 0x109   : > { %v1617_v44 = vadd.f32 1e-06, %v1553_v30  ;;  %v1554_v6 = vsub.f32 %v1490_v2, %v1522_v58  ;;  %v4492_v29 = vmul.f32 0.0078125, %v1305_v3  ;;  %v1716_v33 = vmul.f32 %v4497_v18, %v1677_v11 }
 0x10a   : > { %v3251_v1 = vpop.eup %3250  ;;  %v1307_v20 = vpop.xlane.xlu1 %1306 }
 0x10b   : > { %3256 = vrsqrt.f32 %v1617_v44  ;;  %v1618_v21 = vadd.f32 1e-06, %v1554_v6  ;;  %v1523_v37 = vmul.f32 %v4492_v29, %v4492_v29  ;;  %v4502_v56 = vmul.f32 0.0078125, %v1307_v20 }
 0x10c   : > { %v1434_v34 = vpop.xlane.xlu0 %1433  ;;  %v1678_v63 = vmul.f32 %v3251_v1, %v1582_v0  ;;  %v1755_v59 = vadd.f32 %v4508_v48, %v1716_v33  ;;  %v1587_v8 = vsub.f32 %v3969_v31, %v4492_v29 }
 0x10d   : > { %3258 = vrsqrt.f32 %v1618_v21  ;;  %v1491_v23 = vmul.f32 0.0078125, %v1434_v34  ;;  %v1524_v25 = vmul.f32 %v4502_v56, %v4502_v56  ;;  %v1588_v31 = vsub.f32 %v3980_v50, %v4502_v56 }
 0x10e   : > { %v1436_v60 = vpop.xlane.xlu1 %1435  ;;  %v1717_v49 = vmul.f32 %v4497_v18, %v1678_v63 }
 0x10f   : > { %v1555_v15 = vsub.f32 %v1491_v23, %v1523_v37  ;;  %v1492_v17 = vmul.f32 0.0078125, %v1436_v60 }
 0x110   : > { %v3253_v5 = vpop.eup %3252  ;;  %v1309_v24 = vpop.xlane.xlu0 %1308  ;;  %v1756_v43 = vadd.f32 %v4508_v48, %v1717_v49 }
 0x111   : > { %v1619_v58 = vadd.f32 1e-06, %v1555_v15  ;;  %v1556_v30 = vsub.f32 %v1492_v17, %v1524_v25  ;;  %v4517_v2 = vmul.f32 0.0078125, %v1309_v24  ;;  %v1679_v3 = vmul.f32 %v3253_v5, %v1583_v22 }
 0x112   : > { %v3255_v11 = vpop.eup %3254  ;;  %v1311_v40 = vpop.xlane.xlu1 %1310  ;;  %v1787_v44 = vpack.c.bf16 %v1756_v43, %v1755_v59 }
 0x113   : > { %3260 = vrsqrt.f32 %v1619_v58  ;;  %v1620_v6 = vadd.f32 1e-06, %v1556_v30  ;;  %v1525_v1 = vmul.f32 %v4517_v2, %v4517_v2  ;;  %v4523_v0 = vmul.f32 0.0078125, %v1311_v40 }
 0x114   : > { %1944 = vmatmul.mubr.bf16.vlgmr.msra.gmra.mxu0 %v1787_v44  ;;  %v1438_v20 = vpop.xlane.xlu0 %1437  ;;  %v1680_v21 = vmul.f32 %v3255_v11, %v1584_v38  ;;  %v1718_v37 = vmul.f32 %v4497_v18, %v1679_v3  ;;  %v1589_v56 = vsub.f32 %v4010_v35, %v4517_v2 }
 0x115   : > { %3262 = vrsqrt.f32 %v1620_v6  ;;  %v1493_v34 = vmul.f32 0.0078125, %v1438_v20  ;;  %1953 = vmatprep.mubr.bf16.mxu0 %v3515_v4  ;;  %v1526_v33 = vmul.f32 %v4523_v0, %v4523_v0  ;;  %v1590_v35 = vsub.f32 %v4021_v51, %v4523_v0 }
 0x116   : > { %v1440_v63 = vpop.xlane.xlu1 %1439  ;;  %v1719_v47 = vmul.f32 %v4497_v18, %v1680_v21  ;;  %v1757_v25 = vadd.f32 %v4508_v48, %v1718_v37 }
 0x117   : > { %v1557_v23 = vsub.f32 %v1493_v34, %v1525_v1  ;;  %v1494_v60 = vmul.f32 0.0078125, %v1440_v63 }
 0x118   : > { %v3257_v49 = vpop.eup %3256  ;;  %v1313_v22 = vpop.xlane.xlu0 %1312  ;;  %v1758_v15 = vadd.f32 %v4508_v48, %v1719_v47 }
 0x119   : > { %v1621_v17 = vadd.f32 1e-06, %v1557_v23  ;;  %v1558_v5 = vsub.f32 %v1494_v60, %v1526_v33  ;;  %v4534_v24 = vmul.f32 0.0078125, %v1313_v22  ;;  %v1681_v59 = vmul.f32 %v3257_v49, %v1585_v41 }
 0x11a   : > { %v3259_v43 = vpop.eup %3258  ;;  %v1315_v10 = vpop.xlane.xlu1 %1314  ;;  %v1788_v58 = vpack.c.bf16 %v1758_v15, %v1757_v25 }
 0x11b   : > { %3264 = vrsqrt.f32 %v1621_v17  ;;  %v1622_v30 = vadd.f32 1e-06, %v1558_v5  ;;  %v1527_v3 = vmul.f32 %v4534_v24, %v4534_v24  ;;  %v4540_v11 = vmul.f32 0.0078125, %v1315_v10 }
 0x11c   : > { %1954 = vmatmul.mubr.bf16.gmra.mxu0 %v1788_v58  ;;  %v1442_v38 = vpop.xlane.xlu0 %1441  ;;  %v1682_v40 = vmul.f32 %v3259_v43, %v1586_v16  ;;  %v1720_v44 = vmul.f32 %v4497_v18, %v1681_v59  ;;  %v1591_v0 = vsub.f32 %v4048_v27, %v4534_v24 }
 0x11d   : > { %3266 = vrsqrt.f32 %v1622_v30  ;;  %v1495_v6 = vmul.f32 0.0078125, %v1442_v38  ;;  %1963 = vmatprep.mubr.bf16.mxu0 %v3515_v4  ;;  %v1528_v20 = vmul.f32 %v4540_v11, %v4540_v11  ;;  %v1592_v27 = vsub.f32 %v4064_v53, %v4540_v11 }
 0x11e   : > { %v1444_v1 = vpop.xlane.xlu1 %1443  ;;  %v1721_v42 = vmul.f32 %v4497_v18, %v1682_v40  ;;  %v1759_v47 = vadd.f32 %v4508_v48, %v1720_v44 }
 0x11f   : > { %v1559_v21 = vsub.f32 %v1495_v6, %v1527_v3  ;;  %v1496_v37 = vmul.f32 0.0078125, %v1444_v1 }
 0x120   : > { %v3261_v34 = vpop.eup %3260  ;;  %v1317_v63 = vpop.xlane.xlu0 %1316  ;;  %v1760_v41 = vadd.f32 %v4508_v48, %v1721_v42 }
 0x121   : > { %v1623_v33 = vadd.f32 1e-06, %v1559_v21  ;;  %v1560_v23 = vsub.f32 %v1496_v37, %v1528_v20  ;;  %v4551_v60 = vmul.f32 0.0078125, %v1317_v63  ;;  %v1683_v49 = vmul.f32 %v3261_v34, %v1587_v8 }
 0x122   : > { %v3263_v22 = vpop.eup %3262  ;;  %v1319_v29 = vpop.xlane.xlu1 %1318  ;;  %v1789_v25 = vpack.c.bf16 %v1760_v41, %v1759_v47 }
 0x123   : > { %3268 = vrsqrt.f32 %v1623_v33  ;;  %v1624_v15 = vadd.f32 1e-06, %v1560_v23  ;;  %v1529_v17 = vmul.f32 %v4551_v60, %v4551_v60  ;;  %v4557_v5 = vmul.f32 0.0078125, %v1319_v29 }
 0x124   : > { %1964 = vmatmul.mubr.bf16.gmra.mxu0 %v1789_v25  ;;  %v1446_v59 = vpop.xlane.xlu0 %1445  ;;  %v1684_v43 = vmul.f32 %v3263_v22, %v1588_v31  ;;  %v1722_v16 = vmul.f32 %v4497_v18, %v1683_v49  ;;  %v1593_v11 = vsub.f32 %v4088_v12, %v4551_v60 }
 0x125   : > { %3270 = vrsqrt.f32 %v1624_v15  ;;  %v1497_v10 = vmul.f32 0.0078125, %v1446_v59  ;;  %1973 = vmatprep.mubr.bf16.mxu0 %v3515_v4  ;;  %v1530_v30 = vmul.f32 %v4557_v5, %v4557_v5  ;;  %v1594_v12 = vsub.f32 %v4099_v52, %v4557_v5 }
 0x126   : > { %v1448_v58 = vpop.xlane.xlu1 %1447  ;;  %v1723_v50 = vmul.f32 %v4497_v18, %v1684_v43  ;;  %v1761_v6 = vadd.f32 %v4508_v48, %v1722_v16 }
 0x127   : > { %v1561_v3 = vsub.f32 %v1497_v10, %v1529_v17  ;;  %v1498_v38 = vmul.f32 0.0078125, %v1448_v58 }
 0x128   : > { %v3265_v40 = vpop.eup %3264  ;;  %v1321_v44 = vpop.xlane.xlu0 %1320  ;;  %v1762_v1 = vadd.f32 %v4508_v48, %v1723_v50 }
 0x129   : > { %v1625_v42 = vadd.f32 1e-06, %v1561_v3  ;;  %v1562_v8 = vsub.f32 %v1498_v38, %v1530_v30  ;;  %v4568_v20 = vmul.f32 0.0078125, %v1321_v44  ;;  %v1685_v21 = vmul.f32 %v3265_v40, %v1589_v56 }
 0x12a   : > { %v3267_v37 = vpop.eup %3266  ;;  %v1323_v2 = vpop.xlane.xlu1 %1322  ;;  %v1790_v34 = vpack.c.bf16 %v1762_v1, %v1761_v6 }
 0x12b   : > { %3272 = vrsqrt.f32 %v1625_v42  ;;  %v1626_v63 = vadd.f32 1e-06, %v1562_v8  ;;  %v1531_v47 = vmul.f32 %v4568_v20, %v4568_v20  ;;  %v4574_v41 = vmul.f32 0.0078125, %v1323_v2 }
 0x12c   : > { %1974 = vmatmul.mubr.bf16.gmra.mxu0 %v1790_v34  ;;  %v1450_v33 = vpop.xlane.xlu0 %1449  ;;  %v1686_v23 = vmul.f32 %v3267_v37, %v1590_v35  ;;  %v1724_v49 = vmul.f32 %v4497_v18, %v1685_v21  ;;  %v1595_v5 = vsub.f32 %v4135_v54, %v4568_v20 }
 0x12d   : > { %3274 = vrsqrt.f32 %v1626_v63  ;;  %v1499_v22 = vmul.f32 0.0078125, %v1450_v33  ;;  %1983 = vmatprep.mubr.bf16.mxu0 %v3515_v4  ;;  %v1532_v29 = vmul.f32 %v4574_v41, %v4574_v41  ;;  %v1596_v54 = vsub.f32 %v4145_v7, %v4574_v41 }
 0x12e   : > { %v1452_v31 = vpop.xlane.xlu1 %1451  ;;  %v1725_v51 = vmul.f32 %v4497_v18, %v1686_v23  ;;  %v1763_v43 = vadd.f32 %v4508_v48, %v1724_v49 }
 0x12f   : > { %v1563_v25 = vsub.f32 %v1499_v22, %v1531_v47  ;;  %v1500_v15 = vmul.f32 0.0078125, %v1452_v31 }
 0x130   : > { %v3269_v17 = vpop.eup %3268  ;;  %v1325_v59 = vpop.xlane.xlu0 %1324  ;;  %v1764_v16 = vadd.f32 %v4508_v48, %v1725_v51 }
 0x131   : > { %v1627_v10 = vadd.f32 1e-06, %v1563_v25  ;;  %v1564_v58 = vsub.f32 %v1500_v15, %v1532_v29  ;;  %v4585_v50 = vmul.f32 0.0078125, %v1325_v59  ;;  %v1687_v56 = vmul.f32 %v3269_v17, %v1591_v0 }
 0x132   : > { %v3271_v30 = vpop.eup %3270  ;;  %v1327_v24 = vpop.xlane.xlu1 %1326  ;;  %v1791_v3 = vpack.c.bf16 %v1764_v16, %v1763_v43 }
 0x133   : > { %3276 = vrsqrt.f32 %v1627_v10  ;;  %v1628_v38 = vadd.f32 1e-06, %v1564_v58  ;;  %v1533_v40 = vmul.f32 %v4585_v50, %v4585_v50  ;;  %v4591_v44 = vmul.f32 0.0078125, %v1327_v24 }
 0x134   : > { %1984 = vmatmul.mubr.bf16.gmra.mxu0 %v1791_v3  ;;  %v1454_v6 = vpop.xlane.xlu0 %1453  ;;  %v1688_v1 = vmul.f32 %v3271_v30, %v1592_v27  ;;  %v1726_v42 = vmul.f32 %v4497_v18, %v1687_v56  ;;  %v1597_v41 = vsub.f32 %v4188_v9, %v4585_v50 }
 0x135   : > { %3278 = vrsqrt.f32 %v1628_v38  ;;  %v1501_v8 = vmul.f32 0.0078125, %v1454_v6  ;;  %1993 = vmatprep.mubr.bf16.mxu0 %v3515_v4  ;;  %v1534_v37 = vmul.f32 %v4591_v44, %v4591_v44  ;;  %v1598_v9 = vsub.f32 %v4201_v26, %v4591_v44  ;;  %v5256_v44 = vld [vmem:[#allocation9_spill] sm:$0xff] }
 0x136   : > { %v1456_v21 = vpop.xlane.xlu1 %1455  ;;  %v1727_v53 = vmul.f32 %v4497_v18, %v1688_v1  ;;  %v1765_v47 = vadd.f32 %v4508_v48, %v1726_v42 }
 0x137   : > { %v1565_v35 = vsub.f32 %v1501_v8, %v1533_v40  ;;  %v1502_v2 = vmul.f32 0.0078125, %v1456_v21 }
 0x138   : > { %v3273_v34 = vpop.eup %3272  ;;  %v1329_v63 = vpop.xlane.xlu0 %1328  ;;  %v1766_v33 = vadd.f32 %v4508_v48, %v1727_v53 }
 0x139   : > { %v1629_v23 = vadd.f32 1e-06, %v1565_v35  ;;  %v1566_v49 = vsub.f32 %v1502_v2, %v1534_v37  ;;  %v4602_v22 = vmul.f32 0.0078125, %v1329_v63  ;;  %v1689_v31 = vmul.f32 %v3273_v34, %v1593_v11 }
 0x13a   : > { %v3275_v51 = vpop.eup %3274  ;;  %v1331_v60 = vpop.xlane.xlu1 %1330  ;;  %v1792_v0 = vpack.c.bf16 %v1766_v33, %v1765_v47 }
 0x13b   : > { %3280 = vrsqrt.f32 %v1629_v23  ;;  %v1630_v29 = vadd.f32 1e-06, %v1566_v49  ;;  %v1535_v25 = vmul.f32 %v4602_v22, %v4602_v22  ;;  %v4608_v15 = vmul.f32 0.0078125, %v1331_v60 }
 0x13c   : > { %1994 = vmatmul.mubr.bf16.gmra.mxu0 %v1792_v0  ;;  %v1458_v17 = vpop.xlane.xlu0 %1457  ;;  %v1690_v59 = vmul.f32 %v3275_v51, %v1594_v12  ;;  %v1728_v43 = vmul.f32 %v4497_v18, %v1689_v31 }
 0x13d   : > { %3282 = vrsqrt.f32 %v1630_v29  ;;  %v1503_v16 = vmul.f32 0.0078125, %v1458_v17  ;;  %2003 = vmatprep.mubr.bf16.mxu0 %v3515_v4  ;;  %v1536_v58 = vmul.f32 %v4608_v15, %v4608_v15 }
 0x13e   : > { %v1460_v10 = vpop.xlane.xlu1 %1459  ;;  %v1729_v52 = vmul.f32 %v4497_v18, %v1690_v59  ;;  %v1767_v3 = vadd.f32 %v4508_v48, %v1728_v43 }
 0x13f   : > { %v1567_v56 = vsub.f32 %v1503_v16, %v1535_v25  ;;  %v1504_v30 = vmul.f32 0.0078125, %v1460_v10 }
 0x140   : > { %v3277_v27 = vpop.eup %3276  ;;  %v1333_v24 = vpop.xlane.xlu0 %1332  ;;  %v1768_v38 = vadd.f32 %v4508_v48, %v1729_v52 }
 0x141   : > { %v1631_v40 = vadd.f32 1e-06, %v1567_v56  ;;  %v1568_v6 = vsub.f32 %v1504_v30, %v1536_v58  ;;  %v4619_v1 = vmul.f32 0.0078125, %v1333_v24  ;;  %v1691_v42 = vmul.f32 %v3277_v27, %v1595_v5 }
 0x142   : > { %v3279_v8 = vpop.eup %3278  ;;  %v1335_v20 = vpop.xlane.xlu1 %1334  ;;  %v1793_v21 = vpack.c.bf16 %v1768_v38, %v1767_v3  ;;  %v1599_v24 = vsub.f32 %v5256_v44, %v4602_v22  ;;  %v1600_v22 = vsub.f32 %v4252_v57, %v4608_v15 }
 0x143   : > { %3284 = vrsqrt.f32 %v1631_v40  ;;  %v1632_v53 = vadd.f32 1e-06, %v1568_v6  ;;  %v1537_v11 = vmul.f32 %v4619_v1, %v4619_v1  ;;  %v4625_v37 = vmul.f32 0.0078125, %v1335_v20 }
 0x144   : > { %2004 = vmatmul.mubr.bf16.gmra.mxu0 %v1793_v21  ;;  %v1462_v35 = vpop.xlane.xlu0 %1461  ;;  %v1692_v2 = vmul.f32 %v3279_v8, %v1596_v54  ;;  %v1730_v34 = vmul.f32 %v4497_v18, %v1691_v42 }
 0x145   : > { %3286 = vrsqrt.f32 %v1632_v53  ;;  %v1505_v63 = vmul.f32 0.0078125, %v1462_v35  ;;  %2013 = vmatprep.mubr.bf16.mxu0 %v3515_v4  ;;  %v1538_v33 = vmul.f32 %v4625_v37, %v4625_v37 }
 0x146   : > { %v1464_v47 = vpop.xlane.xlu1 %1463  ;;  %v1731_v7 = vmul.f32 %v4497_v18, %v1692_v2  ;;  %v1769_v12 = vadd.f32 %v4508_v48, %v1730_v34 }
 0x147   : > { %v1569_v23 = vsub.f32 %v1505_v63, %v1537_v11  ;;  %v1506_v49 = vmul.f32 0.0078125, %v1464_v47  ;;  %v3232_v63 = vld [vmem:[%s5244_s7 + $0x78] sm:$0xff]  }
 0x148   : > { %v3281_v31 = vpop.eup %3280  ;;  %v1337_v51 = vpop.xlane.xlu0 %1336  ;;  %v1770_v60 = vadd.f32 %v4508_v48, %v1731_v7  ;;  %3055 = vmatprep.subr.bf16.mxu1 %v3232_v63 }
 0x149   : > { %v1633_v0 = vadd.f32 1e-06, %v1569_v23  ;;  %v1570_v29 = vsub.f32 %v1506_v49, %v1538_v33  ;;  %v4636_v25 = vmul.f32 0.0078125, %v1337_v51  ;;  %v1693_v17 = vmul.f32 %v3281_v31, %v1597_v41  ;;  %v3233_v41 = vld [vmem:[%s5244_s7 + $0x38] sm:$0xff]  }
 0x14a   : > { %v3283_v59 = vpop.eup %3282  ;;  %v1339_v50 = vpop.xlane.xlu1 %1338  ;;  %v1794_v43 = vpack.c.bf16 %v1770_v60, %v1769_v12  ;;  %3056 = vmatpush3.bf16.msra.mxu1 %v3233_v41  ;;  %v3234_v12 = vld [vmem:[%s5244_s7 + $0x70] sm:$0xff]   ;;  %v1601_v60 = vsub.f32 %v4287_v36, %v4619_v1 }
 0x14b   : > { %3288 = vrsqrt.f32 %v1633_v0  ;;  %v1634_v16 = vadd.f32 1e-06, %v1570_v29  ;;  %v1539_v10 = vmul.f32 %v4636_v25, %v4636_v25  ;;  %v4642_v52 = vmul.f32 0.0078125, %v1339_v50  ;;  %3057 = vmatprep.subr.bf16.mxu1 %v3234_v12 }
 0x14c   : > { %2014 = vmatmul.mubr.bf16.gmra.mxu0 %v1794_v43  ;;  %v1466_v5 = vpop.xlane.xlu0 %1465  ;;  %v1694_v58 = vmul.f32 %v3283_v59, %v1598_v9  ;;  %v1732_v56 = vmul.f32 %v4497_v18, %v1693_v17  ;;  %v3235_v59 = vld [vmem:[%s5244_s7 + $0x30] sm:$0xff]  }
 0x14d   : > { %3290 = vrsqrt.f32 %v1634_v16  ;;  %v1507_v30 = vmul.f32 0.0078125, %v1466_v5  ;;  %2023 = vmatprep.mubr.bf16.mxu0 %v3515_v4  ;;  %v1540_v3 = vmul.f32 %v4642_v52, %v4642_v52 }
 0x14e   : > { %v1468_v27 = vpop.xlane.xlu1 %1467  ;;  %v1733_v26 = vmul.f32 %v4497_v18, %v1694_v58  ;;  %v1771_v8 = vadd.f32 %v4508_v48, %v1732_v56  ;;  %3058 = vmatpush3.bf16.msra.mxu1 %v3235_v59  ;;  %v1602_v56 = vsub.f32 %v4313_v39, %v4625_v37 }
 0x14f   : > { %v1571_v38 = vsub.f32 %v1507_v30, %v1539_v10  ;;  %v1508_v40 = vmul.f32 0.0078125, %v1468_v27 }
 0x150   : > { %v3285_v6 = vpop.eup %3284  ;;  %v1341_v42 = vpop.xlane.xlu0 %1340  ;;  %v1772_v54 = vadd.f32 %v4508_v48, %v1733_v26  ;;  %v3236_v26 = vld [vmem:[%s5244_s7 + $0x68] sm:$0xff]  }
 0x151   : > { %v1635_v20 = vadd.f32 1e-06, %v1571_v38  ;;  %v1572_v21 = vsub.f32 %v1508_v40, %v1540_v3  ;;  %v4653_v53 = vmul.f32 0.0078125, %v1341_v42  ;;  %v1695_v11 = vmul.f32 %v3285_v6, %v1599_v24  ;;  %v3237_v3 = vld [vmem:[%s5244_s7 + $0x28] sm:$0xff]   ;;  %3059 = vmatprep.subr.bf16.mxu1 %v3236_v26 }
 0x152   : > { %v3287_v35 = vpop.eup %3286  ;;  %v1343_v2 = vpop.xlane.xlu1 %1342  ;;  %v1795_v34 = vpack.c.bf16 %v1772_v54, %v1771_v8  ;;  %3060 = vmatpush3.bf16.msra.mxu1 %v3237_v3  ;;  %v3238_v54 = vld [vmem:[%s5244_s7 + $0x60] sm:$0xff]  }
 0x153   : > { %3292 = vrsqrt.f32 %v1635_v20  ;;  %v1636_v47 = vadd.f32 1e-06, %v1572_v21  ;;  %v1541_v7 = vmul.f32 %v4653_v53, %v4653_v53  ;;  %v4665_v33 = vmul.f32 0.0078125, %v1343_v2  ;;  %3061 = vmatprep.subr.bf16.mxu1 %v3238_v54 }
 0x154   : > { %2024 = vmatmul.mubr.bf16.gmra.mxu0 %v1795_v34  ;;  %v1470_v23 = vpop.xlane.xlu0 %1469  ;;  %v1696_v57 = vmul.f32 %v3287_v35, %v1600_v22  ;;  %v1734_v15 = vmul.f32 %v4497_v18, %v1695_v11  ;;  %v1603_v20 = vsub.f32 %v4350_v28, %v4636_v25  ;;  %v3239_v22 = vld [vmem:[%s5244_s7 + $0x20] sm:$0xff]  }
 0x155   : > { %3294 = vrsqrt.f32 %v1636_v47  ;;  %v1509_v49 = vmul.f32 0.0078125, %v1470_v23  ;;  %2033 = vmatprep.mubr.bf16.mxu0 %v3515_v4  ;;  %v1542_v0 = vmul.f32 %v4665_v33, %v4665_v33  ;;  %v1606_v3 = vsub.f32 %v4398_v45, %v4665_v33  ;;  %v3245_v45 = vld [vmem:[%s5244_s7 + $0x8] sm:$0xff]  }
 0x156   : > { %v1472_v31 = vpop.xlane.xlu1 %1471  ;;  %v1735_v51 = vmul.f32 %v4497_v18, %v1696_v57  ;;  %v1773_v43 = vadd.f32 %v4508_v48, %v1734_v15  ;;  %3062 = vmatpush3.bf16.msra.mxu1 %v3239_v22  ;;  %v1604_v57 = vsub.f32 %v4353_v13, %v4642_v52 }
 0x157   : > { %v1573_v29 = vsub.f32 %v1509_v49, %v1541_v7  ;;  %v1510_v17 = vmul.f32 0.0078125, %v1472_v31  ;;  %v3240_v31 = vld [vmem:[%s5244_s7 + $0x58] sm:$0xff]  }
 0x158   : > { %v3289_v9 = vpop.eup %3288  ;;  %v1345_v50 = vpop.xlane.xlu0 %1344  ;;  %v1774_v16 = vadd.f32 %v4508_v48, %v1735_v51  ;;  %3063 = vmatprep.subr.bf16.mxu1 %v3240_v31 }
 0x159   : > { %v1637_v10 = vadd.f32 1e-06, %v1573_v29  ;;  %v1574_v5 = vsub.f32 %v1510_v17, %v1542_v0  ;;  %v4682_v58 = vmul.f32 0.0078125, %v1345_v50  ;;  %v1697_v36 = vmul.f32 %v3289_v9, %v1601_v60  ;;  %v3241_v60 = vld [vmem:[%s5244_s7 + $0x18] sm:$0xff]  }
 0x15a   : > { %v3291_v1 = vpop.eup %3290  ;;  %v1347_v30 = vpop.xlane.xlu1 %1346  ;;  %v1796_v27 = vpack.c.bf16 %v1774_v16, %v1773_v43  ;;  %3064 = vmatpush3.bf16.msra.mxu1 %v3241_v60  ;;  %v1605_v50 = vsub.f32 %v4381_v62, %v4653_v53 }
 0x15b   : > { %3296 = vrsqrt.f32 %v1637_v10  ;;  %v1638_v44 = vadd.f32 1e-06, %v1574_v5  ;;  %v1543_v24 = vmul.f32 %v4682_v58, %v4682_v58  ;;  %v4694_v38 = vmul.f32 0.0078125, %v1347_v30  ;;  %v3242_v5 = vld [vmem:[%s5244_s7 + $0x50] sm:$0xff]  }
 0x15c   : > { %2034 = vmatmul.mubr.bf16.gmra.mxu0 %v1796_v27  ;;  %v1474_v40 = vpop.xlane.xlu0 %1473  ;;  %v1698_v39 = vmul.f32 %v3291_v1, %v1602_v56  ;;  %v1736_v37 = vmul.f32 %v4497_v18, %v1697_v36  ;;  %v3243_v27 = vld [vmem:[%s5244_s7 + $0x10] sm:$0xff]   ;;  %3065 = vmatprep.subr.bf16.mxu1 %v3242_v5  ;;  %v1607_v22 = vsub.f32 %v4426_v14, %v4682_v58 }
 0x15d   : > { %3298 = vrsqrt.f32 %v1638_v44  ;;  %v1511_v6 = vmul.f32 0.0078125, %v1474_v40  ;;  %2043 = vmatprep.mubr.bf16.mxu0 %v3515_v4  ;;  %v1544_v21 = vmul.f32 %v4694_v38, %v4694_v38 }
 0x15e   : > { %v1476_v42 = vpop.xlane.xlu1 %1475  ;;  %v1737_v8 = vmul.f32 %v4497_v18, %v1698_v39  ;;  %v1775_v63 = vadd.f32 %v4508_v48, %v1736_v37  ;;  %3066 = vmatpush3.bf16.msra.mxu1 %v3243_v27 }
 0x15f   : > { %v1575_v11 = vsub.f32 %v1511_v6, %v1543_v24  ;;  %v1512_v35 = vmul.f32 0.0078125, %v1476_v42  ;;  %v3244_v42 = vld [vmem:[%s5244_s7 + $0x48] sm:$0xff]  }
 0x160   : > { %v3293_v2 = vpop.eup %3292  ;;  %v1349_v34 = vpop.xlane.xlu0 %1348  ;;  %v1776_v47 = vadd.f32 %v4508_v48, %v1737_v8  ;;  %3067 = vmatprep.subr.bf16.mxu1 %v3244_v42 }
 0x161   : > { %v1639_v7 = vadd.f32 1e-06, %v1575_v11  ;;  %v1576_v41 = vsub.f32 %v1512_v35, %v1544_v21  ;;  %v4711_v23 = vmul.f32 0.0078125, %v1349_v34  ;;  %v1699_v28 = vmul.f32 %v3293_v2, %v1603_v20 }
 0x162   : > { %v3295_v25 = vpop.eup %3294  ;;  %v1351_v15 = vpop.xlane.xlu1 %1350  ;;  %v1797_v49 = vpack.c.bf16 %v1776_v47, %v1775_v63  ;;  %3068 = vmatpush3.bf16.msra.mxu1 %v3245_v45  ;;  %v3246_v47 = vld [vmem:[%s5244_s7 + $0x40] sm:$0xff]  }
 0x163   : > { %3300 = vrsqrt.f32 %v1639_v7  ;;  %v1640_v51 = vadd.f32 1e-06, %v1576_v41  ;;  %v1545_v12 = vmul.f32 %v4711_v23, %v4711_v23  ;;  %v4723_v0 = vmul.f32 0.0078125, %v1351_v15  ;;  %3069 = vmatprep.subr.bf16.mxu1 %v3246_v47 }
 0x164   : > { %2044 = vmatmul.mubr.bf16.gmra.mxu0 %v1797_v49  ;;  %v1478_v29 = vpop.xlane.xlu0 %1477  ;;  %v1700_v13 = vmul.f32 %v3295_v25, %v1604_v57  ;;  %v1738_v52 = vmul.f32 %v4497_v18, %v1699_v28  ;;  %v3247_v25 = vld [vmem:[%s5244_s7] sm:$0xff]   ;;  %v1608_v57 = vsub.f32 %v4435_v19, %v4694_v38  ;;  %v1609_v19 = vsub.f32 %v4450_v61, %v4711_v23 }
 0x165   : > { %3302 = vrsqrt.f32 %v1640_v51  ;;  %v1513_v17 = vmul.f32 0.0078125, %v1478_v29  ;;  %2053 = vmatprep.mubr.bf16.mxu0 %v3515_v4  ;;  %v1546_v43 = vmul.f32 %v4723_v0, %v4723_v0 }
 0x166   : > { %v1480_v59 = vpop.xlane.xlu1 %1479  ;;  %v1739_v9 = vmul.f32 %v4497_v18, %v1700_v13  ;;  %v1777_v56 = vadd.f32 %v4508_v48, %v1738_v52  ;;  %3070 = vmatpush3.bf16.msra.mxu1 %v3247_v25 }
 0x167   : > { %v1577_v16 = vsub.f32 %v1513_v17, %v1545_v12  ;;  %v1514_v10 = vmul.f32 0.0078125, %v1480_v59  ;;  %v1610_v17 = vsub.f32 %v4454_v46, %v4723_v0 }
 0x168   : > { %v3297_v36 = vpop.eup %3296  ;;  %v1353_v1 = vpop.xlane.xlu0 %1352  ;;  %v1778_v30 = vadd.f32 %v4508_v48, %v1739_v9 }
 0x169   : > { %v1641_v62 = vadd.f32 1e-06, %v1577_v16  ;;  %v1578_v53 = vsub.f32 %v1514_v10, %v1546_v43  ;;  %v4740_v26 = vmul.f32 0.0078125, %v1353_v1  ;;  %v1701_v44 = vmul.f32 %v3297_v36, %v1605_v50 }
 0x16a   : > { %v3299_v24 = vpop.eup %3298  ;;  %v1355_v40 = vpop.xlane.xlu1 %1354  ;;  %v1798_v39 = vpack.c.bf16 %v1778_v30, %v1777_v56 }
 0x16b   : > { %3304 = vrsqrt.f32 %v1641_v62  ;;  %v1642_v37 = vadd.f32 1e-06, %v1578_v53  ;;  %v1547_v6 = vmul.f32 %v4740_v26, %v4740_v26  ;;  %v1388_v8 = vmul.f32 0.0078125, %v1355_v40 }
 0x16c   : > { %2054 = vmatmul.mubr.bf16.gmra.mxu0 %v1798_v39  ;;  %v1482_v54 = vpop.xlane.xlu0 %1481  ;;  %v1702_v20 = vmul.f32 %v3299_v24, %v1606_v3  ;;  %v1740_v21 = vmul.f32 %v4497_v18, %v1701_v44  ;;  %v1611_v61 = vsub.f32 %v4464_v55, %v4740_v26  ;;  %v5257_v44 = vld [vmem:[#allocation8_spill] sm:$0xff] }
 0x16d   : > { %3306 = vrsqrt.f32 %v1642_v37  ;;  %v1515_v33 = vmul.f32 0.0078125, %v1482_v54  ;;  %2063 = vmatprep.mubr.bf16.mxu0 %v3515_v4  ;;  %v1548_v2 = vmul.f32 %v1388_v8, %v1388_v8  ;;  %v1612_v46 = vsub.f32 %v4467_v32, %v1388_v8  ;;  %v1819_v32 = vld [vmem:[%s5243_s6] sm:$0x3] }
 0x16e   : > { %v1484_v11 = vpop.xlane.xlu1 %1483  ;;  %v1741_v35 = vmul.f32 %v4497_v18, %v1702_v20  ;;  %v1779_v41 = vadd.f32 %v4508_v48, %v1740_v21  ;;  %v5258_v24 = vsub.s32 0, %v5257_v44  ;;  %v5259_v40 = vsub.s32 1, %v5257_v44 }
 0x16f   : > { %v1579_v34 = vsub.f32 %v1515_v33, %v1547_v6  ;;  %v1516_v63 = vmul.f32 0.0078125, %v1484_v11 }
 0x170   : > { %v3301_v7 = vpop.eup %3300  ;;  %v1780_v28 = vadd.f32 %v4508_v48, %v1741_v35  ;;  %v4794_v3 = vrot.slane %v1819_v32, %v5258_v24  ;;  %v4798_v39 = vrot.slane %v1819_v32, %v5259_v40 }
 0x171   : > { %v1643_v14 = vadd.f32 1e-06, %v1579_v34  ;;  %v1580_v58 = vsub.f32 %v1516_v63, %v1548_v2  ;;  %v1703_v15 = vmul.f32 %v3301_v7, %v1607_v22 }
 0x172   : > { %v3303_v49 = vpop.eup %3302  ;;  %v1799_v31 = vpack.c.bf16 %v1780_v28, %v1779_v41 }
 0x173   : > { %3308 = vrsqrt.f32 %v1643_v14  ;;  %v1644_v51 = vadd.f32 1e-06, %v1580_v58  ;;  %v1704_v12 = vmul.f32 %v3303_v49, %v1608_v57  ;;  %v1742_v60 = vmul.f32 %v4497_v18, %v1703_v15 }
 0x174   : > { %2064 = vmatmul.mubr.bf16.gmra.mxu0 %v1799_v31 }
 0x175   : > { %3310 = vrsqrt.f32 %v1644_v51  ;;  %2073 = vmatprep.mubr.bf16.mxu0 %v3515_v4  ;;  %v1743_v29 = vmul.f32 %v4497_v18, %v1704_v12  ;;  %v1781_v38 = vadd.f32 %v4508_v48, %v1742_v60 }
 0x177   : > { %v1782_v13 = vadd.f32 %v4508_v48, %v1743_v29 }
 0x178   : > { %v3305_v52 = vpop.eup %3304 }
 0x179   : > { %v1800_v59 = vpack.c.bf16 %v1782_v13, %v1781_v38  ;;  %v1705_v9 = vmul.f32 %v3305_v52, %v1609_v19 }
 0x17a   : > { %v3307_v50 = vpop.eup %3306 }
 0x17b   : > { %v1706_v43 = vmul.f32 %v3307_v50, %v1610_v17  ;;  %v1744_v16 = vmul.f32 %v4497_v18, %v1705_v9 }
 0x17c   : > { %2074 = vmatmul.mubr.bf16.gmra.mxu0 %v1800_v59 }
 0x17d   : > { %2083 = vmatprep.mubr.bf16.mxu0 %v3515_v4  ;;  %v1745_v10 = vmul.f32 %v4497_v18, %v1706_v43  ;;  %v1783_v23 = vadd.f32 %v4508_v48, %v1744_v16 }
 0x17f   : > { %v1784_v5 = vadd.f32 %v4508_v48, %v1745_v10 }
 0x180   : > { %v3309_v36 = vpop.eup %3308 }
 0x181   : > { %v1801_v0 = vpack.c.bf16 %v1784_v5, %v1783_v23  ;;  %v1707_v1 = vmul.f32 %v3309_v36, %v1611_v61 }
 0x182   : > { %v3311_v56 = vpop.eup %3310 }
 0x183   : > { %v1708_v30 = vmul.f32 %v3311_v56, %v1612_v46  ;;  %v1746_v27 = vmul.f32 %v4497_v18, %v1707_v1 }
 0x184   : > { %2084 = vmatmul.mubr.bf16.gmra.mxu0 %v1801_v0 }
 0x185   : > { %2093 = vmatprep.mubr.bf16.mxu0 %v3515_v4  ;;  %v1747_v62 = vmul.f32 %v4497_v18, %v1708_v30  ;;  %v1785_v55 = vadd.f32 %v4508_v48, %v1746_v27 }
 0x187   : > { %v1786_v53 = vadd.f32 %v4508_v48, %v1747_v62 }
 0x189   : > { %v1802_v26 = vpack.c.bf16 %v1786_v53, %v1785_v55 }
 0x18c   : > { %2094 = vmatmul.mubr.bf16.gmra.mxu0 %v1802_v26 }
 0x1d4   : > { %v1945_v4 = vpop.f32.mrf.mxu0 }
 0x1d5   : > { %v1946_v18 = vadd.f32 %v1945_v4, %v4794_v3 }
 0x1d6   : > { %v1947_v37 = vpop.f32.mrf.mxu0 }
 0x1d7   : > { %v2168_v6 = vmul.f32 0.70710677, %v1946_v18  ;;  %v1948_v48 = vadd.f32 %v1947_v37, %v4798_v39  ;;  %v2104_v1 = vmul.f32 0.5, %v1946_v18 }
 0x1d8   : > { %v1949_v42 = vpop.f32.mrf.mxu0 }
 0x1d9   : > { %v2169_v8 = vmul.f32 0.70710677, %v1948_v48  ;;  %v1950_v54 = vadd.f32 %v1949_v42, %v4794_v3  ;;  %3312 = verf.f32 %v2168_v6  ;;  %v2105_v23 = vmul.f32 0.5, %v1948_v48 }
 0x1da   : > { %v1951_v20 = vpop.f32.mrf.mxu0 }
 0x1db   : > { %v2170_v21 = vmul.f32 0.70710677, %v1950_v54  ;;  %v1952_v45 = vadd.f32 %v1951_v20, %v4798_v39  ;;  %3314 = verf.f32 %v2169_v8  ;;  %v2106_v10 = vmul.f32 0.5, %v1950_v54 }
 0x1dc   : > { %v1955_v33 = vpop.f32.mrf.mxu0 }
 0x1dd   : > { %3316 = verf.f32 %v2170_v21  ;;  %v2171_v11 = vmul.f32 0.70710677, %v1952_v45  ;;  %v4805_v35 = vadd.f32 %v1955_v33, %v4794_v3  ;;  %v2107_v5 = vmul.f32 0.5, %v1952_v45 }
 0x1de   : > { %v1957_v22 = vpop.f32.mrf.mxu0 }
 0x1df   : > { %3318 = verf.f32 %v2171_v11  ;;  %v2172_v2 = vmul.f32 0.70710677, %v4805_v35  ;;  %v4809_v34 = vadd.f32 %v1957_v22, %v4798_v39 }
 0x1e0   : > { %v1959_v63 = vpop.f32.mrf.mxu0 }
 0x1e1   : > { %v2173_v47 = vmul.f32 0.70710677, %v4809_v34  ;;  %v1960_v7 = vadd.f32 %v1959_v63, %v4794_v3  ;;  %3320 = verf.f32 %v2172_v2  ;;  %v2108_v63 = vmul.f32 0.5, %v4805_v35 }
 0x1e2   : > { %v1961_v41 = vpop.f32.mrf.mxu0 }
 0x1e3   : > { %v2174_v28 = vmul.f32 0.70710677, %v1960_v7  ;;  %v1962_v25 = vadd.f32 %v1961_v41, %v4798_v39  ;;  %3322 = verf.f32 %v2173_v47  ;;  %v2110_v20 = vmul.f32 0.5, %v1960_v7 }
 0x1e4   : > { %v1965_v57 = vpop.f32.mrf.mxu0  ;;  %v2109_v47 = vmul.f32 0.5, %v4809_v34 }
 0x1e5   : > { %3324 = verf.f32 %v2174_v28  ;;  %v2175_v14 = vmul.f32 0.70710677, %v1962_v25  ;;  %v4815_v58 = vadd.f32 %v1965_v57, %v4794_v3  ;;  %v2111_v21 = vmul.f32 0.5, %v1962_v25 }
 0x1e6   : > { %v1967_v15 = vpop.f32.mrf.mxu0  ;;  %v3313_v31 = vpop.eup %3312 }
 0x1e7   : > { %3326 = verf.f32 %v2175_v14  ;;  %v2176_v49 = vmul.f32 0.70710677, %v4815_v58  ;;  %v4819_v51 = vadd.f32 %v1967_v15, %v4798_v39  ;;  %v2296_v16 = vadd.f32 1.0, %v3313_v31 }
 0x1e8   : > { %v1969_v12 = vpop.f32.mrf.mxu0  ;;  %v3315_v60 = vpop.eup %3314 }
 0x1e9   : > { %v4822_v29 = vadd.f32 %v1969_v12, %v4794_v3  ;;  %v2177_v38 = vmul.f32 0.70710677, %v4819_v51  ;;  %3328 = verf.f32 %v2176_v49  ;;  %v2297_v43 = vadd.f32 1.0, %v3315_v60 }
 0x1ea   : > { %v3317_v19 = vpop.eup %3316  ;;  %v1971_v13 = vpop.f32.mrf.mxu0  ;;  %v2360_v32 = vmul.f32 %v2296_v16, %v2104_v1 }
 0x1eb   : > { %v2298_v52 = vadd.f32 1.0, %v3317_v19  ;;  %v2178_v17 = vmul.f32 0.70710677, %v4822_v29  ;;  %v4827_v59 = vadd.f32 %v1971_v13, %v4798_v39  ;;  %3330 = verf.f32 %v2177_v38 }
 0x1ec   : > { %v3319_v9 = vpop.eup %3318  ;;  %v1975_v50 = vpop.f32.mrf.mxu0  ;;  %v2361_v55 = vmul.f32 %v2297_v43, %v2105_v23  ;;  %v2114_v38 = vmul.f32 0.5, %v4822_v29 }
 0x1ed   : > { %3332 = verf.f32 %v2178_v17  ;;  %v2179_v61 = vmul.f32 0.70710677, %v4827_v59  ;;  %v4831_v36 = vadd.f32 %v1975_v50, %v4794_v3  ;;  %v2299_v0 = vadd.f32 1.0, %v3319_v9 }
 0x1ee   : > { %v1977_v46 = vpop.f32.mrf.mxu0  ;;  %v2362_v56 = vmul.f32 %v2298_v52, %v2106_v10  ;;  %v3321_v27 = vpop.eup %3320  ;;  %v2115_v10 = vmul.f32 0.5, %v4827_v59  ;;  %v2112_v59 = vmul.f32 0.5, %v4815_v58 }
 0x1ef   : > { %3334 = verf.f32 %v2179_v61  ;;  %v4834_v30 = vadd.f32 %v1977_v46, %v4798_v39  ;;  %v2363_v53 = vmul.f32 %v2299_v0, %v2107_v5  ;;  %v2180_v44 = vmul.f32 0.70710677, %v4831_v36 }
 0x1f0   : > { %v1979_v62 = vpop.f32.mrf.mxu0  ;;  %v3323_v26 = vpop.eup %3322  ;;  %v2424_v42 = vpack.c.bf16 %v2362_v56, %v2360_v32  ;;  %v2300_v11 = vadd.f32 1.0, %v3321_v27  ;;  %v2113_v0 = vmul.f32 0.5, %v4819_v51 }
 0x1f1   : > { %v2181_v24 = vmul.f32 0.70710677, %v4834_v30  ;;  %v4839_v4 = vadd.f32 %v1979_v62, %v4794_v3  ;;  %v2425_v37 = vpack.c.bf16 %v2363_v53, %v2361_v55  ;;  %v2301_v54 = vadd.f32 1.0, %v3323_v26 }
 0x1f2   : > { %v3325_v40 = vpop.eup %3324  ;;  %v1981_v18 = vpop.f32.mrf.mxu0  ;;  %v2364_v35 = vmul.f32 %v2300_v11, %v2108_v63 }
 0x1f3   : > { %v2302_v6 = vadd.f32 1.0, %v3325_v40  ;;  %3336 = verf.f32 %v2181_v24  ;;  %v4842_v48 = vadd.f32 %v1981_v18, %v4798_v39  ;;  %v2182_v45 = vmul.f32 0.70710677, %v4839_v4  ;;  %2623 = vmatprep.mubr.bf16.mxu1 %v2425_v37 }
 0x1f4   : > { %v3327_v8 = vpop.eup %3326  ;;  %v1985_v33 = vpop.f32.mrf.mxu0  ;;  %3338 = verf.f32 %v2180_v44  ;;  %2624 = vmatmul.mubr.bf16.vlgmr.msra.gmra.mxu1 %v2424_v42  ;;  %v2365_v15 = vmul.f32 %v2301_v54, %v2109_v47  ;;  %v2117_v18 = vmul.f32 0.5, %v4834_v30  ;;  %v2118_v54 = vmul.f32 0.5, %v4839_v4 }
 0x1f5   : > { %v2303_v22 = vadd.f32 1.0, %v3327_v8  ;;  %v2183_v2 = vmul.f32 0.70710677, %v4842_v48  ;;  %3340 = verf.f32 %v2182_v45  ;;  %v4849_v41 = vadd.f32 %v1985_v33, %v4794_v3 }
 0x1f6   : > { %v1987_v7 = vpop.f32.mrf.mxu0  ;;  %v2366_v28 = vmul.f32 %v2302_v6, %v2110_v20  ;;  %v3329_v14 = vpop.eup %3328  ;;  %v2119_v11 = vmul.f32 0.5, %v4842_v48 }
 0x1f7   : > { %v2367_v25 = vmul.f32 %v2303_v22, %v2111_v21  ;;  %3342 = verf.f32 %v2183_v2  ;;  %v4852_v57 = vadd.f32 %v1987_v7, %v4798_v39  ;;  %v2184_v49 = vmul.f32 0.70710677, %v4849_v41 }
 0x1f8   : > { %v1989_v31 = vpop.f32.mrf.mxu0  ;;  %v3331_v12 = vpop.eup %3330  ;;  %v2426_v50 = vpack.c.bf16 %v2366_v28, %v2364_v35  ;;  %v2304_v5 = vadd.f32 1.0, %v3329_v14  ;;  %v2116_v7 = vmul.f32 0.5, %v4831_v36 }
 0x1f9   : > { %v2185_v34 = vmul.f32 0.70710677, %v4852_v57  ;;  %v4857_v60 = vadd.f32 %v1989_v31, %v4794_v3  ;;  %v2427_v52 = vpack.c.bf16 %v2367_v25, %v2365_v15  ;;  %3344 = verf.f32 %v2184_v49 }
 0x1fa   : > { %v3333_v19 = vpop.eup %3332  ;;  %v1991_v13 = vpop.f32.mrf.mxu0  ;;  %v2305_v16 = vadd.f32 1.0, %v3331_v12  ;;  %v2368_v24 = vmul.f32 %v2304_v5, %v2112_v59 }
 0x1fb   : > { %v2306_v17 = vadd.f32 1.0, %v3333_v19  ;;  %v2186_v9 = vmul.f32 0.70710677, %v4857_v60  ;;  %3346 = verf.f32 %v2185_v34  ;;  %v4863_v61 = vadd.f32 %v1991_v13, %v4798_v39  ;;  %2631 = vmatprep.mubr.bf16.mxu1 %v2427_v52 }
 0x1fc   : > { %v3335_v43 = vpop.eup %3334  ;;  %v1995_v23 = vpop.f32.mrf.mxu0  ;;  %2632 = vmatmul.mubr.bf16.gmra.mxu1 %v2426_v50  ;;  %v2369_v26 = vmul.f32 %v2305_v16, %v2113_v0 }
 0x1fd   : > { %v2307_v46 = vadd.f32 1.0, %v3335_v43  ;;  %3348 = verf.f32 %v2186_v9  ;;  %v4866_v29 = vadd.f32 %v1995_v23, %v4794_v3  ;;  %v2187_v1 = vmul.f32 0.70710677, %v4863_v61 }
 0x1fe   : > { %v1997_v56 = vpop.f32.mrf.mxu0  ;;  %v2370_v27 = vmul.f32 %v2306_v17, %v2114_v38 }
 0x1ff   : > { %v2371_v62 = vmul.f32 %v2307_v46, %v2115_v10  ;;  %v4872_v55 = vadd.f32 %v1997_v56, %v4798_v39  ;;  %3350 = verf.f32 %v2187_v1  ;;  %v2188_v32 = vmul.f32 0.70710677, %v4866_v29 }
 0x200   : > { %v3337_v53 = vpop.eup %3336  ;;  %v1999_v44 = vpop.f32.mrf.mxu0  ;;  %v2428_v21 = vpack.c.bf16 %v2370_v27, %v2368_v24  ;;  %v2122_v46 = vmul.f32 0.5, %v4857_v60  ;;  %v2121_v1 = vmul.f32 0.5, %v4852_v57  ;;  %v2123_v56 = vmul.f32 0.5, %v4863_v61 }
 0x201   : > { %v2189_v40 = vmul.f32 0.70710677, %v4872_v55  ;;  %v3339_v51 = vpop.eup %3338  ;;  %v2309_v37 = vadd.f32 1.0, %v3337_v53  ;;  %v4878_v58 = vadd.f32 %v1999_v44, %v4794_v3  ;;  %v2429_v42 = vpack.c.bf16 %v2371_v62, %v2369_v26 }
 0x202   : > { %v2001_v6 = vpop.f32.mrf.mxu0  ;;  %v3341_v8 = vpop.eup %3340  ;;  %v2308_v2 = vadd.f32 1.0, %v3339_v51  ;;  %v2120_v53 = vmul.f32 0.5, %v4849_v41  ;;  %v2125_v57 = vmul.f32 0.5, %v4872_v55 }
 0x203   : > { %3352 = verf.f32 %v2189_v40  ;;  %v4882_v20 = vadd.f32 %v2001_v6, %v4798_v39  ;;  %v2310_v33 = vadd.f32 1.0, %v3341_v8  ;;  %v2190_v30 = vmul.f32 0.70710677, %v4878_v58  ;;  %2639 = vmatprep.mubr.bf16.mxu1 %v2429_v42 }
 0x204   : > { %v3343_v45 = vpop.eup %3342  ;;  %3354 = verf.f32 %v2188_v32  ;;  %v2005_v22 = vpop.f32.mrf.mxu0  ;;  %2640 = vmatmul.mubr.bf16.gmra.mxu1 %v2428_v21  ;;  %v2373_v28 = vmul.f32 %v2309_v37, %v2117_v18  ;;  %v2372_v34 = vmul.f32 %v2308_v2, %v2116_v7  ;;  %v2126_v37 = vmul.f32 0.5, %v4878_v58 }
 0x205   : > { %v2311_v63 = vadd.f32 1.0, %v3343_v45  ;;  %v2191_v47 = vmul.f32 0.70710677, %v4882_v20  ;;  %v4888_v4 = vadd.f32 %v2005_v22, %v4794_v3  ;;  %3356 = verf.f32 %v2190_v30 }
 0x206   : > { %v2007_v25 = vpop.f32.mrf.mxu0  ;;  %v2374_v14 = vmul.f32 %v2310_v33, %v2118_v54  ;;  %v3345_v49 = vpop.eup %3344  ;;  %v2127_v45 = vmul.f32 0.5, %v4882_v20  ;;  %v2124_v20 = vmul.f32 0.5, %v4866_v29 }
 0x207   : > { %v2375_v48 = vmul.f32 %v2311_v63, %v2119_v11  ;;  %3358 = verf.f32 %v2191_v47  ;;  %v2192_v15 = vmul.f32 0.70710677, %v4888_v4  ;;  %v4893_v31 = vadd.f32 %v2007_v25, %v4798_v39 }
 0x208   : > { %v2009_v12 = vpop.f32.mrf.mxu0  ;;  %v3347_v35 = vpop.eup %3346  ;;  %v2430_v50 = vpack.c.bf16 %v2374_v14, %v2372_v34  ;;  %v2312_v5 = vadd.f32 1.0, %v3345_v49 }
 0x209   : > { %v4896_v19 = vadd.f32 %v2009_v12, %v4794_v3  ;;  %v2431_v38 = vpack.c.bf16 %v2375_v48, %v2373_v28  ;;  %v2193_v13 = vmul.f32 0.70710677, %v4893_v31  ;;  %3360 = verf.f32 %v2192_v15 }
 0x20a   : > { %v3349_v36 = vpop.eup %3348  ;;  %v2011_v52 = vpop.f32.mrf.mxu0  ;;  %v2313_v43 = vadd.f32 1.0, %v3347_v35  ;;  %v2376_v18 = vmul.f32 %v2312_v5, %v2120_v53 }
 0x20b   : > { %v2314_v17 = vadd.f32 1.0, %v3349_v36  ;;  %v2194_v9 = vmul.f32 0.70710677, %v4896_v19  ;;  %2647 = vmatprep.mubr.bf16.mxu1 %v2431_v38  ;;  %3362 = verf.f32 %v2193_v13  ;;  %v4901_v16 = vadd.f32 %v2011_v52, %v4798_v39 }
 0x20c   : > { %v2015_v10 = vpop.f32.mrf.mxu0  ;;  %v3351_v23 = vpop.eup %3350  ;;  %2648 = vmatmul.mubr.bf16.gmra.mxu1 %v2430_v50  ;;  %v2377_v44 = vmul.f32 %v2313_v43, %v2121_v1 }
 0x20d   : > { %3364 = verf.f32 %v2194_v9  ;;  %v4905_v0 = vadd.f32 %v2015_v10, %v4794_v3  ;;  %v2315_v59 = vadd.f32 1.0, %v3351_v23  ;;  %v2195_v27 = vmul.f32 0.70710677, %v4901_v16 }
 0x20e   : > { %v2017_v62 = vpop.f32.mrf.mxu0  ;;  %v2378_v26 = vmul.f32 %v2314_v17, %v2122_v46 }
 0x20f   : > { %v4912_v32 = vadd.f32 %v2017_v62, %v4798_v39  ;;  %v2379_v24 = vmul.f32 %v2315_v59, %v2123_v56  ;;  %3366 = verf.f32 %v2195_v27  ;;  %v2196_v61 = vmul.f32 0.70710677, %v4905_v0 }
 0x210   : > { %v3353_v60 = vpop.eup %3352  ;;  %v2019_v40 = vpop.f32.mrf.mxu0  ;;  %v2432_v11 = vpack.c.bf16 %v2378_v26, %v2376_v18  ;;  %v2130_v56 = vmul.f32 0.5, %v4896_v19  ;;  %v2129_v27 = vmul.f32 0.5, %v4893_v31  ;;  %v2131_v62 = vmul.f32 0.5, %v4901_v16 }
 0x211   : > { %v3355_v51 = vpop.eup %3354  ;;  %v2197_v6 = vmul.f32 0.70710677, %v4912_v32  ;;  %v4919_v41 = vadd.f32 %v2019_v40, %v4794_v3  ;;  %v2433_v8 = vpack.c.bf16 %v2379_v24, %v2377_v44  ;;  %v2317_v21 = vadd.f32 1.0, %v3353_v60 }
 0x212   : > { %v2021_v42 = vpop.f32.mrf.mxu0  ;;  %v3357_v54 = vpop.eup %3356  ;;  %v2316_v30 = vadd.f32 1.0, %v3355_v51  ;;  %v2128_v44 = vmul.f32 0.5, %v4888_v4  ;;  %v2133_v4 = vmul.f32 0.5, %v4912_v32 }
 0x213   : > { %v4923_v33 = vadd.f32 %v2021_v42, %v4798_v39  ;;  %v2318_v22 = vadd.f32 1.0, %v3357_v54  ;;  %3368 = verf.f32 %v2197_v6  ;;  %v2198_v58 = vmul.f32 0.70710677, %v4919_v41  ;;  %2655 = vmatprep.mubr.bf16.mxu1 %v2433_v8 }
 0x214   : > { %v3359_v55 = vpop.eup %3358  ;;  %v2025_v2 = vpop.f32.mrf.mxu0  ;;  %3370 = verf.f32 %v2196_v61  ;;  %2656 = vmatmul.mubr.bf16.gmra.mxu1 %v2432_v11  ;;  %v2381_v14 = vmul.f32 %v2317_v21, %v2125_v57  ;;  %v2380_v49 = vmul.f32 %v2316_v30, %v2124_v20 }
 0x215   : > { %v2319_v63 = vadd.f32 1.0, %v3359_v55  ;;  %v2199_v47 = vmul.f32 0.70710677, %v4923_v33  ;;  %v4928_v7 = vadd.f32 %v2025_v2, %v4794_v3  ;;  %v2382_v28 = vmul.f32 %v2318_v22, %v2126_v37 }
 0x216   : > { %3372 = verf.f32 %v2198_v58  ;;  %v2027_v25 = vpop.f32.mrf.mxu0  ;;  %v3361_v15 = vpop.eup %3360  ;;  %v2134_v22 = vmul.f32 0.5, %v4919_v41  ;;  %v2135_v2 = vmul.f32 0.5, %v4923_v33 }
 0x217   : > { %v2383_v48 = vmul.f32 %v2319_v63, %v2127_v45  ;;  %3374 = verf.f32 %v2199_v47  ;;  %v2200_v12 = vmul.f32 0.70710677, %v4928_v7  ;;  %v4933_v35 = vadd.f32 %v2027_v25, %v4798_v39 }
 0x218   : > { %v2029_v34 = vpop.f32.mrf.mxu0  ;;  %v3363_v38 = vpop.eup %3362  ;;  %v2434_v9 = vpack.c.bf16 %v2382_v28, %v2380_v49  ;;  %v2320_v1 = vadd.f32 1.0, %v3361_v15  ;;  %v2132_v28 = vmul.f32 0.5, %v4905_v0 }
 0x219   : > { %v4936_v36 = vadd.f32 %v2029_v34, %v4794_v3  ;;  %v2435_v13 = vpack.c.bf16 %v2383_v48, %v2381_v14  ;;  %v2201_v52 = vmul.f32 0.70710677, %v4933_v35  ;;  %3376 = verf.f32 %v2200_v12 }
 0x21a   : > { %v3365_v29 = vpop.eup %3364  ;;  %v2031_v17 = vpop.f32.mrf.mxu0  ;;  %v2321_v23 = vadd.f32 1.0, %v3363_v38  ;;  %v2384_v61 = vmul.f32 %v2320_v1, %v2128_v44 }
 0x21b   : > { %v2322_v50 = vadd.f32 1.0, %v3365_v29  ;;  %v2202_v43 = vmul.f32 0.70710677, %v4936_v36  ;;  %v4941_v10 = vadd.f32 %v2031_v17, %v4798_v39  ;;  %2663 = vmatprep.mubr.bf16.mxu1 %v2435_v13  ;;  %3378 = verf.f32 %v2201_v52 }
 0x21c   : > { %v2035_v5 = vpop.f32.mrf.mxu0  ;;  %v3367_v46 = vpop.eup %3366  ;;  %2664 = vmatmul.mubr.bf16.gmra.mxu1 %v2434_v9  ;;  %v2385_v19 = vmul.f32 %v2321_v23, %v2129_v27  ;;  %v2138_v9 = vmul.f32 0.5, %v4936_v36 }
 0x21d   : > { %3380 = verf.f32 %v2202_v43  ;;  %v2203_v59 = vmul.f32 0.70710677, %v4941_v10  ;;  %v2323_v53 = vadd.f32 1.0, %v3367_v46  ;;  %v4948_v26 = vadd.f32 %v2035_v5, %v4794_v3 }
 0x21e   : > { %v2037_v60 = vpop.f32.mrf.mxu0  ;;  %v2386_v24 = vmul.f32 %v2322_v50, %v2130_v56  ;;  %v2139_v56 = vmul.f32 0.5, %v4941_v10 }
 0x21f   : > { %3382 = verf.f32 %v2203_v59  ;;  %v4952_v40 = vadd.f32 %v2037_v60, %v4798_v39  ;;  %v2387_v51 = vmul.f32 %v2323_v53, %v2131_v62  ;;  %v2204_v18 = vmul.f32 0.70710677, %v4948_v26 }
 0x220   : > { %v2039_v57 = vpop.f32.mrf.mxu0  ;;  %v3369_v31 = vpop.eup %3368  ;;  %v2436_v55 = vpack.c.bf16 %v2386_v24, %v2384_v61  ;;  %v2137_v60 = vmul.f32 0.5, %v4933_v35 }
 0x221   : > { %v2205_v16 = vmul.f32 0.70710677, %v4952_v40  ;;  %v4957_v37 = vadd.f32 %v2039_v57, %v4794_v3  ;;  %v3371_v6 = vpop.eup %3370  ;;  %v2325_v42 = vadd.f32 1.0, %v3369_v31  ;;  %v2437_v54 = vpack.c.bf16 %v2387_v51, %v2385_v19 }
 0x222   : > { %v2041_v8 = vpop.f32.mrf.mxu0  ;;  %3384 = verf.f32 %v2204_v18  ;;  %v2324_v63 = vadd.f32 1.0, %v3371_v6  ;;  %v2136_v19 = vmul.f32 0.5, %v4928_v7 }
 0x223   : > { %v3373_v21 = vpop.eup %3372  ;;  %v2206_v45 = vmul.f32 0.70710677, %v4957_v37  ;;  %v4962_v11 = vadd.f32 %v2041_v8, %v4798_v39  ;;  %3386 = verf.f32 %v2205_v16  ;;  %2671 = vmatprep.mubr.bf16.mxu1 %v2437_v54  ;;  %v2389_v25 = vmul.f32 %v2325_v42, %v2133_v4 }
 0x224   : > { %v3375_v30 = vpop.eup %3374  ;;  %v2326_v58 = vadd.f32 1.0, %v3373_v21  ;;  %v2045_v32 = vpop.f32.mrf.mxu0  ;;  %2672 = vmatmul.mubr.bf16.gmra.mxu1 %v2436_v55  ;;  %v2388_v13 = vmul.f32 %v2324_v63, %v2132_v28 }
 0x225   : > { %v2327_v47 = vadd.f32 1.0, %v3375_v30  ;;  %3388 = verf.f32 %v2206_v45  ;;  %v2207_v20 = vmul.f32 0.70710677, %v4962_v11  ;;  %v4969_v14 = vadd.f32 %v2045_v32, %v4794_v3 }
 0x226   : > { %v2047_v48 = vpop.f32.mrf.mxu0  ;;  %v2390_v41 = vmul.f32 %v2326_v58, %v2134_v22  ;;  %v3377_v49 = vpop.eup %3376  ;;  %v2142_v58 = vmul.f32 0.5, %v4957_v37 }
 0x227   : > { %v2391_v15 = vmul.f32 %v2327_v47, %v2135_v2  ;;  %3390 = verf.f32 %v2207_v20  ;;  %v4972_v33 = vadd.f32 %v2047_v48, %v4798_v39  ;;  %v2208_v12 = vmul.f32 0.70710677, %v4969_v14 }
 0x228   : > { %v2049_v34 = vpop.f32.mrf.mxu0  ;;  %v3379_v38 = vpop.eup %3378  ;;  %v2438_v5 = vpack.c.bf16 %v2390_v41, %v2388_v13  ;;  %v2328_v62 = vadd.f32 1.0, %v3377_v49  ;;  %v2143_v47 = vmul.f32 0.5, %v4962_v11  ;;  %v2141_v48 = vmul.f32 0.5, %v4952_v40 }
 0x229   : > { %v2209_v29 = vmul.f32 0.70710677, %v4972_v33  ;;  %v4977_v0 = vadd.f32 %v2049_v34, %v4794_v3  ;;  %v2439_v52 = vpack.c.bf16 %v2391_v15, %v2389_v25  ;;  %3392 = verf.f32 %v2208_v12 }
 0x22a   : > { %v3381_v17 = vpop.eup %3380  ;;  %v2051_v50 = vpop.f32.mrf.mxu0  ;;  %v2329_v1 = vadd.f32 1.0, %v3379_v38  ;;  %v2392_v4 = vmul.f32 %v2328_v62, %v2136_v19  ;;  %v2140_v25 = vmul.f32 0.5, %v4948_v26 }
 0x22b   : > { %v2330_v43 = vadd.f32 1.0, %v3381_v17  ;;  %v2210_v23 = vmul.f32 0.70710677, %v4977_v0  ;;  %2679 = vmatprep.mubr.bf16.mxu1 %v2439_v52  ;;  %3394 = verf.f32 %v2209_v29  ;;  %v4983_v59 = vadd.f32 %v2051_v50, %v4798_v39 }
 0x22c   : > { %v3383_v46 = vpop.eup %3382  ;;  %v2055_v27 = vpop.f32.mrf.mxu0  ;;  %2680 = vmatmul.mubr.bf16.gmra.mxu1 %v2438_v5  ;;  %v2393_v31 = vmul.f32 %v2329_v1, %v2137_v60  ;;  %v2146_v60 = vmul.f32 0.5, %v4977_v0 }
 0x22d   : > { %v2331_v53 = vadd.f32 1.0, %v3383_v46  ;;  %3396 = verf.f32 %v2210_v23  ;;  %v4986_v36 = vadd.f32 %v2055_v27, %v4794_v3  ;;  %v2211_v44 = vmul.f32 0.70710677, %v4983_v59 }
 0x22e   : > { %v2057_v24 = vpop.f32.mrf.mxu0  ;;  %v2394_v10 = vmul.f32 %v2330_v43, %v2138_v9 }
 0x22f   : > { %v2395_v51 = vmul.f32 %v2331_v53, %v2139_v56  ;;  %v4992_v18 = vadd.f32 %v2057_v24, %v4798_v39  ;;  %v3385_v57 = vpop.eup %3384  ;;  %3398 = verf.f32 %v2211_v44  ;;  %v2212_v61 = vmul.f32 0.70710677, %v4986_v36 }
 0x230   : > { %v2059_v16 = vpop.f32.mrf.mxu0  ;;  %v3387_v6 = vpop.eup %3386  ;;  %v2440_v55 = vpack.c.bf16 %v2394_v10, %v2392_v4  ;;  %v2332_v63 = vadd.f32 1.0, %v3385_v57  ;;  %v2145_v53 = vmul.f32 0.5, %v4972_v33  ;;  %v2147_v24 = vmul.f32 0.5, %v4983_v59 }
 0x231   : > { %v2213_v35 = vmul.f32 0.70710677, %v4992_v18  ;;  %v4997_v8 = vadd.f32 %v2059_v16, %v4794_v3  ;;  %v2441_v54 = vpack.c.bf16 %v2395_v51, %v2393_v31  ;;  %v2333_v22 = vadd.f32 1.0, %v3387_v6 }
 0x232   : > { %v3389_v42 = vpop.eup %3388  ;;  %v2061_v7 = vpop.f32.mrf.mxu0  ;;  %v2396_v26 = vmul.f32 %v2332_v63, %v2140_v25  ;;  %v2144_v57 = vmul.f32 0.5, %v4969_v14  ;;  %v2149_v59 = vmul.f32 0.5, %v4992_v18 }
 0x233   : > { %v2334_v21 = vadd.f32 1.0, %v3389_v42  ;;  %3400 = verf.f32 %v2213_v35  ;;  %v5000_v45 = vadd.f32 %v2061_v7, %v4798_v39  ;;  %v2214_v2 = vmul.f32 0.70710677, %v4997_v8  ;;  %2687 = vmatprep.mubr.bf16.mxu1 %v2441_v54 }
 0x234   : > { %v3391_v30 = vpop.eup %3390  ;;  %3402 = verf.f32 %v2212_v61  ;;  %v2065_v32 = vpop.f32.mrf.mxu0  ;;  %2688 = vmatmul.mubr.bf16.gmra.mxu1 %v2440_v55  ;;  %v2397_v34 = vmul.f32 %v2333_v22, %v2141_v48  ;;  %v2150_v22 = vmul.f32 0.5, %v4997_v8 }
 0x235   : > { %v2335_v20 = vadd.f32 1.0, %v3391_v30  ;;  %v2215_v28 = vmul.f32 0.70710677, %v5000_v45  ;;  %3404 = verf.f32 %v2214_v2  ;;  %v5009_v41 = vadd.f32 %v2065_v32, %v4794_v3 }
 0x236   : > { %v2067_v37 = vpop.f32.mrf.mxu0  ;;  %v2398_v15 = vmul.f32 %v2334_v21, %v2142_v58  ;;  %v3393_v11 = vpop.eup %3392  ;;  %v2151_v58 = vmul.f32 0.5, %v5000_v45  ;;  %v2148_v45 = vmul.f32 0.5, %v4986_v36 }
 0x237   : > { %v2399_v49 = vmul.f32 %v2335_v20, %v2143_v47  ;;  %3406 = verf.f32 %v2215_v28  ;;  %v5012_v12 = vadd.f32 %v2067_v37, %v4798_v39  ;;  %v2216_v38 = vmul.f32 0.70710677, %v5009_v41 }
 0x238   : > { %v2069_v13 = vpop.f32.mrf.mxu0  ;;  %v3395_v29 = vpop.eup %3394  ;;  %v2442_v23 = vpack.c.bf16 %v2398_v15, %v2396_v26  ;;  %v2336_v62 = vadd.f32 1.0, %v3393_v11 }
 0x239   : > { %v2217_v40 = vmul.f32 0.70710677, %v5012_v12  ;;  %v5017_v52 = vadd.f32 %v2069_v13, %v4794_v3  ;;  %v2443_v50 = vpack.c.bf16 %v2399_v49, %v2397_v34  ;;  %3408 = verf.f32 %v2216_v38 }
 0x23a   : > { %v3397_v17 = vpop.eup %3396  ;;  %v2071_v9 = vpop.f32.mrf.mxu0  ;;  %v2337_v5 = vadd.f32 1.0, %v3395_v29  ;;  %v2400_v35 = vmul.f32 %v2336_v62, %v2144_v57 }
 0x23b   : > { %v2338_v43 = vadd.f32 1.0, %v3397_v17  ;;  %3410 = verf.f32 %v2217_v40  ;;  %v2218_v46 = vmul.f32 0.70710677, %v5017_v52  ;;  %v5021_v1 = vadd.f32 %v2071_v9, %v4798_v39  ;;  %2695 = vmatprep.mubr.bf16.mxu1 %v2443_v50 }
 0x23c   : > { %v2075_v56 = vpop.f32.mrf.mxu0  ;;  %v3399_v27 = vpop.eup %3398  ;;  %2696 = vmatmul.mubr.bf16.gmra.mxu1 %v2442_v23  ;;  %v2401_v16 = vmul.f32 %v2337_v5, %v2145_v53  ;;  %v2154_v36 = vmul.f32 0.5, %v5017_v52  ;;  %v2152_v52 = vmul.f32 0.5, %v5009_v41 }
 0x23d   : > { %v5026_v44 = vadd.f32 %v2075_v56, %v4794_v3  ;;  %v2339_v19 = vadd.f32 1.0, %v3399_v27  ;;  %3412 = verf.f32 %v2218_v46  ;;  %v2219_v10 = vmul.f32 0.70710677, %v5021_v1 }
 0x23e   : > { %v2077_v51 = vpop.f32.mrf.mxu0  ;;  %v2402_v31 = vmul.f32 %v2338_v43, %v2146_v60 }
 0x23f   : > { %v5032_v61 = vadd.f32 %v2077_v51, %v4798_v39  ;;  %v2403_v0 = vmul.f32 %v2339_v19, %v2147_v24  ;;  %3414 = verf.f32 %v2219_v10  ;;  %v2220_v42 = vmul.f32 0.70710677, %v5026_v44 }
 0x240   : > { %v3401_v33 = vpop.eup %3400  ;;  %v2079_v6 = vpop.f32.mrf.mxu0  ;;  %v2444_v32 = vpack.c.bf16 %v2402_v31, %v2400_v35  ;;  %v2153_v51 = vmul.f32 0.5, %v5012_v12  ;;  %v2155_v31 = vmul.f32 0.5, %v5021_v1 }
 0x241   : > { %v3403_v4 = vpop.eup %3402  ;;  %v2341_v7 = vadd.f32 1.0, %v3401_v33  ;;  %v2221_v54 = vmul.f32 0.70710677, %v5032_v61  ;;  %v5038_v14 = vadd.f32 %v2079_v6, %v4794_v3  ;;  %v2445_v55 = vpack.c.bf16 %v2403_v0, %v2401_v16 }
 0x242   : > { %v2081_v21 = vpop.f32.mrf.mxu0  ;;  %v3405_v30 = vpop.eup %3404  ;;  %v2340_v63 = vadd.f32 1.0, %v3403_v4  ;;  %v2157_v12 = vmul.f32 0.5, %v5032_v61 }
 0x243   : > { %v5043_v2 = vadd.f32 %v2081_v21, %v4798_v39  ;;  %v2342_v47 = vadd.f32 1.0, %v3405_v30  ;;  %3416 = verf.f32 %v2221_v54  ;;  %v2222_v20 = vmul.f32 0.70710677, %v5038_v14  ;;  %2703 = vmatprep.mubr.bf16.mxu1 %v2445_v55 }
 0x244   : > { %v3407_v18 = vpop.eup %3406  ;;  %v2085_v28 = vpop.f32.mrf.mxu0  ;;  %3418 = verf.f32 %v2220_v42  ;;  %2704 = vmatmul.mubr.bf16.gmra.mxu1 %v2444_v32  ;;  %v2405_v37 = vmul.f32 %v2341_v7, %v2149_v59  ;;  %v2404_v40 = vmul.f32 %v2340_v63, %v2148_v45 }
 0x245   : > { %v2343_v25 = vadd.f32 1.0, %v3407_v18  ;;  %v2223_v48 = vmul.f32 0.70710677, %v5043_v2  ;;  %v5048_v8 = vadd.f32 %v2085_v28, %v4794_v3  ;;  %3420 = verf.f32 %v2222_v20 }
 0x246   : > { %v2087_v15 = vpop.f32.mrf.mxu0  ;;  %v2406_v49 = vmul.f32 %v2342_v47, %v2150_v22  ;;  %v3409_v38 = vpop.eup %3408  ;;  %v2158_v47 = vmul.f32 0.5, %v5038_v14  ;;  %v2159_v28 = vmul.f32 0.5, %v5043_v2 }
 0x247   : > { %v2407_v11 = vmul.f32 %v2343_v25, %v2151_v58  ;;  %3422 = verf.f32 %v2223_v48  ;;  %v2224_v34 = vmul.f32 0.70710677, %v5048_v8  ;;  %v5053_v13 = vadd.f32 %v2087_v15, %v4798_v39 }
 0x248   : > { %v2089_v29 = vpop.f32.mrf.mxu0  ;;  %v3411_v26 = vpop.eup %3410  ;;  %v2446_v56 = vpack.c.bf16 %v2406_v49, %v2404_v40  ;;  %v2344_v27 = vadd.f32 1.0, %v3409_v38  ;;  %v2156_v48 = vmul.f32 0.5, %v5026_v44 }
 0x249   : > { %v5056_v17 = vadd.f32 %v2089_v29, %v4794_v3  ;;  %v2447_v9 = vpack.c.bf16 %v2407_v11, %v2405_v37  ;;  %v2225_v50 = vmul.f32 0.70710677, %v5053_v13  ;;  %3424 = verf.f32 %v2224_v34 }
 0x24a   : > { %v2091_v43 = vpop.f32.mrf.mxu0  ;;  %v3413_v23 = vpop.eup %3412  ;;  %v2345_v62 = vadd.f32 1.0, %v3411_v26  ;;  %v2408_v6 = vmul.f32 %v2344_v27, %v2152_v52  ;;  %v2161_v40 = vmul.f32 0.5, %v5053_v13 }
 0x24b   : > { %v2226_v5 = vmul.f32 0.70710677, %v5056_v17  ;;  %v5062_v46 = vadd.f32 %v2091_v43, %v4798_v39  ;;  %2711 = vmatprep.mubr.bf16.mxu1 %v2447_v9  ;;  %v2346_v53 = vadd.f32 1.0, %v3413_v23  ;;  %3426 = verf.f32 %v2225_v50 }
 0x24c   : > { %v2095_v60 = vpop.f32.mrf.mxu0  ;;  %v3415_v24 = vpop.eup %3414  ;;  %2712 = vmatmul.mubr.bf16.gmra.mxu1 %v2446_v56  ;;  %v2409_v4 = vmul.f32 %v2345_v62, %v2153_v51  ;;  %v2160_v43 = vmul.f32 0.5, %v5048_v8 }
 0x24d   : > { %3428 = verf.f32 %v2226_v5  ;;  %v2227_v19 = vmul.f32 0.70710677, %v5062_v46  ;;  %v5067_v10 = vadd.f32 %v2095_v60, %v4794_v3  ;;  %v2410_v57 = vmul.f32 %v2346_v53, %v2154_v36 }
 0x24e   : > { %v2347_v33 = vadd.f32 1.0, %v3415_v24  ;;  %v2097_v16 = vpop.f32.mrf.mxu0  ;;  %v2162_v36 = vmul.f32 0.5, %v5056_v17  ;;  %v2163_v44 = vmul.f32 0.5, %v5062_v46 }
 0x24f   : > { %3430 = verf.f32 %v2227_v19  ;;  %v2228_v0 = vmul.f32 0.70710677, %v5067_v10  ;;  %v2098_v35 = vadd.f32 %v2097_v16, %v4798_v39  ;;  %v2448_v30 = vpack.c.bf16 %v2410_v57, %v2408_v6 }
 0x250   : > { %v2411_v41 = vmul.f32 %v2347_v33, %v2155_v31  ;;  %v2099_v59 = vpop.f32.mrf.mxu0  ;;  %v3417_v42 = vpop.eup %3416  ;;  %v2164_v8 = vmul.f32 0.5, %v5067_v10  ;;  %v5092_v10 = vld [vmem:[%s5246_s9] ss:$0 sm:$0xff] }
 0x251   : > { %v2100_v7 = vadd.f32 %v2099_v59, %v4794_v3  ;;  %v3419_v54 = vpop.eup %3418  ;;  %v2229_v21 = vmul.f32 0.70710677, %v2098_v35  ;;  %v2349_v58 = vadd.f32 1.0, %v3417_v42  ;;  %3432 = verf.f32 %v2228_v0 }
 0x252   : > { %v2101_v55 = vpop.f32.mrf.mxu0  ;;  %v2449_v1 = vpack.c.bf16 %v2411_v41, %v2409_v4  ;;  %v3421_v22 = vpop.eup %3420  ;;  %v2348_v3 = vadd.f32 1.0, %v3419_v54  ;;  %v2165_v17 = vmul.f32 0.5, %v2098_v35  ;;  %v5087_v35 = vld [vmem:[%s5245_s8] ss:$0 sm:$0xff] }
 0x253   : > { %v2230_v32 = vmul.f32 0.70710677, %v2100_v7  ;;  %v2102_v18 = vadd.f32 %v2101_v55, %v4798_v39  ;;  %v2350_v20 = vadd.f32 1.0, %v3421_v22  ;;  %3434 = verf.f32 %v2229_v21 }
 0x254   : > { %v3423_v63 = vpop.eup %3422  ;;  %2719 = vmatprep.mubr.bf16.mxu1 %v2449_v1  ;;  %v2413_v45 = vmul.f32 %v2349_v58, %v2157_v12  ;;  %v2412_v11 = vmul.f32 %v2348_v3, %v2156_v48  ;;  %v2166_v46 = vmul.f32 0.5, %v2100_v7  ;;  %v3441_v58 = vld [vmem:[%s3740_s21 + $0x3] sm:$0xff]  ;;  %v3442_v3 = vld [vmem:[%s3740_s21 + $0xb] sm:$0xff] }
 0x255   : > { %v2351_v61 = vadd.f32 1.0, %v3423_v63  ;;  %3436 = verf.f32 %v2230_v32  ;;  %v2231_v25 = vmul.f32 0.70710677, %v2102_v18  ;;  %2720 = vmatmul.mubr.bf16.gmra.mxu1 %v2448_v30  ;;  %v2414_v37 = vmul.f32 %v2350_v20, %v2158_v47 }
 0x256   : > { %v3425_v39 = vpop.eup %3424  ;;  %v2167_v31 = vmul.f32 0.5, %v2102_v18 }
 0x257   : > { %v2415_v15 = vmul.f32 %v2351_v61, %v2159_v28  ;;  %3438 = verf.f32 %v2231_v25  ;;  %v2450_v29 = vpack.c.bf16 %v2414_v37, %v2412_v11  ;;  %v2352_v9 = vadd.f32 1.0, %v3425_v39  ;;  %v3443_v39 = vld [vmem:[%s3740_s21 + $0x13] sm:$0xff] }
 0x258   : > { %v3427_v49 = vpop.eup %3426 }
 0x259   : > { %v2451_v14 = vpack.c.bf16 %v2415_v15, %v2413_v45  ;;  %v2353_v38 = vadd.f32 1.0, %v3427_v49  ;;  %v2416_v53 = vmul.f32 %v2352_v9, %v2160_v43  ;;  %v3445_v43 = vld [vmem:[%s3740_s21 + $0x23] sm:$0xff] }
 0x25a   : > { %v3429_v34 = vpop.eup %3428 }
 0x25b   : > { %v2354_v2 = vadd.f32 1.0, %v3429_v34  ;;  %2727 = vmatprep.mubr.bf16.mxu1 %v2451_v14  ;;  %v2417_v23 = vmul.f32 %v2353_v38, %v2161_v40 }
 0x25c   : > { %v3431_v26 = vpop.eup %3430 }
 0x25d   : > { %v2355_v50 = vadd.f32 1.0, %v3431_v26  ;;  %2728 = vmatmul.mubr.bf16.gmra.mxu1 %v2450_v29  ;;  %v2418_v5 = vmul.f32 %v2354_v2, %v2162_v36  ;;  %v3444_v29 = vld [vmem:[%s3740_s21 + $0x1b] sm:$0xff] }
 0x25e   : > { %v3433_v27 = vpop.eup %3432 }
 0x25f   : > { %v2419_v56 = vmul.f32 %v2355_v50, %v2163_v44  ;;  %v2452_v13 = vpack.c.bf16 %v2418_v5, %v2416_v53  ;;  %v2356_v57 = vadd.f32 1.0, %v3433_v27 }
 0x260   : > { %v3435_v62 = vpop.eup %3434 }
 0x261   : > { %v2453_v60 = vpack.c.bf16 %v2419_v56, %v2417_v23  ;;  %v2357_v52 = vadd.f32 1.0, %v3435_v62  ;;  %v2420_v4 = vmul.f32 %v2356_v57, %v2164_v8  ;;  %v3447_v57 = vld [vmem:[%s3740_s21 + $0x33] sm:$0xff] }
 0x262   : > { %v3437_v24 = vpop.eup %3436 }
 0x263   : > { %v2358_v19 = vadd.f32 1.0, %v3437_v24  ;;  %2735 = vmatprep.mubr.bf16.mxu1 %v2453_v60  ;;  %v2421_v16 = vmul.f32 %v2357_v52, %v2165_v17  ;;  %v3446_v60 = vld [vmem:[%s3740_s21 + $0x2b] sm:$0xff] }
 0x264   : > { %v3439_v51 = vpop.eup %3438 }
 0x265   : > { %v2359_v33 = vadd.f32 1.0, %v3439_v51  ;;  %2736 = vmatmul.mubr.bf16.gmra.mxu1 %v2452_v13  ;;  %v2422_v0 = vmul.f32 %v2358_v19, %v2166_v46 }
 0x267   : > { %v2423_v6 = vmul.f32 %v2359_v33, %v2167_v31  ;;  %v2454_v59 = vpack.c.bf16 %v2422_v0, %v2420_v4 }
 0x269   : > { %v2455_v41 = vpack.c.bf16 %v2423_v6, %v2421_v16  ;;  %v3448_v6 = vld [vmem:[%s3740_s21 + $0x3b] sm:$0xff] }
 0x26b   : > { %2743 = vmatprep.mubr.bf16.mxu1 %v2455_v41 }
 0x26d   : > { %2744 = vmatmul.mubr.bf16.gmra.mxu1 %v2454_v59 }
 0x2b4   : > { %v3071_v42 = vpop.f32.mrf.mxu1 }
 0x2b6   : > { %v3072_v7 = vpop.f32.mrf.mxu1 }
 0x2b7   : > { %v3073_v54 = vadd.f32 %v3072_v7, %v3071_v42 }
 0x2b8   : > { %v3074_v12 = vpop.f32.mrf.mxu1 }
 0x2b9   : > { %v2626_v21 = vadd.f32 %v3073_v54, %v5087_v35 }
 0x2ba   : > { %v3075_v55 = vpop.f32.mrf.mxu1 }
 0x2bb   : > { %v2759_v1 = vmul.f32 %v5092_v10, %v2626_v21  ;;  %v3076_v30 = vadd.f32 %v3075_v55, %v3074_v12  ;;  %v3449_v12 = vld [vmem:[%s3740_s21 + $0x43] sm:$0xff] }
 0x2bc   : > { %v3077_v22 = vpop.f32.mrf.mxu1 }
 0x2bd   : > { %v2791_v32 = vadd.f32 %v3441_v58, %v2759_v1  ;;  %v2629_v18 = vadd.f32 %v3076_v30, %v5087_v35 }
 0x2be   : > { %v3078_v63 = vpop.f32.mrf.mxu1 }
 0x2bf   : > { %2823 = vst [vmem:[%s3614_s30] sm:$0xff] %v2791_v32  ;;  %v2760_v47 = vmul.f32 %v5092_v10, %v2629_v18  ;;  %v3079_v20 = vadd.f32 %v3078_v63, %v3077_v22  ;;  %v3450_v32 = vld [vmem:[%s3740_s21 + $0x4b] sm:$0xff] }
 0x2c0   : > { %v3080_v28 = vpop.f32.mrf.mxu1 }
 0x2c1   : > { %v2792_v61 = vadd.f32 %v3442_v3, %v2760_v47  ;;  %v2634_v25 = vadd.f32 %v3079_v20, %v5087_v35 }
 0x2c2   : > { %v3081_v48 = vpop.f32.mrf.mxu1 }
 0x2c3   : > { %2824 = vst [vmem:[%s3614_s30 + $0x8] sm:$0xff] %v2792_v61  ;;  %v2761_v45 = vmul.f32 %v5092_v10, %v2634_v25  ;;  %v3082_v37 = vadd.f32 %v3081_v48, %v3080_v28  ;;  %v3451_v61 = vld [vmem:[%s3740_s21 + $0x53] sm:$0xff] }
 0x2c4   : > { %v3083_v15 = vpop.f32.mrf.mxu1 }
 0x2c5   : > { %v2793_v49 = vadd.f32 %v3443_v39, %v2761_v45  ;;  %v2637_v11 = vadd.f32 %v3082_v37, %v5087_v35 }
 0x2c6   : > { %v3084_v14 = vpop.f32.mrf.mxu1 }
 0x2c7   : > { %2825 = vst [vmem:[%s3614_s30 + $0x10] sm:$0xff] %v2793_v49  ;;  %v2762_v34 = vmul.f32 %v5092_v10, %v2637_v11  ;;  %v3085_v38 = vadd.f32 %v3084_v14, %v3083_v15  ;;  %v3452_v49 = vld [vmem:[%s3740_s21 + $0x5b] sm:$0xff] }
 0x2c8   : > { %v3086_v2 = vpop.f32.mrf.mxu1 }
 0x2c9   : > { %v2794_v26 = vadd.f32 %v3444_v29, %v2762_v34  ;;  %v2642_v40 = vadd.f32 %v3085_v38, %v5087_v35 }
 0x2ca   : > { %v3087_v9 = vpop.f32.mrf.mxu1 }
 0x2cb   : > { %2826 = vst [vmem:[%s3614_s30 + $0x18] sm:$0xff] %v2794_v26  ;;  %v2763_v36 = vmul.f32 %v5092_v10, %v2642_v40  ;;  %v3088_v44 = vadd.f32 %v3087_v9, %v3086_v2  ;;  %v3453_v26 = vld [vmem:[%s3740_s21 + $0x63] sm:$0xff] }
 0x2cc   : > { %v3089_v50 = vpop.f32.mrf.mxu1 }
 0x2cd   : > { %v2795_v23 = vadd.f32 %v3445_v43, %v2763_v36  ;;  %v2645_v5 = vadd.f32 %v3088_v44, %v5087_v35 }
 0x2ce   : > { %v3090_v56 = vpop.f32.mrf.mxu1 }
 0x2cf   : > { %2827 = vst [vmem:[%s3614_s30 + $0x20] sm:$0xff] %v2795_v23  ;;  %v2764_v27 = vmul.f32 %v5092_v10, %v2645_v5  ;;  %v3091_v62 = vadd.f32 %v3090_v56, %v3089_v50  ;;  %v3454_v23 = vld [vmem:[%s3740_s21 + $0x6b] sm:$0xff] }
 0x2d0   : > { %v3092_v53 = vpop.f32.mrf.mxu1 }
 0x2d1   : > { %v2796_v24 = vadd.f32 %v3446_v60, %v2764_v27  ;;  %v2650_v52 = vadd.f32 %v3091_v62, %v5087_v35 }
 0x2d2   : > { %v3093_v19 = vpop.f32.mrf.mxu1 }
 0x2d3   : > { %2828 = vst [vmem:[%s3614_s30 + $0x28] sm:$0xff] %v2796_v24  ;;  %v2765_v13 = vmul.f32 %v5092_v10, %v2650_v52  ;;  %v3094_v51 = vadd.f32 %v3093_v19, %v3092_v53  ;;  %v3455_v24 = vld [vmem:[%s3740_s21 + $0x73] sm:$0xff] }
 0x2d4   : > { %v3095_v17 = vpop.f32.mrf.mxu1 }
 0x2d5   : > { %v2797_v46 = vadd.f32 %v3447_v57, %v2765_v13  ;;  %v2653_v31 = vadd.f32 %v3094_v51, %v5087_v35 }
 0x2d6   : > { %v3096_v33 = vpop.f32.mrf.mxu1 }
 0x2d7   : > { %2829 = vst [vmem:[%s3614_s30 + $0x30] sm:$0xff] %v2797_v46  ;;  %v2766_v8 = vmul.f32 %v5092_v10, %v2653_v31  ;;  %v3097_v16 = vadd.f32 %v3096_v33, %v3095_v17  ;;  %v3456_v46 = vld [vmem:[%s3740_s21 + $0x7b] sm:$0xff] }
 0x2d8   : > { %v3098_v0 = vpop.f32.mrf.mxu1 }
 0x2d9   : > { %v2798_v4 = vadd.f32 %v3448_v6, %v2766_v8  ;;  %v2658_v41 = vadd.f32 %v3097_v16, %v5087_v35 }
 0x2da   : > { %v3099_v59 = vpop.f32.mrf.mxu1 }
 0x2db   : > { %2830 = vst [vmem:[%s3614_s30 + $0x38] sm:$0xff] %v2798_v4  ;;  %v2767_v42 = vmul.f32 %v5092_v10, %v2658_v41  ;;  %v3100_v7 = vadd.f32 %v3099_v59, %v3098_v0  ;;  %v3457_v4 = vld [vmem:[%s3740_s21 + $0x83] sm:$0xff] }
 0x2dc   : > { %v3101_v54 = vpop.f32.mrf.mxu1 }
 0x2dd   : > { %v2799_v21 = vadd.f32 %v3449_v12, %v2767_v42  ;;  %v2661_v55 = vadd.f32 %v3100_v7, %v5087_v35 }
 0x2de   : > { %v3102_v1 = vpop.f32.mrf.mxu1 }
 0x2df   : > { %2831 = vst [vmem:[%s3614_s30 + $0x40] sm:$0xff] %v2799_v21  ;;  %v2768_v30 = vmul.f32 %v5092_v10, %v2661_v55  ;;  %v3103_v22 = vadd.f32 %v3102_v1, %v3101_v54  ;;  %v3458_v21 = vld [vmem:[%s3740_s21 + $0x8b] sm:$0xff] }
 0x2e0   : > { %v3104_v58 = vpop.f32.mrf.mxu1 }
 0x2e1   : > { %v2800_v18 = vadd.f32 %v3450_v32, %v2768_v30  ;;  %v2666_v63 = vadd.f32 %v3103_v22, %v5087_v35 }
 0x2e2   : > { %v3105_v47 = vpop.f32.mrf.mxu1 }
 0x2e3   : > { %2832 = vst [vmem:[%s3614_s30 + $0x48] sm:$0xff] %v2800_v18  ;;  %v2769_v20 = vmul.f32 %v5092_v10, %v2666_v63  ;;  %v3106_v28 = vadd.f32 %v3105_v47, %v3104_v58  ;;  %v3459_v18 = vld [vmem:[%s3740_s21 + $0x93] sm:$0xff] }
 0x2e4   : > { %v3107_v3 = vpop.f32.mrf.mxu1 }
 0x2e5   : > { %v2801_v25 = vadd.f32 %v3451_v61, %v2769_v20  ;;  %v2669_v48 = vadd.f32 %v3106_v28, %v5087_v35 }
 0x2e6   : > { %v3108_v45 = vpop.f32.mrf.mxu1 }
 0x2e7   : > { %2833 = vst [vmem:[%s3614_s30 + $0x50] sm:$0xff] %v2801_v25  ;;  %v2770_v37 = vmul.f32 %v5092_v10, %v2669_v48  ;;  %v3109_v15 = vadd.f32 %v3108_v45, %v3107_v3  ;;  %v3460_v25 = vld [vmem:[%s3740_s21 + $0x9b] sm:$0xff] }
 0x2e8   : > { %v3110_v39 = vpop.f32.mrf.mxu1 }
 0x2e9   : > { %v2802_v11 = vadd.f32 %v3452_v49, %v2770_v37  ;;  %v2674_v14 = vadd.f32 %v3109_v15, %v5087_v35 }
 0x2ea   : > { %v3111_v34 = vpop.f32.mrf.mxu1 }
 0x2eb   : > { %2834 = vst [vmem:[%s3614_s30 + $0x58] sm:$0xff] %v2802_v11  ;;  %v2771_v38 = vmul.f32 %v5092_v10, %v2674_v14  ;;  %v3112_v2 = vadd.f32 %v3111_v34, %v3110_v39  ;;  %v3461_v11 = vld [vmem:[%s3740_s21 + $0xa3] sm:$0xff] }
 0x2ec   : > { %v3113_v29 = vpop.f32.mrf.mxu1 }
 0x2ed   : > { %v2803_v40 = vadd.f32 %v3453_v26, %v2771_v38  ;;  %v2677_v9 = vadd.f32 %v3112_v2, %v5087_v35 }
 0x2ee   : > { %v3114_v36 = vpop.f32.mrf.mxu1 }
 0x2ef   : > { %2835 = vst [vmem:[%s3614_s30 + $0x60] sm:$0xff] %v2803_v40  ;;  %v2772_v44 = vmul.f32 %v5092_v10, %v2677_v9  ;;  %v3115_v50 = vadd.f32 %v3114_v36, %v3113_v29  ;;  %v3462_v40 = vld [vmem:[%s3740_s21 + $0xab] sm:$0xff] }
 0x2f0   : > { %v3116_v43 = vpop.f32.mrf.mxu1 }
 0x2f1   : > { %v2804_v5 = vadd.f32 %v3454_v23, %v2772_v44  ;;  %v2682_v56 = vadd.f32 %v3115_v50, %v5087_v35 }
 0x2f2   : > { %v3117_v27 = vpop.f32.mrf.mxu1 }
 0x2f3   : > { %2836 = vst [vmem:[%s3614_s30 + $0x68] sm:$0xff] %v2804_v5  ;;  %v2773_v62 = vmul.f32 %v5092_v10, %v2682_v56  ;;  %v3118_v53 = vadd.f32 %v3117_v27, %v3116_v43  ;;  %v3463_v5 = vld [vmem:[%s3740_s21 + $0xb3] sm:$0xff] }
 0x2f4   : > { %v3119_v60 = vpop.f32.mrf.mxu1 }
 0x2f5   : > { %v2805_v52 = vadd.f32 %v3455_v24, %v2773_v62  ;;  %v2685_v19 = vadd.f32 %v3118_v53, %v5087_v35 }
 0x2f6   : > { %v3120_v13 = vpop.f32.mrf.mxu1 }
 0x2f7   : > { %2837 = vst [vmem:[%s3614_s30 + $0x70] sm:$0xff] %v2805_v52  ;;  %v2774_v51 = vmul.f32 %v5092_v10, %v2685_v19  ;;  %v3121_v17 = vadd.f32 %v3120_v13, %v3119_v60  ;;  %v3464_v52 = vld [vmem:[%s3740_s21 + $0xbb] sm:$0xff] }
 0x2f8   : > { %v3122_v57 = vpop.f32.mrf.mxu1 }
 0x2f9   : > { %v2806_v31 = vadd.f32 %v3456_v46, %v2774_v51  ;;  %v2690_v33 = vadd.f32 %v3121_v17, %v5087_v35 }
 0x2fa   : > { %v3123_v8 = vpop.f32.mrf.mxu1 }
 0x2fb   : > { %2838 = vst [vmem:[%s3614_s30 + $0x78] sm:$0xff] %v2806_v31  ;;  %v2775_v16 = vmul.f32 %v5092_v10, %v2690_v33  ;;  %v3124_v0 = vadd.f32 %v3123_v8, %v3122_v57  ;;  %v3465_v31 = vld [vmem:[%s3740_s21 + $0xc3] sm:$0xff] }
 0x2fc   : > { %v3125_v6 = vpop.f32.mrf.mxu1 }
 0x2fd   : > { %v2807_v41 = vadd.f32 %v3457_v4, %v2775_v16  ;;  %v2693_v59 = vadd.f32 %v3124_v0, %v5087_v35 }
 0x2fe   : > { %v3126_v42 = vpop.f32.mrf.mxu1 }
 0x2ff   : > { %2839 = vst [vmem:[%s3614_s30 + $0x80] sm:$0xff] %v2807_v41  ;;  %v2776_v7 = vmul.f32 %v5092_v10, %v2693_v59  ;;  %v3127_v54 = vadd.f32 %v3126_v42, %v3125_v6  ;;  %v3466_v41 = vld [vmem:[%s3740_s21 + $0xcb] sm:$0xff] }
 0x300   : > { %v3128_v12 = vpop.f32.mrf.mxu1 }
 0x301   : > { %v2808_v55 = vadd.f32 %v3458_v21, %v2776_v7  ;;  %v2698_v1 = vadd.f32 %v3127_v54, %v5087_v35 }
 0x302   : > { %v3129_v30 = vpop.f32.mrf.mxu1 }
 0x303   : > { %2840 = vst [vmem:[%s3614_s30 + $0x88] sm:$0xff] %v2808_v55  ;;  %v2777_v22 = vmul.f32 %v5092_v10, %v2698_v1  ;;  %v3130_v58 = vadd.f32 %v3129_v30, %v3128_v12  ;;  %v3467_v55 = vld [vmem:[%s3740_s21 + $0xd3] sm:$0xff] }
 0x304   : > { %v3131_v32 = vpop.f32.mrf.mxu1 }
 0x305   : > { %v2809_v63 = vadd.f32 %v3459_v18, %v2777_v22  ;;  %v2701_v47 = vadd.f32 %v3130_v58, %v5087_v35 }
 0x306   : > { %v3132_v20 = vpop.f32.mrf.mxu1 }
 0x307   : > { %2841 = vst [vmem:[%s3614_s30 + $0x90] sm:$0xff] %v2809_v63  ;;  %v2778_v28 = vmul.f32 %v5092_v10, %v2701_v47  ;;  %v3133_v3 = vadd.f32 %v3132_v20, %v3131_v32  ;;  %v3468_v63 = vld [vmem:[%s3740_s21 + $0xdb] sm:$0xff] }
 0x308   : > { %v3134_v61 = vpop.f32.mrf.mxu1 }
 0x309   : > { %v2810_v48 = vadd.f32 %v3460_v25, %v2778_v28  ;;  %v2706_v45 = vadd.f32 %v3133_v3, %v5087_v35 }
 0x30a   : > { %v3135_v37 = vpop.f32.mrf.mxu1 }
 0x30b   : > { %2842 = vst [vmem:[%s3614_s30 + $0x98] sm:$0xff] %v2810_v48  ;;  %v2779_v15 = vmul.f32 %v5092_v10, %v2706_v45  ;;  %v3136_v39 = vadd.f32 %v3135_v37, %v3134_v61  ;;  %v3469_v48 = vld [vmem:[%s3740_s21 + $0xe3] sm:$0xff] }
 0x30c   : > { %v3137_v49 = vpop.f32.mrf.mxu1 }
 0x30d   : > { %v2811_v14 = vadd.f32 %v3461_v11, %v2779_v15  ;;  %v2709_v34 = vadd.f32 %v3136_v39, %v5087_v35 }
 0x30e   : > { %v3138_v38 = vpop.f32.mrf.mxu1 }
 0x30f   : > { %2843 = vst [vmem:[%s3614_s30 + $0xa0] sm:$0xff] %v2811_v14  ;;  %v2780_v2 = vmul.f32 %v5092_v10, %v2709_v34  ;;  %v3139_v29 = vadd.f32 %v3138_v38, %v3137_v49  ;;  %v3470_v14 = vld [vmem:[%s3740_s21 + $0xeb] sm:$0xff] }
 0x310   : > { %v3140_v26 = vpop.f32.mrf.mxu1 }
 0x311   : > { %v2812_v9 = vadd.f32 %v3462_v40, %v2780_v2  ;;  %v2714_v36 = vadd.f32 %v3139_v29, %v5087_v35  ;;  %v3471_v40 = vld [vmem:[%s3740_s21 + $0xf3] sm:$0xff] }
 0x312   : > { %v3141_v44 = vpop.f32.mrf.mxu1 }
 0x313   : > { %2844 = vst [vmem:[%s3614_s30 + $0xa8] sm:$0xff] %v2812_v9  ;;  %v2781_v50 = vmul.f32 %v5092_v10, %v2714_v36  ;;  %v3142_v43 = vadd.f32 %v3141_v44, %v3140_v26 }
 0x315   : > { %v3143_v23 = vpop.f32.mrf.mxu1  ;;  %v2813_v56 = vadd.f32 %v3463_v5, %v2781_v50  ;;  %v2717_v27 = vadd.f32 %v3142_v43, %v5087_v35  ;;  %v3472_v50 = vld [vmem:[%s3740_s21 + $0xfb] sm:$0xff] }
 0x317   : > { %v3144_v62 = vpop.f32.mrf.mxu1  ;;  %2845 = vst [vmem:[%s3614_s30 + $0xb0] sm:$0xff] %v2813_v56  ;;  %v2782_v53 = vmul.f32 %v5092_v10, %v2717_v27 }
 0x318   : > { %v3145_v60 = vadd.f32 %v3144_v62, %v3143_v23 }
 0x319   : > { %v3146_v24 = vpop.f32.mrf.mxu1  ;;  %v2814_v19 = vadd.f32 %v3464_v52, %v2782_v53 }
 0x31a   : > { %v2722_v13 = vadd.f32 %v3145_v60, %v5087_v35 }
 0x31b   : > { %v3147_v51 = vpop.f32.mrf.mxu1  ;;  %2846 = vst [vmem:[%s3614_s30 + $0xb8] sm:$0xff] %v2814_v19 }
 0x31c   : > { %v2783_v17 = vmul.f32 %v5092_v10, %v2722_v13  ;;  %v3148_v57 = vadd.f32 %v3147_v51, %v3146_v24 }
 0x31d   : > { %v3149_v46 = vpop.f32.mrf.mxu1 }
 0x31e   : > { %v2815_v33 = vadd.f32 %v3465_v31, %v2783_v17  ;;  %v2725_v8 = vadd.f32 %v3148_v57, %v5087_v35 }
 0x31f   : > { %v3150_v16 = vpop.f32.mrf.mxu1 }
 0x320   : > { %2847 = vst [vmem:[%s3614_s30 + $0xc0] sm:$0xff] %v2815_v33  ;;  %v2784_v0 = vmul.f32 %v5092_v10, %v2725_v8  ;;  %v3151_v6 = vadd.f32 %v3150_v16, %v3149_v46 }
 0x321   : > { %v3152_v4 = vpop.f32.mrf.mxu1 }
 0x322   : > { %v2816_v59 = vadd.f32 %v3466_v41, %v2784_v0  ;;  %v2730_v42 = vadd.f32 %v3151_v6, %v5087_v35 }
 0x323   : > { %v3153_v7 = vpop.f32.mrf.mxu1 }
 0x324   : > { %2848 = vst [vmem:[%s3614_s30 + $0xc8] sm:$0xff] %v2816_v59  ;;  %v2785_v54 = vmul.f32 %v5092_v10, %v2730_v42  ;;  %v3154_v12 = vadd.f32 %v3153_v7, %v3152_v4 }
 0x325   : > { %v3155_v21 = vpop.f32.mrf.mxu1 }
 0x326   : > { %v2817_v1 = vadd.f32 %v3467_v55, %v2785_v54  ;;  %v2733_v30 = vadd.f32 %v3154_v12, %v5087_v35 }
 0x327   : > { %v3156_v22 = vpop.f32.mrf.mxu1 }
 0x328   : > { %2849 = vst [vmem:[%s3614_s30 + $0xd0] sm:$0xff] %v2817_v1  ;;  %v2786_v58 = vmul.f32 %v5092_v10, %v2733_v30  ;;  %v3157_v32 = vadd.f32 %v3156_v22, %v3155_v21 }
 0x329   : > { %v3158_v18 = vpop.f32.mrf.mxu1 }
 0x32a   : > { %v2818_v47 = vadd.f32 %v3468_v63, %v2786_v58  ;;  %v2738_v20 = vadd.f32 %v3157_v32, %v5087_v35 }
 0x32b   : > { %v3159_v28 = vpop.f32.mrf.mxu1 }
 0x32c   : > { %2850 = vst [vmem:[%s3614_s30 + $0xd8] sm:$0xff] %v2818_v47  ;;  %v2787_v3 = vmul.f32 %v5092_v10, %v2738_v20  ;;  %v3160_v61 = vadd.f32 %v3159_v28, %v3158_v18 }
 0x32d   : > { %v3161_v25 = vpop.f32.mrf.mxu1 }
 0x32e   : > { %v2819_v45 = vadd.f32 %v3469_v48, %v2787_v3  ;;  %v2741_v37 = vadd.f32 %v3160_v61, %v5087_v35 }
 0x32f   : > { %v3162_v15 = vpop.f32.mrf.mxu1 }
 0x330   : > { %2851 = vst [vmem:[%s3614_s30 + $0xe0] sm:$0xff] %v2819_v45  ;;  %v2788_v39 = vmul.f32 %v5092_v10, %v2741_v37  ;;  %v3163_v49 = vadd.f32 %v3162_v15, %v3161_v25 }
 0x331   : > { %v3164_v11 = vpop.f32.mrf.mxu1 }
 0x332   : > { %v2820_v34 = vadd.f32 %v3470_v14, %v2788_v39  ;;  %v2746_v38 = vadd.f32 %v3163_v49, %v5087_v35 }
 0x333   : > { %v3165_v2 = vpop.f32.mrf.mxu1 }
 0x334   : > { %2852 = vst [vmem:[%s3614_s30 + $0xe8] sm:$0xff] %v2820_v34  ;;  %v2789_v29 = vmul.f32 %v5092_v10, %v2746_v38  ;;  %v3166_v26 = vadd.f32 %v3165_v2, %v3164_v11 }
 0x336   : > { %v2821_v9 = vadd.f32 %v3471_v40, %v2789_v29  ;;  %v2749_v36 = vadd.f32 %v3166_v26, %v5087_v35 }
 0x338   : > { %2853 = vst [vmem:[%s3614_s30 + $0xf0] sm:$0xff] %v2821_v9  ;;  %v2790_v44 = vmul.f32 %v5092_v10, %v2749_v36 }
 0x33a   : > { %v2822_v43 = vadd.f32 %v3472_v50, %v2790_v44 }
 0x33c   : > { %2854 = vst [vmem:[%s3614_s30 + $0xf8] sm:$0xff] %v2822_v43 }
 0x33d PF: > { %s20_s17 = sadd.s32 1, %s3513_s17   ;;  %s5260_s12 = sld [smem:[#allocation7_spill]] }
 0x33e   : > { %p17_p10 = scmp.ge.s32.totalorder %s20_s17, 6   ;;  %s5261_s13 = smov %s3505_s15 }
 0x33f   : > { %s5262_s14 = smov %s3509_s16  ;;  %s5263_s15 = smov %s5266_s18 }
 0x340   :  { %19 = sbr.rel (!%p17_p10) target bundleno = 3 (0x3), region = 182 }
 0x343   : > { %s5264_s16 = smov %s5260_s12 }
 0x345   :  { %2885 = vsyncmov [#allocation3] }
 0x348   :  { %s2886_s30 = vpop.sfrf %2885 }
 0x349   :  { %p3053_p11 = scmp.ne.s32.totalorder %s2886_s30, 0 }
 0x34b   :  { %2890 = shalt.err (%p3053_p11)  }
 0x34c   :  { %2892 = vsyncmov [#allocation3 + $0x1] }
 0x34f   :  { %s2893_s21 = vpop.sfrf %2892 }
 0x350   :  { %p3054_p12 = scmp.ne.s32.totalorder %s2893_s21, 0 }
 0x352   :  { %2897 = shalt.err (%p3054_p12)  }

</bundles_post_ra>
